<compile_context>
chip_gen: v7x
topology: tpu7x:2x2x1
jax: 0.10.0
libtpu: 0.0.40
codegen_flags: <defaults>
</compile_context>

<pallas_src>
import functools
import math

import jax
import jax.numpy as jnp
from jax.experimental import pallas as pl
from jax.experimental.pallas import tpu as pltpu


def _round_up(x, m):
    return ((x + m - 1) // m) * m


# ----------------------------------------------------------------------------
# Pallas kernels
# ----------------------------------------------------------------------------
def _matmul_bias_relu_kernel(x_ref, w_ref, b_ref, o_ref):
    # x: (tm, K), w: (K, N), b: (1, N)  ->  relu(x @ w + b)
    acc = jnp.dot(x_ref[...], w_ref[...], preferred_element_type=jnp.float32)
    o_ref[...] = jnp.maximum(acc + b_ref[...], 0.0).astype(o_ref.dtype)


def _fused_noisy_head_kernel(x_ref, w1_ref, sw1_ref, ew1_ref, b1_ref, sb1_ref,
                             eb1_ref, w2_ref, sw2_ref, ew2_ref, b2_ref, sb2_ref,
                             eb2_ref, o_ref, h_acc):
    """Fused NoisyLinear(conv_out->512) + ReLU + NoisyLinear(512->A).

    Grid axis 0 tiles the first layer's K (conv_out) dimension.  The hidden
    activation is accumulated in VMEM scratch; on the last K step the bias/ReLU
    is applied and the (small) second noisy matmul runs in the same kernel.
    """
    k = pl.program_id(0)

    @pl.when(k == 0)
    def _():
        h_acc[...] = jnp.zeros_like(h_acc)

    # Noisy weight for this K tile: w + sigma * eps  (combined in VMEM).
    w1_eff = w1_ref[...] + sw1_ref[...] * ew1_ref[...]          # (tk, H)
    h_acc[...] += jnp.dot(x_ref[...], w1_eff,
                          preferred_element_type=jnp.float32)   # (Mp, H)

    @pl.when(k == pl.num_programs(0) - 1)
    def _():
        b1_eff = b1_ref[...] + sb1_ref[...] * eb1_ref[...]      # (1, H)
        h = jnp.maximum(h_acc[...] + b1_eff, 0.0)               # (Mp, H)
        w2_eff = w2_ref[...] + sw2_ref[...] * ew2_ref[...]      # (H, Np)
        b2_eff = b2_ref[...] + sb2_ref[...] * eb2_ref[...]      # (1, Np)
        out = jnp.dot(h, w2_eff, preferred_element_type=jnp.float32) + b2_eff
        o_ref[...] = out.astype(o_ref.dtype)


# ----------------------------------------------------------------------------
# Pallas wrappers
# ----------------------------------------------------------------------------
def matmul_bias_relu_pallas(x, w, b, *, tm=256):
    """y = relu(x @ w + b), tiled over rows with a 'parallel' grid."""
    M, K = x.shape
    Kw, N = w.shape
    assert K == Kw
    tm = _round_up(max(8, min(tm, M)), 8)
    Mp = _round_up(M, tm)
    if Mp != M:
        x = jnp.pad(x, ((0, Mp - M), (0, 0)))
    nm = Mp // tm

    flops = 2 * Mp * K * N
    bytes_acc = 4 * (Mp * K + K * N + N + Mp * N)

    grid_spec = pltpu.PrefetchScalarGridSpec(
        num_scalar_prefetch=0,
        grid=(nm,),
        in_specs=[
            pl.BlockSpec((tm, K), lambda i: (i, 0)),   # row tile of im2col
            pl.BlockSpec((K, N), lambda i: (0, 0)),    # full weight (resident)
            pl.BlockSpec((1, N), lambda i: (0, 0)),    # bias
        ],
        out_specs=pl.BlockSpec((tm, N), lambda i: (i, 0)),
    )
    out = pl.pallas_call(
        _matmul_bias_relu_kernel,
        out_shape=jax.ShapeDtypeStruct((Mp, N), jnp.float32),
        grid_spec=grid_spec,
        compiler_params=pltpu.CompilerParams(
            dimension_semantics=("parallel",),
            vmem_limit_bytes=32 * 1024 * 1024),
        cost_estimate=pl.CostEstimate(
            flops=flops, transcendentals=0, bytes_accessed=bytes_acc),
    )(x, w, b.reshape(1, N))
    return out[:M]


def fused_noisy_head_pallas(flat, head, noise):
    """Fused NoisyLinear->ReLU->NoisyLinear head.  flat: (B, conv_out)."""
    M, K1 = flat.shape
    assert K1 == head["K1"]
    ew1t, eb1, ew2t, eb2 = noise
    K1p, tk, Np, A, H = head["K1p"], head["tk"], head["Np"], head["A"], head["H"]
    Mp = _round_up(M, 8)

    xk = flat
    if Mp != M or K1p != K1:
        xk = jnp.pad(flat, ((0, Mp - M), (0, K1p - K1)))
    ew1t_p = jnp.pad(ew1t, ((0, K1p - K1), (0, 0))) if K1p != K1 else ew1t
    ew2t_p = jnp.pad(ew2t, ((0, 0), (0, Np - A)))
    eb2_p = jnp.pad(eb2, (0, Np - A)).reshape(1, Np)
    eb1_p = eb1.reshape(1, H)

    nk = K1p // tk
    flops = 2 * Mp * K1p * H + 2 * Mp * H * Np
    bytes_acc = 4 * (Mp * K1p + 3 * K1p * H + 3 * H + 3 * H * Np + 3 * Np
                     + Mp * Np)

    grid_spec = pltpu.PrefetchScalarGridSpec(
        num_scalar_prefetch=0,
        grid=(nk,),
        in_specs=[
            pl.BlockSpec((Mp, tk), lambda k: (0, k)),   # x K-tile
            pl.BlockSpec((tk, H), lambda k: (k, 0)),    # w1 K-tile   (in,out)
            pl.BlockSpec((tk, H), lambda k: (k, 0)),    # sigma_w1 K-tile
            pl.BlockSpec((tk, H), lambda k: (k, 0)),    # eps_w1 K-tile
            pl.BlockSpec((1, H), lambda k: (0, 0)),     # b1
            pl.BlockSpec((1, H), lambda k: (0, 0)),     # sigma_b1
            pl.BlockSpec((1, H), lambda k: (0, 0)),     # eps_b1
            pl.BlockSpec((H, Np), lambda k: (0, 0)),    # w2 (resident)
            pl.BlockSpec((H, Np), lambda k: (0, 0)),    # sigma_w2
            pl.BlockSpec((H, Np), lambda k: (0, 0)),    # eps_w2
            pl.BlockSpec((1, Np), lambda k: (0, 0)),    # b2
            pl.BlockSpec((1, Np), lambda k: (0, 0)),    # sigma_b2
            pl.BlockSpec((1, Np), lambda k: (0, 0)),    # eps_b2
        ],
        out_specs=pl.BlockSpec((Mp, Np), lambda k: (0, 0)),
        scratch_shapes=[pltpu.VMEM((Mp, H), jnp.float32)],
    )
    out = pl.pallas_call(
        _fused_noisy_head_kernel,
        out_shape=jax.ShapeDtypeStruct((Mp, Np), jnp.float32),
        grid_spec=grid_spec,
        compiler_params=pltpu.CompilerParams(
            dimension_semantics=("arbitrary",),
            vmem_limit_bytes=32 * 1024 * 1024),
        cost_estimate=pl.CostEstimate(
            flops=flops, transcendentals=0, bytes_accessed=bytes_acc),
    )(xk, head["w1t"], head["sw1t"], ew1t_p,
      head["b1"], head["sb1"], eb1_p,
      head["w2t"], head["sw2t"], ew2t_p,
      head["b2"], head["sb2"], eb2_p)
    return out[:M, :A]


# ----------------------------------------------------------------------------
# Glue: NHWC im2col, parameter init / preparation, full forward, reference
# ----------------------------------------------------------------------------
def im2col_nhwc(x, kh, kw, stride):
    """x: (N, H, W, C) -> (N*OH*OW, KH*KW*C), channel-last column order."""
    n, h, w, c = x.shape
    oh = (h - kh) // stride + 1
    ow = (w - kw) // stride + 1
    cols = []
    for i in range(kh):
        for j in range(kw):
            cols.append(x[:, i:i + stride * oh:stride,
                          j:j + stride * ow:stride, :])
    cols = jnp.stack(cols, axis=3)                 # (N, OH, OW, KH*KW, C)
    return cols.reshape(n * oh * ow, kh * kw * c), oh, ow


def init_params(key, input_shape, num_actions, sigma_init=0.017):
    """PyTorch-layout parameters (OIHW convs, (out,in) linears, CHW flatten)."""
    c_in, h_in, w_in = input_shape
    keys = jax.random.split(key, 8)
    ki = iter(keys)

    def uniform(k, shape, std):
        return jax.random.uniform(k, shape, jnp.float32, -std, std)

    conv_defs = [(32, c_in, 8, 4), (64, 32, 4, 2), (64, 64, 3, 1)]
    conv = []
    h, w = h_in, w_in
    for oc, ic, ksz, stride in conv_defs:
        std = 1.0 / math.sqrt(ic * ksz * ksz)
        conv.append((uniform(next(ki), (oc, ic, ksz, ksz), std),
                     uniform(next(ki), (oc,), std)))
        h = (h - ksz) // stride + 1
        w = (w - ksz) // stride + 1
    conv_output_size = 64 * h * w

    def noisy_linear(k, in_f, out_f):
        std = math.sqrt(3.0 / in_f)
        k1, k2 = jax.random.split(k)
        return (uniform(k1, (out_f, in_f), std), uniform(k2, (out_f,), std),
                jnp.full((out_f, in_f), sigma_init, jnp.float32),
                jnp.full((out_f,), sigma_init, jnp.float32))

    lin1 = noisy_linear(next(ki), conv_output_size, 512)
    lin2 = noisy_linear(next(ki), 512, num_actions)
    return {"conv": conv, "strides": [d[3] for d in conv_defs],
            "lin": (lin1, lin2), "conv_output_size": conv_output_size}


def prepare_params(params, *, tm_conv=256, tk=128):
    """One-time conversion to kernel layout (done outside the forward pass)."""
    conv_prep = []
    for (w, b), stride in zip(params["conv"], params["strides"]):
        oc, c, kh, kw = w.shape
        # OIHW -> (KH*KW*C, OC) to match the NHWC (channel-last) im2col columns.
        w_mat = jnp.transpose(w, (2, 3, 1, 0)).reshape(kh * kw * c, oc)
        conv_prep.append((w_mat, b, kh, kw, stride))

    (w1, b1, sw1, sb1), (w2, b2, sw2, sb2) = params["lin"]
    H = b1.shape[0]
    K1 = w1.shape[1]
    A = w2.shape[0]
    Np = _round_up(max(A, 128), 128)            # lane-dense output slab

    if tk is None or tk >= K1:
        tk_eff, K1p = K1, K1
    else:
        tk_eff = _round_up(tk, 128)
        K1p = _round_up(K1, tk_eff)

    head = dict(
        w1t=jnp.pad(w1.T, ((0, K1p - K1), (0, 0))),     # (K1p, H)
        sw1t=jnp.pad(sw1.T, ((0, K1p - K1), (0, 0))),
        b1=b1.reshape(1, H), sb1=sb1.reshape(1, H),
        w2t=jnp.pad(w2.T, ((0, 0), (0, Np - A))),       # (H, Np)
        sw2t=jnp.pad(sw2.T, ((0, 0), (0, Np - A))),
        b2=jnp.pad(b2, (0, Np - A)).reshape(1, Np),
        sb2=jnp.pad(sb2, (0, Np - A)).reshape(1, Np),
        K1=K1, K1p=K1p, tk=tk_eff, Np=Np, A=A, H=H,
    )
    return {"conv": conv_prep, "head": head, "tm_conv": tm_conv,
            "conv_output_size": params["conv_output_size"]}


def sample_noise(key, conv_out, num_actions):
    """Gaussian noise, sampled directly in kernel (in, out) layout."""
    k1, k2, k3, k4 = jax.random.split(key, 4)
    ew1t = jax.random.normal(k1, (conv_out, 512), jnp.float32)
    eb1 = jax.random.normal(k2, (512,), jnp.float32)
    ew2t = jax.random.normal(k3, (512, num_actions), jnp.float32)
    eb2 = jax.random.normal(k4, (num_actions,), jnp.float32)
    return ew1t, eb1, ew2t, eb2


def noisy_dqn_forward(prep, x_nchw, noise):
    """x: (N, C, H, W) float32 -> (N, num_actions) float32."""
    x = jnp.transpose(x_nchw, (0, 2, 3, 1))          # NCHW -> NHWC, once
    n = x.shape[0]
    for w_mat, b, kh, kw, stride in prep["conv"]:
        cols, oh, ow = im2col_nhwc(x, kh, kw, stride)
        y = matmul_bias_relu_pallas(cols, w_mat, b, tm=prep["tm_conv"])
        x = y.reshape(n, oh, ow, w_mat.shape[1])     # stays NHWC
    # Match torch's (C, H, W) flatten order; final feature map is tiny.
    flat = jnp.transpose(x, (0, 3, 1, 2)).reshape(n, -1)
    return fused_noisy_head_pallas(flat, prep["head"], noise)


def reference_forward(params, x, noise):
    """Pure-JAX reference on the PyTorch-layout params (same math)."""
    h = x
    for (w, b), s in zip(params["conv"], params["strides"]):
        h = jax.lax.conv_general_dilated(
            h, w, (s, s), "VALID", dimension_numbers=("NCHW", "OIHW", "NCHW"))
        h = jnp.maximum(h + b[None, :, None, None], 0.0)
    flat = h.reshape(x.shape[0], -1)
    (w1, b1, sw1, sb1), (w2, b2, sw2, sb2) = params["lin"]
    ew1t, eb1, ew2t, eb2 = noise
    we1 = w1 + sw1 * ew1t.T
    be1 = b1 + sb1 * eb1
    h = jnp.maximum(flat @ we1.T + be1, 0.0)
    we2 = w2 + sw2 * ew2t.T
    be2 = b2 + sb2 * eb2
    return h @ we2.T + be2


if __name__ == "__main__":
    key = jax.random.PRNGKey(0)
    # Small shape consistent with the conv stack (8/4, 4/2, 3/1 -> 2x2 spatial).
    input_shape = (4, 44, 44)
    num_actions = 6
    batch = 4

    torch_params = init_params(key, input_shape, num_actions)
    prep = prepare_params(torch_params, tm_conv=256, tk=128)

    x = jax.random.uniform(jax.random.fold_in(key, 99),
                           (batch,) + input_shape, jnp.float32)
    noise = sample_noise(jax.random.fold_in(key, 123),
                         torch_params["conv_output_size"], num_actions)

    fwd = jax.jit(lambda xx, nz: noisy_dqn_forward(prep, xx, nz))
    out = jax.block_until_ready(fwd(x, noise))
    assert out.shape == (batch, num_actions), out.shape

    ref = reference_forward(torch_params, x, noise)
    max_err = float(jnp.max(jnp.abs(out - ref)))
    assert jnp.allclose(out, ref, rtol=1e-3, atol=1e-3), max_err

    print("KERNEL_OK")
</pallas_src>

<mosaic_0001>
module attributes {stable_mosaic.version = 11 : i64} {
  func.func @_matmul_bias_relu_kernel(%arg0: i32, %arg1: memref<256x256xf32, #tpu.memory_space<vmem>>, %arg2: memref<256x32xf32, #tpu.memory_space<vmem>>, %arg3: memref<1x32xf32, #tpu.memory_space<vmem>>, %arg4: memref<256x32xf32, #tpu.memory_space<vmem>>) attributes {dimension_semantics = [#tpu.dimension_semantics<parallel>], iteration_bounds = array<i64: 2>, scalar_prefetch = 0 : i64, scratch_operands = 0 : i64, tpu.core_type = #tpu.core_type<tc>, window_params = [{transform_indices = @transform_0, window_bounds = array<i64: 256, 256>}, {pipeline_mode = #tpu.pipeline_mode<synchronous>, transform_indices = @transform_1, window_bounds = array<i64: 256, 32>}, {pipeline_mode = #tpu.pipeline_mode<synchronous>, transform_indices = @transform_2, window_bounds = array<i64: 1, 32>}, {transform_indices = @transform_3, window_bounds = array<i64: 256, 32>}]} {
    %c0 = arith.constant 0 : index
    %c0_0 = arith.constant 0 : index
    %0 = vector.load %arg1[%c0, %c0_0] : memref<256x256xf32, #tpu.memory_space<vmem>>, vector<256x256xf32>
    %c0_1 = arith.constant 0 : index
    %c0_2 = arith.constant 0 : index
    %1 = vector.load %arg2[%c0_1, %c0_2] : memref<256x32xf32, #tpu.memory_space<vmem>>, vector<256x32xf32>
    %cst = arith.constant dense<0.000000e+00> : vector<256x32xf32>
    %2 = tpu.matmul %0, %1, %cst {dimension_numbers = #tpu.dot_dimension_numbers<[1], [0], [0], [1], [0, 0, 1, 1], [], []>} : vector<256x256xf32>, vector<256x32xf32>, vector<256x32xf32> -> vector<256x32xf32>
    %c0_3 = arith.constant 0 : index
    %c0_4 = arith.constant 0 : index
    %3 = vector.load %arg3[%c0_3, %c0_4] : memref<1x32xf32, #tpu.memory_space<vmem>>, vector<1x32xf32>
    %4 = vector.broadcast %3 : vector<1x32xf32> to vector<256x32xf32>
    %5 = arith.addf %2, %4 : vector<256x32xf32>
    %cst_5 = arith.constant 0.000000e+00 : f32
    %6 = vector.broadcast %cst_5 : f32 to vector<256x32xf32>
    %7 = arith.maximumf %5, %6 : vector<256x32xf32>
    %c0_6 = arith.constant 0 : index
    %c0_7 = arith.constant 0 : index
    %8 = vector.load %arg4[%c0_6, %c0_7] : memref<256x32xf32, #tpu.memory_space<vmem>>, vector<256x32xf32>
    tpu.vector_store %arg4[%c0_6, %c0_7], %7 {strides = array<i32>} : memref<256x32xf32, #tpu.memory_space<vmem>>, vector<256x32xf32>,
    return
  }
  func.func @transform_0(%arg0: i32) -> (i32, i32) {
    %c0_i32 = arith.constant 0 : i32
    %c0_i32_0 = arith.constant 0 : i32
    return %arg0, %c0_i32 : i32, i32
  }
  func.func @transform_1(%arg0: i32) -> (i32, i32) {
    %c0_i32 = arith.constant 0 : i32
    %c0_i32_0 = arith.constant 0 : i32
    %c0_i32_1 = arith.constant 0 : i32
    return %c0_i32, %c0_i32_0 : i32, i32
  }
  func.func @transform_2(%arg0: i32) -> (i32, i32) {
    %c0_i32 = arith.constant 0 : i32
    %c0_i32_0 = arith.constant 0 : i32
    %c0_i32_1 = arith.constant 0 : i32
    return %c0_i32, %c0_i32_0 : i32, i32
  }
  func.func @transform_3(%arg0: i32) -> (i32, i32) {
    %c0_i32 = arith.constant 0 : i32
    %c0_i32_0 = arith.constant 0 : i32
    return %arg0, %c0_i32 : i32, i32
  }
}

module attributes {stable_mosaic.version = 11 : i64} {
  func.func @_matmul_bias_relu_kernel(%arg0: i32, %arg1: memref<64x512xf32, #tpu.memory_space<vmem>>, %arg2: memref<512x64xf32, #tpu.memory_space<vmem>>, %arg3: memref<1x64xf32, #tpu.memory_space<vmem>>, %arg4: memref<64x64xf32, #tpu.memory_space<vmem>>) attributes {dimension_semantics = [#tpu.dimension_semantics<parallel>], iteration_bounds = array<i64: 1>, scalar_prefetch = 0 : i64, scratch_operands = 0 : i64, tpu.core_type = #tpu.core_type<tc>, window_params = [{transform_indices = @transform_0, window_bounds = array<i64: 64, 512>}, {pipeline_mode = #tpu.pipeline_mode<synchronous>, transform_indices = @transform_1, window_bounds = array<i64: 512, 64>}, {pipeline_mode = #tpu.pipeline_mode<synchronous>, transform_indices = @transform_2, window_bounds = array<i64: 1, 64>}, {transform_indices = @transform_3, window_bounds = array<i64: 64, 64>}]} {
    %c0 = arith.constant 0 : index
    %c0_0 = arith.constant 0 : index
    %0 = vector.load %arg1[%c0, %c0_0] : memref<64x512xf32, #tpu.memory_space<vmem>>, vector<64x512xf32>
    %c0_1 = arith.constant 0 : index
    %c0_2 = arith.constant 0 : index
    %1 = vector.load %arg2[%c0_1, %c0_2] : memref<512x64xf32, #tpu.memory_space<vmem>>, vector<512x64xf32>
    %cst = arith.constant dense<0.000000e+00> : vector<64x64xf32>
    %2 = tpu.matmul %0, %1, %cst {dimension_numbers = #tpu.dot_dimension_numbers<[1], [0], [0], [1], [0, 0, 1, 1], [], []>} : vector<64x512xf32>, vector<512x64xf32>, vector<64x64xf32> -> vector<64x64xf32>
    %c0_3 = arith.constant 0 : index
    %c0_4 = arith.constant 0 : index
    %3 = vector.load %arg3[%c0_3, %c0_4] : memref<1x64xf32, #tpu.memory_space<vmem>>, vector<1x64xf32>
    %4 = vector.broadcast %3 : vector<1x64xf32> to vector<64x64xf32>
    %5 = arith.addf %2, %4 : vector<64x64xf32>
    %cst_5 = arith.constant 0.000000e+00 : f32
    %6 = vector.broadcast %cst_5 : f32 to vector<64x64xf32>
    %7 = arith.maximumf %5, %6 : vector<64x64xf32>
    %c0_6 = arith.constant 0 : index
    %c0_7 = arith.constant 0 : index
    %8 = vector.load %arg4[%c0_6, %c0_7] : memref<64x64xf32, #tpu.memory_space<vmem>>, vector<64x64xf32>
    tpu.vector_store %arg4[%c0_6, %c0_7], %7 {strides = array<i32>} : memref<64x64xf32, #tpu.memory_space<vmem>>, vector<64x64xf32>,
    return
  }
  func.func @transform_0(%arg0: i32) -> (i32, i32) {
    %c0_i32 = arith.constant 0 : i32
    %c0_i32_0 = arith.constant 0 : i32
    return %arg0, %c0_i32 : i32, i32
  }
  func.func @transform_1(%arg0: i32) -> (i32, i32) {
    %c0_i32 = arith.constant 0 : i32
    %c0_i32_0 = arith.constant 0 : i32
    %c0_i32_1 = arith.constant 0 : i32
    return %c0_i32, %c0_i32_0 : i32, i32
  }
  func.func @transform_2(%arg0: i32) -> (i32, i32) {
    %c0_i32 = arith.constant 0 : i32
    %c0_i32_0 = arith.constant 0 : i32
    %c0_i32_1 = arith.constant 0 : i32
    return %c0_i32, %c0_i32_0 : i32, i32
  }
  func.func @transform_3(%arg0: i32) -> (i32, i32) {
    %c0_i32 = arith.constant 0 : i32
    %c0_i32_0 = arith.constant 0 : i32
    return %arg0, %c0_i32 : i32, i32
  }
}

module attributes {stable_mosaic.version = 11 : i64} {
  func.func @_matmul_bias_relu_kernel(%arg0: i32, %arg1: memref<16x576xf32, #tpu.memory_space<vmem>>, %arg2: memref<576x64xf32, #tpu.memory_space<vmem>>, %arg3: memref<1x64xf32, #tpu.memory_space<vmem>>, %arg4: memref<16x64xf32, #tpu.memory_space<vmem>>) attributes {dimension_semantics = [#tpu.dimension_semantics<parallel>], iteration_bounds = array<i64: 1>, scalar_prefetch = 0 : i64, scratch_operands = 0 : i64, tpu.core_type = #tpu.core_type<tc>, window_params = [{transform_indices = @transform_0, window_bounds = array<i64: 16, 576>}, {pipeline_mode = #tpu.pipeline_mode<synchronous>, transform_indices = @transform_1, window_bounds = array<i64: 576, 64>}, {pipeline_mode = #tpu.pipeline_mode<synchronous>, transform_indices = @transform_2, window_bounds = array<i64: 1, 64>}, {transform_indices = @transform_3, window_bounds = array<i64: 16, 64>}]} {
    %c0 = arith.constant 0 : index
    %c0_0 = arith.constant 0 : index
    %0 = vector.load %arg1[%c0, %c0_0] : memref<16x576xf32, #tpu.memory_space<vmem>>, vector<16x576xf32>
    %c0_1 = arith.constant 0 : index
    %c0_2 = arith.constant 0 : index
    %1 = vector.load %arg2[%c0_1, %c0_2] : memref<576x64xf32, #tpu.memory_space<vmem>>, vector<576x64xf32>
    %cst = arith.constant dense<0.000000e+00> : vector<16x64xf32>
    %2 = tpu.matmul %0, %1, %cst {dimension_numbers = #tpu.dot_dimension_numbers<[1], [0], [0], [1], [0, 0, 1, 1], [], []>} : vector<16x576xf32>, vector<576x64xf32>, vector<16x64xf32> -> vector<16x64xf32>
    %c0_3 = arith.constant 0 : index
    %c0_4 = arith.constant 0 : index
    %3 = vector.load %arg3[%c0_3, %c0_4] : memref<1x64xf32, #tpu.memory_space<vmem>>, vector<1x64xf32>
    %4 = vector.broadcast %3 : vector<1x64xf32> to vector<16x64xf32>
    %5 = arith.addf %2, %4 : vector<16x64xf32>
    %cst_5 = arith.constant 0.000000e+00 : f32
    %6 = vector.broadcast %cst_5 : f32 to vector<16x64xf32>
    %7 = arith.maximumf %5, %6 : vector<16x64xf32>
    %c0_6 = arith.constant 0 : index
    %c0_7 = arith.constant 0 : index
    %8 = vector.load %arg4[%c0_6, %c0_7] : memref<16x64xf32, #tpu.memory_space<vmem>>, vector<16x64xf32>
    tpu.vector_store %arg4[%c0_6, %c0_7], %7 {strides = array<i32>} : memref<16x64xf32, #tpu.memory_space<vmem>>, vector<16x64xf32>,
    return
  }
  func.func @transform_0(%arg0: i32) -> (i32, i32) {
    %c0_i32 = arith.constant 0 : i32
    %c0_i32_0 = arith.constant 0 : i32
    return %arg0, %c0_i32 : i32, i32
  }
  func.func @transform_1(%arg0: i32) -> (i32, i32) {
    %c0_i32 = arith.constant 0 : i32
    %c0_i32_0 = arith.constant 0 : i32
    %c0_i32_1 = arith.constant 0 : i32
    return %c0_i32, %c0_i32_0 : i32, i32
  }
  func.func @transform_2(%arg0: i32) -> (i32, i32) {
    %c0_i32 = arith.constant 0 : i32
    %c0_i32_0 = arith.constant 0 : i32
    %c0_i32_1 = arith.constant 0 : i32
    return %c0_i32, %c0_i32_0 : i32, i32
  }
  func.func @transform_3(%arg0: i32) -> (i32, i32) {
    %c0_i32 = arith.constant 0 : i32
    %c0_i32_0 = arith.constant 0 : i32
    return %arg0, %c0_i32 : i32, i32
  }
}

module attributes {stable_mosaic.version = 11 : i64} {
  func.func @_fused_noisy_head_kernel(%arg0: i32, %arg1: memref<8x128xf32, #tpu.memory_space<vmem>>, %arg2: memref<128x512xf32, #tpu.memory_space<vmem>>, %arg3: memref<128x512xf32, #tpu.memory_space<vmem>>, %arg4: memref<128x512xf32, #tpu.memory_space<vmem>>, %arg5: memref<1x512xf32, #tpu.memory_space<vmem>>, %arg6: memref<1x512xf32, #tpu.memory_space<vmem>>, %arg7: memref<1x512xf32, #tpu.memory_space<vmem>>, %arg8: memref<512x128xf32, #tpu.memory_space<vmem>>, %arg9: memref<512x128xf32, #tpu.memory_space<vmem>>, %arg10: memref<512x128xf32, #tpu.memory_space<vmem>>, %arg11: memref<1x128xf32, #tpu.memory_space<vmem>>, %arg12: memref<1x128xf32, #tpu.memory_space<vmem>>, %arg13: memref<1x128xf32, #tpu.memory_space<vmem>>, %arg14: memref<8x128xf32, #tpu.memory_space<vmem>>, %arg15: memref<8x512xf32, #tpu.memory_space<vmem>>) attributes {dimension_semantics = [#tpu.dimension_semantics<arbitrary>], iteration_bounds = array<i64: 2>, scalar_prefetch = 0 : i64, scratch_operands = 1 : i64, tpu.core_type = #tpu.core_type<tc>, window_params = [{transform_indices = @transform_0, window_bounds = array<i64: 8, 128>}, {transform_indices = @transform_1, window_bounds = array<i64: 128, 512>}, {transform_indices = @transform_2, window_bounds = array<i64: 128, 512>}, {transform_indices = @transform_3, window_bounds = array<i64: 128, 512>}, {pipeline_mode = #tpu.pipeline_mode<synchronous>, transform_indices = @transform_4, window_bounds = array<i64: 1, 512>}, {pipeline_mode = #tpu.pipeline_mode<synchronous>, transform_indices = @transform_5, window_bounds = array<i64: 1, 512>}, {pipeline_mode = #tpu.pipeline_mode<synchronous>, transform_indices = @transform_6, window_bounds = array<i64: 1, 512>}, {pipeline_mode = #tpu.pipeline_mode<synchronous>, transform_indices = @transform_7, window_bounds = array<i64: 512, 128>}, {pipeline_mode = #tpu.pipeline_mode<synchronous>, transform_indices = @transform_8, window_bounds = array<i64: 512, 128>}, {pipeline_mode = #tpu.pipeline_mode<synchronous>, transform_indices = @transform_9, window_bounds = array<i64: 512, 128>}, {pipeline_mode = #tpu.pipeline_mode<synchronous>, transform_indices = @transform_10, window_bounds = array<i64: 1, 128>}, {pipeline_mode = #tpu.pipeline_mode<synchronous>, transform_indices = @transform_11, window_bounds = array<i64: 1, 128>}, {pipeline_mode = #tpu.pipeline_mode<synchronous>, transform_indices = @transform_12, window_bounds = array<i64: 1, 128>}, {pipeline_mode = #tpu.pipeline_mode<synchronous>, transform_indices = @transform_13, window_bounds = array<i64: 8, 128>}]} {
    %c0_i32 = arith.constant 0 : i32
    %0 = arith.cmpi eq, %arg0, %c0_i32 : i32
    %1 = arith.extui %0 : i1 to i32
    %c0_i32_0 = arith.constant 0 : i32
    %2 = arith.cmpi ne, %1, %c0_i32_0 : i32
    scf.if %2 {
      %cst_13 = arith.constant 0.000000e+00 : f32
      %16 = vector.broadcast %cst_13 : f32 to vector<8x512xf32>
      %c0_14 = arith.constant 0 : index
      %c0_15 = arith.constant 0 : index
      %17 = vector.load %arg15[%c0_14, %c0_15] : memref<8x512xf32, #tpu.memory_space<vmem>>, vector<8x512xf32>
      tpu.vector_store %arg15[%c0_14, %c0_15], %16 {strides = array<i32>} : memref<8x512xf32, #tpu.memory_space<vmem>>, vector<8x512xf32>,
    } else {
    }
    %c0 = arith.constant 0 : index
    %c0_1 = arith.constant 0 : index
    %3 = vector.load %arg2[%c0, %c0_1] : memref<128x512xf32, #tpu.memory_space<vmem>>, vector<128x512xf32>
    %c0_2 = arith.constant 0 : index
    %c0_3 = arith.constant 0 : index
    %4 = vector.load %arg3[%c0_2, %c0_3] : memref<128x512xf32, #tpu.memory_space<vmem>>, vector<128x512xf32>
    %c0_4 = arith.constant 0 : index
    %c0_5 = arith.constant 0 : index
    %5 = vector.load %arg4[%c0_4, %c0_5] : memref<128x512xf32, #tpu.memory_space<vmem>>, vector<128x512xf32>
    %6 = arith.mulf %4, %5 : vector<128x512xf32>
    %7 = arith.addf %3, %6 : vector<128x512xf32>
    %c0_6 = arith.constant 0 : index
    %c0_7 = arith.constant 0 : index
    %8 = vector.load %arg15[%c0_6, %c0_7] : memref<8x512xf32, #tpu.memory_space<vmem>>, vector<8x512xf32>
    %c0_8 = arith.constant 0 : index
    %c0_9 = arith.constant 0 : index
    %9 = vector.load %arg1[%c0_8, %c0_9] : memref<8x128xf32, #tpu.memory_space<vmem>>, vector<8x128xf32>
    %cst = arith.constant dense<0.000000e+00> : vector<8x512xf32>
    %10 = tpu.matmul %9, %7, %cst {dimension_numbers = #tpu.dot_dimension_numbers<[1], [0], [0], [1], [0, 0, 1, 1], [], []>} : vector<8x128xf32>, vector<128x512xf32>, vector<8x512xf32> -> vector<8x512xf32>
    %11 = arith.addf %8, %10 : vector<8x512xf32>
    %c0_10 = arith.constant 0 : index
    %c0_11 = arith.constant 0 : index
    %12 = vector.load %arg15[%c0_10, %c0_11] : memref<8x512xf32, #tpu.memory_space<vmem>>, vector<8x512xf32>
    tpu.vector_store %arg15[%c0_10, %c0_11], %11 {strides = array<i32>} : memref<8x512xf32, #tpu.memory_space<vmem>>, vector<8x512xf32>,
    %c1_i32 = arith.constant 1 : i32
    %13 = arith.cmpi eq, %arg0, %c1_i32 : i32
    %14 = arith.extui %13 : i1 to i32
    %c0_i32_12 = arith.constant 0 : i32
    %15 = arith.cmpi ne, %14, %c0_i32_12 : i32
    scf.if %15 {
      %c0_13 = arith.constant 0 : index
      %c0_14 = arith.constant 0 : index
      %16 = vector.load %arg5[%c0_13, %c0_14] : memref<1x512xf32, #tpu.memory_space<vmem>>, vector<1x512xf32>
      %c0_15 = arith.constant 0 : index
      %c0_16 = arith.constant 0 : index
      %17 = vector.load %arg6[%c0_15, %c0_16] : memref<1x512xf32, #tpu.memory_space<vmem>>, vector<1x512xf32>
      %c0_17 = arith.constant 0 : index
      %c0_18 = arith.constant 0 : index
      %18 = vector.load %arg7[%c0_17, %c0_18] : memref<1x512xf32, #tpu.memory_space<vmem>>, vector<1x512xf32>
      %19 = arith.mulf %17, %18 : vector<1x512xf32>
      %20 = arith.addf %16, %19 : vector<1x512xf32>
      %c0_19 = arith.constant 0 : index
      %c0_20 = arith.constant 0 : index
      %21 = vector.load %arg15[%c0_19, %c0_20] : memref<8x512xf32, #tpu.memory_space<vmem>>, vector<8x512xf32>
      %22 = vector.broadcast %20 : vector<1x512xf32> to vector<8x512xf32>
      %23 = arith.addf %21, %22 : vector<8x512xf32>
      %cst_21 = arith.constant 0.000000e+00 : f32
      %24 = vector.broadcast %cst_21 : f32 to vector<8x512xf32>
      %25 = arith.maximumf %23, %24 : vector<8x512xf32>
      %c0_22 = arith.constant 0 : index
      %c0_23 = arith.constant 0 : index
      %26 = vector.load %arg8[%c0_22, %c0_23] : memref<512x128xf32, #tpu.memory_space<vmem>>, vector<512x128xf32>
      %c0_24 = arith.constant 0 : index
      %c0_25 = arith.constant 0 : index
      %27 = vector.load %arg9[%c0_24, %c0_25] : memref<512x128xf32, #tpu.memory_space<vmem>>, vector<512x128xf32>
      %c0_26 = arith.constant 0 : index
      %c0_27 = arith.constant 0 : index
      %28 = vector.load %arg10[%c0_26, %c0_27] : memref<512x128xf32, #tpu.memory_space<vmem>>, vector<512x128xf32>
      %29 = arith.mulf %27, %28 : vector<512x128xf32>
      %30 = arith.addf %26, %29 : vector<512x128xf32>
      %c0_28 = arith.constant 0 : index
      %c0_29 = arith.constant 0 : index
      %31 = vector.load %arg11[%c0_28, %c0_29] : memref<1x128xf32, #tpu.memory_space<vmem>>, vector<1x128xf32>
      %c0_30 = arith.constant 0 : index
      %c0_31 = arith.constant 0 : index
      %32 = vector.load %arg12[%c0_30, %c0_31] : memref<1x128xf32, #tpu.memory_space<vmem>>, vector<1x128xf32>
      %c0_32 = arith.constant 0 : index
      %c0_33 = arith.constant 0 : index
      %33 = vector.load %arg13[%c0_32, %c0_33] : memref<1x128xf32, #tpu.memory_space<vmem>>, vector<1x128xf32>
      %34 = arith.mulf %32, %33 : vector<1x128xf32>
      %35 = arith.addf %31, %34 : vector<1x128xf32>
      %cst_34 = arith.constant dense<0.000000e+00> : vector<8x128xf32>
      %36 = tpu.matmul %25, %30, %cst_34 {dimension_numbers = #tpu.dot_dimension_numbers<[1], [0], [0], [1], [0, 0, 1, 1], [], []>} : vector<8x512xf32>, vector<512x128xf32>, vector<8x128xf32> -> vector<8x128xf32>
      %37 = vector.broadcast %35 : vector<1x128xf32> to vector<8x128xf32>
      %38 = arith.addf %36, %37 : vector<8x128xf32>
      %c0_35 = arith.constant 0 : index
      %c0_36 = arith.constant 0 : index
      %39 = vector.load %arg14[%c0_35, %c0_36] : memref<8x128xf32, #tpu.memory_space<vmem>>, vector<8x128xf32>
      tpu.vector_store %arg14[%c0_35, %c0_36], %38 {strides = array<i32>} : memref<8x128xf32, #tpu.memory_space<vmem>>, vector<8x128xf32>,
    } else {
    }
    return
  }
  func.func @transform_0(%arg0: i32) -> (i32, i32) {
    %c0_i32 = arith.constant 0 : i32
    %c0_i32_0 = arith.constant 0 : i32
    return %c0_i32, %arg0 : i32, i32
  }
  func.func @transform_1(%arg0: i32) -> (i32, i32) {
    %c0_i32 = arith.constant 0 : i32
    %c0_i32_0 = arith.constant 0 : i32
    return %arg0, %c0_i32 : i32, i32
  }
  func.func @transform_2(%arg0: i32) -> (i32, i32) {
    %c0_i32 = arith.constant 0 : i32
    %c0_i32_0 = arith.constant 0 : i32
    return %arg0, %c0_i32 : i32, i32
  }
  func.func @transform_3(%arg0: i32) -> (i32, i32) {
    %c0_i32 = arith.constant 0 : i32
    %c0_i32_0 = arith.constant 0 : i32
    return %arg0, %c0_i32 : i32, i32
  }
  func.func @transform_4(%arg0: i32) -> (i32, i32) {
    %c0_i32 = arith.constant 0 : i32
    %c0_i32_0 = arith.constant 0 : i32
    %c0_i32_1 = arith.constant 0 : i32
    return %c0_i32, %c0_i32_0 : i32, i32
  }
  func.func @transform_5(%arg0: i32) -> (i32, i32) {
    %c0_i32 = arith.constant 0 : i32
    %c0_i32_0 = arith.constant 0 : i32
    %c0_i32_1 = arith.constant 0 : i32
    return %c0_i32, %c0_i32_0 : i32, i32
  }
  func.func @transform_6(%arg0: i32) -> (i32, i32) {
    %c0_i32 = arith.constant 0 : i32
    %c0_i32_0 = arith.constant 0 : i32
    %c0_i32_1 = arith.constant 0 : i32
    return %c0_i32, %c0_i32_0 : i32, i32
  }
  func.func @transform_7(%arg0: i32) -> (i32, i32) {
    %c0_i32 = arith.constant 0 : i32
    %c0_i32_0 = arith.constant 0 : i32
    %c0_i32_1 = arith.constant 0 : i32
    return %c0_i32, %c0_i32_0 : i32, i32
  }
  func.func @transform_8(%arg0: i32) -> (i32, i32) {
    %c0_i32 = arith.constant 0 : i32
    %c0_i32_0 = arith.constant 0 : i32
    %c0_i32_1 = arith.constant 0 : i32
    return %c0_i32, %c0_i32_0 : i32, i32
  }
  func.func @transform_9(%arg0: i32) -> (i32, i32) {
    %c0_i32 = arith.constant 0 : i32
    %c0_i32_0 = arith.constant 0 : i32
    %c0_i32_1 = arith.constant 0 : i32
    return %c0_i32, %c0_i32_0 : i32, i32
  }
  func.func @transform_10(%arg0: i32) -> (i32, i32) {
    %c0_i32 = arith.constant 0 : i32
    %c0_i32_0 = arith.constant 0 : i32
    %c0_i32_1 = arith.constant 0 : i32
    return %c0_i32, %c0_i32_0 : i32, i32
  }
  func.func @transform_11(%arg0: i32) -> (i32, i32) {
    %c0_i32 = arith.constant 0 : i32
    %c0_i32_0 = arith.constant 0 : i32
    %c0_i32_1 = arith.constant 0 : i32
    return %c0_i32, %c0_i32_0 : i32, i32
  }
  func.func @transform_12(%arg0: i32) -> (i32, i32) {
    %c0_i32 = arith.constant 0 : i32
    %c0_i32_0 = arith.constant 0 : i32
    %c0_i32_1 = arith.constant 0 : i32
    return %c0_i32, %c0_i32_0 : i32, i32
  }
  func.func @transform_13(%arg0: i32) -> (i32, i32) {
    %c0_i32 = arith.constant 0 : i32
    %c0_i32_0 = arith.constant 0 : i32
    %c0_i32_1 = arith.constant 0 : i32
    return %c0_i32, %c0_i32_0 : i32, i32
  }
}

</mosaic_0001>

<bundles_post_ra>
// kernel: _lambda_.4
= control target key start
LH: loop header
LB: loop body
LE: loop exit
PB: predicated region body
PF: predicated region fallthrough
CT: control target
= control target key end

     0   :  { %s758_s12 = smov 0   ;;  %s1076_s0 = inlined_call_operand.vmem [shape: f32[512,256], index: 0, kind: input, shape index: {}]   ;;  %s1077_s1 = inlined_call_operand.vmem [shape: f32[256,32], index: 1, kind: input, shape index: {}]   ;;  %s1078_s2 = inlined_call_operand.vmem [shape: f32[1,32], index: 2, kind: input, shape index: {}]   ;;  %s1079_s3 = inlined_call_operand.vmem [shape: f32[512,32], index: 3, kind: output, shape index: {}]  }
   0x1 LB: > { %s626_s13 = sadd.s32 4294967295, %s735_s12   ;;  %p630_p0 = scmp.ge.s32.totalorder %s735_s12, 1  ;;  %s735_s12 = sphi %s758_s12, %s13_s12  }
   0x2   : > { %p139_p1 = scmp.lt.s32.totalorder %s735_s12, 3 }
   0x4   : > { %p140_p2 = pnand %p630_p0, %p139_p1 }
   0x5   : > { %v241_v0 = vld [vmem:[%s1077_s1] sm:$0xff] (!%p140_p2)  ;;  %v242_v1 = vld [vmem:[%s1077_s1 + $0x8] sm:$0xff] (!%p140_p2)  ;;  %v243_v2 = vld [vmem:[%s1077_s1 + $0x10] sm:$0xff] (!%p140_p2)  ;;  %s631_s20 = sshll.u32 (!%p140_p2), %s626_s13, 5  ;;  %v737_v3 = vmov (!%p140_p2), 0.0|0.0   ;;  %vm537_vm0 = vcmask (!%p140_p2), 261120  }
   0x6   : > { %143 = sbr.rel (%p140_p2) target bundleno = 348 (0x15c), region = 32  ;;  %640 = vmatprep.subr.bf16.mxu0 (!%p140_p2), %v737_v3  ;;  %688 = vmatprep.subr.bf16.mxu1 (!%p140_p2), %v737_v3  ;;  %v641_v4 = vpack.c.bf16 (!%p140_p2), %v242_v1, %v241_v0  ;;  %v244_v5 = vld [vmem:[%s1077_s1 + $0x18] sm:$0xff] (!%p140_p2)  ;;  %p165_p3 = scmp.lt.s32.totalorder (!%p140_p2), %s631_s20, 63  ;;  %v245_v7 = vld [vmem:[%s1077_s1 + $0x20] sm:$0xff] (!%p140_p2)  ;;  %v246_v8 = vld [vmem:[%s1077_s1 + $0x28] sm:$0xff] (!%p140_p2) }
   0x7   : > { %v644_v6 = vpack.c.bf16 (!%p140_p2), %v244_v5, %v243_v2  ;;  %v647_v9 = vpack.c.bf16 (!%p140_p2), %v246_v8, %v245_v7  ;;  %v247_v10 = vld [vmem:[%s1077_s1 + $0x30] sm:$0xff] (!%p140_p2)  ;;  %v248_v11 = vld [vmem:[%s1077_s1 + $0x38] sm:$0xff] (!%p140_p2)  ;;  %v249_v15 = vld [vmem:[%s1077_s1 + $0x40] sm:$0xff] (!%p140_p2) }
   0x8   : > { %642 = vmatpush1.bf16.msra.mxu0 (!%p140_p2), %v641_v4  ;;  %704 = vmatpush1.bf16.msra.mxu1 (!%p140_p2), %v641_v4  ;;  %v650_v13 = vpack.c.bf16 (!%p140_p2), %v248_v11, %v247_v10  ;;  %v250_v16 = vld [vmem:[%s1077_s1 + $0x48] sm:$0xff] (!%p140_p2)  ;;  %v251_v18 = vld [vmem:[%s1077_s1 + $0x50] sm:$0xff] (!%p140_p2)  ;;  %v252_v19 = vld [vmem:[%s1077_s1 + $0x58] sm:$0xff] (!%p140_p2) }
   0x9   : > { %643 = vmatprep.subr.bf16.mxu0 (!%p140_p2), %v737_v3  ;;  %689 = vmatprep.subr.bf16.mxu1 (!%p140_p2), %v737_v3  ;;  %v653_v17 = vpack.c.bf16 (!%p140_p2), %v250_v16, %v249_v15  ;;  %v656_v20 = vpack.c.bf16 (!%p140_p2), %v252_v19, %v251_v18  ;;  %v253_v21 = vld [vmem:[%s1077_s1 + $0x60] sm:$0xff] (!%p140_p2)  ;;  %v254_v22 = vld [vmem:[%s1077_s1 + $0x68] sm:$0xff] (!%p140_p2)  ;;  %v255_v24 = vld [vmem:[%s1077_s1 + $0x70] sm:$0xff] (!%p140_p2) }
   0xa   : > { %v659_v23 = vpack.c.bf16 (!%p140_p2), %v254_v22, %v253_v21  ;;  %v256_v25 = vld [vmem:[%s1077_s1 + $0x78] sm:$0xff] (!%p140_p2)  ;;  %v257_v27 = vld [vmem:[%s1077_s1 + $0x80] sm:$0xff] (!%p140_p2)  ;;  %v258_v28 = vld [vmem:[%s1077_s1 + $0x88] sm:$0xff] (!%p140_p2) }
   0xb   : > { %v662_v26 = vpack.c.bf16 (!%p140_p2), %v256_v25, %v255_v24  ;;  %v665_v29 = vpack.c.bf16 (!%p140_p2), %v258_v28, %v257_v27  ;;  %v259_v30 = vld [vmem:[%s1077_s1 + $0x90] sm:$0xff] (!%p140_p2)  ;;  %v260_v31 = vld [vmem:[%s1077_s1 + $0x98] sm:$0xff] (!%p140_p2)  ;;  %v261_v33 = vld [vmem:[%s1077_s1 + $0xa0] sm:$0xff] (!%p140_p2) }
   0xc   : > { %645 = vmatpush1.bf16.msra.mxu0 (!%p140_p2), %v644_v6  ;;  %705 = vmatpush1.bf16.msra.mxu1 (!%p140_p2), %v644_v6  ;;  %v668_v32 = vpack.c.bf16 (!%p140_p2), %v260_v31, %v259_v30  ;;  %v262_v34 = vld [vmem:[%s1077_s1 + $0xa8] sm:$0xff] (!%p140_p2)  ;;  %v263_v36 = vld [vmem:[%s1077_s1 + $0xb0] sm:$0xff] (!%p140_p2)  ;;  %v264_v37 = vld [vmem:[%s1077_s1 + $0xb8] sm:$0xff] (!%p140_p2) }
   0xd   : > { %s1081_s20 = smov (!%p165_p3, %s631_s20), 63  ;;  %646 = vmatprep.subr.bf16.mxu0 %v737_v3  ;;  %690 = vmatprep.subr.bf16.mxu1 %v737_v3  ;;  %v671_v35 = vpack.c.bf16 %v262_v34, %v261_v33  ;;  %v674_v38 = vpack.c.bf16 %v264_v37, %v263_v36  ;;  %v265_v39 = vld [vmem:[%s1077_s1 + $0xc0] sm:$0xff]  ;;  %v266_v40 = vld [vmem:[%s1077_s1 + $0xc8] sm:$0xff]  ;;  %v267_v42 = vld [vmem:[%s1077_s1 + $0xd0] sm:$0xff] }
   0xe   : > { %s639_s27 = sshll.u32 %s1081_s20, 4  ;;  %v677_v41 = vpack.c.bf16 %v266_v40, %v265_v39  ;;  %v268_v43 = vld [vmem:[%s1077_s1 + $0xd8] sm:$0xff]  ;;  %v269_v45 = vld [vmem:[%s1077_s1 + $0xe0] sm:$0xff]  ;;  %v270_v46 = vld [vmem:[%s1077_s1 + $0xe8] sm:$0xff]  ;;  %s635_s10 = sshll.u32 %s1081_s20, 3 }
   0xf   : > { %s794_s30 = scalar_lea.vmem %s1076_s0, %s639_s27  ;;  %v680_v44 = vpack.c.bf16 %v268_v43, %v267_v42  ;;  %v683_v47 = vpack.c.bf16 %v270_v46, %v269_v45  ;;  %v271_v48 = vld [vmem:[%s1077_s1 + $0xf0] sm:$0xff]  ;;  %v272_v49 = vld [vmem:[%s1077_s1 + $0xf8] sm:$0xff] }
  0x10   : > { %v178_v12 = vld [vmem:[%s794_s30 + $0x8] sm:$0xff]  ;;  %648 = vmatpush1.bf16.msra.mxu0 %v647_v9  ;;  %706 = vmatpush1.bf16.msra.mxu1 %v647_v9  ;;  %v686_v50 = vpack.c.bf16 %v272_v49, %v271_v48  ;;  %v177_v51 = vld [vmem:[%s794_s30] sm:$0xff]  ;;  %v180_v53 = vld [vmem:[%s794_s30 + $0x18] sm:$0xff] }
  0x11   : > { %v210_v14 = vld [vmem:[%s794_s30 + $0x108] sm:$0xff]  ;;  %649 = vmatprep.subr.bf16.mxu0 %v737_v3  ;;  %691 = vmatprep.subr.bf16.mxu1 %v737_v3  ;;  %v209_v52 = vld [vmem:[%s794_s30 + $0x100] sm:$0xff]  ;;  %v212_v54 = vld [vmem:[%s794_s30 + $0x118] sm:$0xff] }
  0x12   : > { %344 = vmatprep.mubr.f32.mxu0 %v178_v12  ;;  %424 = vmatprep.mubr.f32.mxu1 %v210_v14  ;;  %v179_v55 = vld [vmem:[%s794_s30 + $0x10] sm:$0xff]  ;;  %v182_v57 = vld [vmem:[%s794_s30 + $0x28] sm:$0xff]  ;;  %v181_v59 = vld [vmem:[%s794_s30 + $0x20] sm:$0xff] }
  0x13   : > { %v211_v56 = vld [vmem:[%s794_s30 + $0x110] sm:$0xff]  ;;  %v214_v58 = vld [vmem:[%s794_s30 + $0x128] sm:$0xff]  ;;  %v213_v60 = vld [vmem:[%s794_s30 + $0x120] sm:$0xff] }
  0x14   : > { %651 = vmatpush1.bf16.msra.mxu0 %v650_v13  ;;  %707 = vmatpush1.bf16.msra.mxu1 %v650_v13  ;;  %v184_v61 = vld [vmem:[%s794_s30 + $0x38] sm:$0xff]  ;;  %v183_v63 = vld [vmem:[%s794_s30 + $0x30] sm:$0xff]  ;;  %v186_v1 = vld [vmem:[%s794_s30 + $0x48] sm:$0xff] }
  0x15   : > { %652 = vmatprep.subr.bf16.mxu0 %v737_v3  ;;  %692 = vmatprep.subr.bf16.mxu1 %v737_v3  ;;  %v216_v62 = vld [vmem:[%s794_s30 + $0x138] sm:$0xff]  ;;  %v215_v0 = vld [vmem:[%s794_s30 + $0x130] sm:$0xff]  ;;  %v218_v2 = vld [vmem:[%s794_s30 + $0x148] sm:$0xff] }
  0x16   : > { %v217_v4 = vld [vmem:[%s794_s30 + $0x140] sm:$0xff]  ;;  %v188_v5 = vld [vmem:[%s794_s30 + $0x58] sm:$0xff]  ;;  %v187_v7 = vld [vmem:[%s794_s30 + $0x50] sm:$0xff] }
  0x17   : > { %v220_v6 = vld [vmem:[%s794_s30 + $0x158] sm:$0xff]  ;;  %v219_v8 = vld [vmem:[%s794_s30 + $0x150] sm:$0xff]  ;;  %v190_v9 = vld [vmem:[%s794_s30 + $0x68] sm:$0xff] }
  0x18   : > { %654 = vmatpush1.bf16.msra.mxu0 %v653_v17  ;;  %708 = vmatpush1.bf16.msra.mxu1 %v653_v17  ;;  %v222_v10 = vld [vmem:[%s794_s30 + $0x168] sm:$0xff]  ;;  %v189_v11 = vld [vmem:[%s794_s30 + $0x60] sm:$0xff]  ;;  %v192_v13 = vld [vmem:[%s794_s30 + $0x78] sm:$0xff] }
  0x19   : > { %655 = vmatprep.subr.bf16.mxu0 %v737_v3  ;;  %693 = vmatprep.subr.bf16.mxu1 %v737_v3  ;;  %v221_v12 = vld [vmem:[%s794_s30 + $0x160] sm:$0xff]  ;;  %v224_v14 = vld [vmem:[%s794_s30 + $0x178] sm:$0xff]  ;;  %v191_v15 = vld [vmem:[%s794_s30 + $0x70] sm:$0xff] }
  0x1a   : > { %v223_v16 = vld [vmem:[%s794_s30 + $0x170] sm:$0xff]  ;;  %v194_v17 = vld [vmem:[%s794_s30 + $0x88] sm:$0xff]  ;;  %v193_v19 = vld [vmem:[%s794_s30 + $0x80] sm:$0xff] }
  0x1b   : > { %v226_v18 = vld [vmem:[%s794_s30 + $0x188] sm:$0xff]  ;;  %v196_v21 = vld [vmem:[%s794_s30 + $0x98] sm:$0xff]  ;;  %v227_v24 = vld [vmem:[%s794_s30 + $0x190] sm:$0xff] }
  0x1c   : > { %657 = vmatpush1.bf16.msra.mxu0 %v656_v20  ;;  %709 = vmatpush1.bf16.msra.mxu1 %v656_v20  ;;  %v225_v20 = vld [vmem:[%s794_s30 + $0x180] sm:$0xff]  ;;  %v228_v22 = vld [vmem:[%s794_s30 + $0x198] sm:$0xff]  ;;  %v198_v25 = vld [vmem:[%s794_s30 + $0xa8] sm:$0xff] }
  0x1d   : > { %658 = vmatprep.subr.bf16.mxu0 %v737_v3  ;;  %694 = vmatprep.subr.bf16.mxu1 %v737_v3  ;;  %v197_v27 = vld [vmem:[%s794_s30 + $0xa0] sm:$0xff]  ;;  %v232_v30 = vld [vmem:[%s794_s30 + $0x1b8] sm:$0xff]  ;;  %v199_v31 = vld [vmem:[%s794_s30 + $0xb0] sm:$0xff] }
  0x1e   : > { %v229_v28 = vld [vmem:[%s794_s30 + $0x1a0] sm:$0xff]  ;;  %v202_v33 = vld [vmem:[%s794_s30 + $0xc8] sm:$0xff]  ;;  %v204_v37 = vld [vmem:[%s794_s30 + $0xd8] sm:$0xff] }
  0x1f   : > { %v234_v34 = vld [vmem:[%s794_s30 + $0x1c8] sm:$0xff]  ;;  %v233_v36 = vld [vmem:[%s794_s30 + $0x1c0] sm:$0xff]  ;;  %v203_v39 = vld [vmem:[%s794_s30 + $0xd0] sm:$0xff] }
  0x20   : > { %660 = vmatpush1.bf16.msra.mxu0 %v659_v23  ;;  %710 = vmatpush1.bf16.msra.mxu1 %v659_v23  ;;  %v195_v23 = vld [vmem:[%s794_s30 + $0x90] sm:$0xff]  ;;  %v238_v42 = vld [vmem:[%s794_s30 + $0x1e8] sm:$0xff]  ;;  %v205_v43 = vld [vmem:[%s794_s30 + $0xe0] sm:$0xff] }
  0x21   : > { %661 = vmatprep.subr.bf16.mxu0 %v737_v3  ;;  %695 = vmatprep.subr.bf16.mxu1 %v737_v3  ;;  %v235_v40 = vld [vmem:[%s794_s30 + $0x1d0] sm:$0xff]  ;;  %v208_v45 = vld [vmem:[%s794_s30 + $0xf8] sm:$0xff]  ;;  %v969_v49 = vld [vmem:[%s1078_s2] ss:$0 sm:$0xff] }
  0x22   : > { %v240_v46 = vld [vmem:[%s794_s30 + $0x1f8] sm:$0xff]  ;;  %v239_v48 = vld [vmem:[%s794_s30 + $0x1f0] sm:$0xff] }
  0x24   : > { %663 = vmatpush1.bf16.msra.mxu0 %v662_v26  ;;  %711 = vmatpush1.bf16.msra.mxu1 %v662_v26  ;;  %v230_v26 = vld [vmem:[%s794_s30 + $0x1a8] sm:$0xff] }
  0x25   : > { %664 = vmatprep.subr.bf16.mxu0 %v737_v3  ;;  %696 = vmatprep.subr.bf16.mxu1 %v737_v3 }
  0x28   : > { %666 = vmatpush1.bf16.msra.mxu0 %v665_v29  ;;  %712 = vmatpush1.bf16.msra.mxu1 %v665_v29  ;;  %v200_v29 = vld [vmem:[%s794_s30 + $0xb8] sm:$0xff] }
  0x29   : > { %667 = vmatprep.subr.bf16.mxu0 %v737_v3  ;;  %697 = vmatprep.subr.bf16.mxu1 %v737_v3 }
  0x2c   : > { %669 = vmatpush1.bf16.msra.mxu0 %v668_v32  ;;  %713 = vmatpush1.bf16.msra.mxu1 %v668_v32  ;;  %v231_v32 = vld [vmem:[%s794_s30 + $0x1b0] sm:$0xff] }
  0x2d   : > { %670 = vmatprep.subr.bf16.mxu0 %v737_v3  ;;  %698 = vmatprep.subr.bf16.mxu1 %v737_v3 }
  0x30   : > { %672 = vmatpush1.bf16.msra.mxu0 %v671_v35  ;;  %714 = vmatpush1.bf16.msra.mxu1 %v671_v35  ;;  %v201_v35 = vld [vmem:[%s794_s30 + $0xc0] sm:$0xff] }
  0x31   : > { %673 = vmatprep.subr.bf16.mxu0 %v737_v3  ;;  %699 = vmatprep.subr.bf16.mxu1 %v737_v3 }
  0x34   : > { %675 = vmatpush1.bf16.msra.mxu0 %v674_v38  ;;  %715 = vmatpush1.bf16.msra.mxu1 %v674_v38  ;;  %v236_v38 = vld [vmem:[%s794_s30 + $0x1d8] sm:$0xff] }
  0x35   : > { %676 = vmatprep.subr.bf16.mxu0 %v737_v3  ;;  %700 = vmatprep.subr.bf16.mxu1 %v737_v3 }
  0x38   : > { %678 = vmatpush1.bf16.msra.mxu0 %v677_v41  ;;  %716 = vmatpush1.bf16.msra.mxu1 %v677_v41  ;;  %v206_v41 = vld [vmem:[%s794_s30 + $0xe8] sm:$0xff] }
  0x39   : > { %679 = vmatprep.subr.bf16.mxu0 %v737_v3  ;;  %701 = vmatprep.subr.bf16.mxu1 %v737_v3 }
  0x3c   : > { %681 = vmatpush1.bf16.msra.mxu0 %v680_v44  ;;  %717 = vmatpush1.bf16.msra.mxu1 %v680_v44  ;;  %v237_v44 = vld [vmem:[%s794_s30 + $0x1e0] sm:$0xff] }
  0x3d   : > { %682 = vmatprep.subr.bf16.mxu0 %v737_v3  ;;  %702 = vmatprep.subr.bf16.mxu1 %v737_v3 }
  0x40   : > { %684 = vmatpush1.bf16.msra.mxu0 %v683_v47  ;;  %718 = vmatpush1.bf16.msra.mxu1 %v683_v47  ;;  %v207_v47 = vld [vmem:[%s794_s30 + $0xf0] sm:$0xff] }
  0x41   : > { %685 = vmatprep.subr.bf16.mxu0 %v737_v3  ;;  %703 = vmatprep.subr.bf16.mxu1 %v737_v3  ;;  %v185_v3 = vld [vmem:[%s794_s30 + $0x40] sm:$0xff]  ;;  %s977_s30 = scalar_lea.vmem %s1079_s3, %s635_s10 }
  0x44   : > { %687 = vmatpush1.bf16.msra.mxu0 %v686_v50  ;;  %719 = vmatpush1.bf16.msra.mxu1 %v686_v50 }
  0x47   : > { %345 = vmatmul.mubr.f32.vlgmr.msra.gmra.mrb[0].mxu0 %v177_v51  ;;  %425 = vmatmul.mubr.f32.vlgmr.msra.gmra.mrb[0].mxu1 %v209_v52 }
  0x48   : > { %349 = vmatprep.mubr.f32.mxu0 %v180_v53  ;;  %429 = vmatprep.mubr.f32.mxu1 %v212_v54 }
  0x4b   : > { %350 = vmatmul.mubr.f32.gmra.mrb[2].mxu0 %v179_v55  ;;  %430 = vmatmul.mubr.f32.gmra.mrb[2].mxu1 %v211_v56 }
  0x4c   : > { %354 = vmatprep.mubr.f32.mxu0 %v182_v57  ;;  %434 = vmatprep.mubr.f32.mxu1 %v214_v58 }
  0x4f   : > { %355 = vmatmul.mubr.f32.gmra.mrb[4].mxu0 %v181_v59  ;;  %435 = vmatmul.mubr.f32.gmra.mrb[4].mxu1 %v213_v60 }
  0x50   : > { %359 = vmatprep.mubr.f32.mxu0 %v184_v61  ;;  %439 = vmatprep.mubr.f32.mxu1 %v216_v62 }
  0x53   : > { %360 = vmatmul.mubr.f32.gmra.mrb[6].mxu0 %v183_v63  ;;  %440 = vmatmul.mubr.f32.gmra.mrb[6].mxu1 %v215_v0 }
  0x54   : > { %364 = vmatprep.mubr.f32.mxu0 %v186_v1  ;;  %444 = vmatprep.mubr.f32.mxu1 %v218_v2 }
  0x57   : > { %365 = vmatmul.mubr.f32.gmra.mrb[8].mxu0 %v185_v3  ;;  %445 = vmatmul.mubr.f32.gmra.mrb[8].mxu1 %v217_v4 }
  0x58   : > { %369 = vmatprep.mubr.f32.mxu0 %v188_v5  ;;  %449 = vmatprep.mubr.f32.mxu1 %v220_v6 }
  0x5b   : > { %370 = vmatmul.mubr.f32.gmra.mrb[10].mxu0 %v187_v7  ;;  %450 = vmatmul.mubr.f32.gmra.mrb[10].mxu1 %v219_v8 }
  0x5c   : > { %374 = vmatprep.mubr.f32.mxu0 %v190_v9  ;;  %454 = vmatprep.mubr.f32.mxu1 %v222_v10 }
  0x5f   : > { %375 = vmatmul.mubr.f32.gmra.mrb[12].mxu0 %v189_v11  ;;  %455 = vmatmul.mubr.f32.gmra.mrb[12].mxu1 %v221_v12 }
  0x60   : > { %379 = vmatprep.mubr.f32.mxu0 %v192_v13  ;;  %459 = vmatprep.mubr.f32.mxu1 %v224_v14 }
  0x63   : > { %380 = vmatmul.mubr.f32.gmra.mrb[14].mxu0 %v191_v15  ;;  %460 = vmatmul.mubr.f32.gmra.mrb[14].mxu1 %v223_v16 }
  0x64   : > { %384 = vmatprep.mubr.f32.mxu0 %v194_v17  ;;  %464 = vmatprep.mubr.f32.mxu1 %v226_v18 }
  0x67   : > { %385 = vmatmul.mubr.f32.gmra.mrb[16].mxu0 %v193_v19  ;;  %465 = vmatmul.mubr.f32.gmra.mrb[16].mxu1 %v225_v20 }
  0x68   : > { %389 = vmatprep.mubr.f32.mxu0 %v196_v21  ;;  %469 = vmatprep.mubr.f32.mxu1 %v228_v22 }
  0x6b   : > { %390 = vmatmul.mubr.f32.gmra.mrb[18].mxu0 %v195_v23  ;;  %470 = vmatmul.mubr.f32.gmra.mrb[18].mxu1 %v227_v24 }
  0x6c   : > { %394 = vmatprep.mubr.f32.mxu0 %v198_v25  ;;  %474 = vmatprep.mubr.f32.mxu1 %v230_v26 }
  0x6f   : > { %395 = vmatmul.mubr.f32.gmra.mrb[20].mxu0 %v197_v27  ;;  %475 = vmatmul.mubr.f32.gmra.mrb[20].mxu1 %v229_v28 }
  0x70   : > { %399 = vmatprep.mubr.f32.mxu0 %v200_v29  ;;  %479 = vmatprep.mubr.f32.mxu1 %v232_v30 }
  0x73   : > { %400 = vmatmul.mubr.f32.gmra.mrb[22].mxu0 %v199_v31  ;;  %480 = vmatmul.mubr.f32.gmra.mrb[22].mxu1 %v231_v32 }
  0x74   : > { %404 = vmatprep.mubr.f32.mxu0 %v202_v33  ;;  %484 = vmatprep.mubr.f32.mxu1 %v234_v34 }
  0x77   : > { %405 = vmatmul.mubr.f32.gmra.mrb[24].mxu0 %v201_v35  ;;  %485 = vmatmul.mubr.f32.gmra.mrb[24].mxu1 %v233_v36 }
  0x78   : > { %409 = vmatprep.mubr.f32.mxu0 %v204_v37  ;;  %489 = vmatprep.mubr.f32.mxu1 %v236_v38 }
  0x7b   : > { %410 = vmatmul.mubr.f32.gmra.mrb[26].mxu0 %v203_v39  ;;  %490 = vmatmul.mubr.f32.gmra.mrb[26].mxu1 %v235_v40 }
  0x7c   : > { %414 = vmatprep.mubr.f32.mxu0 %v206_v41  ;;  %494 = vmatprep.mubr.f32.mxu1 %v238_v42 }
  0x7f   : > { %415 = vmatmul.mubr.f32.gmra.mrb[28].mxu0 %v205_v43  ;;  %495 = vmatmul.mubr.f32.gmra.mrb[28].mxu1 %v237_v44 }
  0x80   : > { %419 = vmatprep.mubr.f32.mxu0 %v208_v45  ;;  %499 = vmatprep.mubr.f32.mxu1 %v240_v46 }
  0x83   : > { %420 = vmatmul.mubr.f32.gmra.mrb[30].mxu0 %v207_v47  ;;  %500 = vmatmul.mubr.f32.gmra.mrb[30].mxu1 %v239_v48 }
 0x11a   : > { %v346_v50 = vpop.f32.mrb[0].mxu0  ;;  %v426_v51 = vpop.f32.mrb[0].mxu1 }
 0x11b   : > { %v347_v52 = vadd.f32 %v969_v49, %v346_v50  ;;  %v427_v53 = vadd.f32 %v969_v49, %v426_v51  ;;  %v348_v54 = vpop.f32.mrb[1].mxu0  ;;  %v428_v55 = vpop.f32.mrb[1].mxu1 }
 0x11d   : > { %v505_v56 = vmax.f32 %v347_v52, 0.0  ;;  %v521_v57 = vmax.f32 %v427_v53, 0.0 }
 0x11e   : > { %v351_v58 = vpop.f32.mrb[2].mxu0  ;;  %v431_v59 = vpop.f32.mrb[2].mxu1 }
 0x11f   : > { %538 = vst.msk [vmem:[%s977_s30] sm:$0xff] %vm537_vm0, %v505_v56  ;;  %554 = vst.msk [vmem:[%s977_s30 + $0x80] sm:$0xff] %vm537_vm0, %v521_v57  ;;  %v352_v60 = vadd.f32 %v969_v49, %v351_v58  ;;  %v432_v61 = vadd.f32 %v969_v49, %v431_v59  ;;  %v353_v62 = vpop.f32.mrb[3].mxu0  ;;  %v433_v63 = vpop.f32.mrb[3].mxu1 }
 0x121   : > { %v506_v0 = vmax.f32 %v352_v60, 0.0  ;;  %v522_v1 = vmax.f32 %v432_v61, 0.0 }
 0x122   : > { %v356_v2 = vpop.f32.mrb[4].mxu0  ;;  %v436_v3 = vpop.f32.mrb[4].mxu1 }
 0x123   : > { %539 = vst.msk [vmem:[%s977_s30 + $0x8] sm:$0xff] %vm537_vm0, %v506_v0  ;;  %555 = vst.msk [vmem:[%s977_s30 + $0x88] sm:$0xff] %vm537_vm0, %v522_v1  ;;  %v357_v4 = vadd.f32 %v969_v49, %v356_v2  ;;  %v437_v5 = vadd.f32 %v969_v49, %v436_v3  ;;  %v358_v6 = vpop.f32.mrb[5].mxu0  ;;  %v438_v7 = vpop.f32.mrb[5].mxu1 }
 0x125   : > { %v507_v8 = vmax.f32 %v357_v4, 0.0  ;;  %v523_v9 = vmax.f32 %v437_v5, 0.0 }
 0x126   : > { %v361_v10 = vpop.f32.mrb[6].mxu0  ;;  %v441_v11 = vpop.f32.mrb[6].mxu1 }
 0x127   : > { %540 = vst.msk [vmem:[%s977_s30 + $0x10] sm:$0xff] %vm537_vm0, %v507_v8  ;;  %556 = vst.msk [vmem:[%s977_s30 + $0x90] sm:$0xff] %vm537_vm0, %v523_v9  ;;  %v362_v12 = vadd.f32 %v969_v49, %v361_v10  ;;  %v442_v13 = vadd.f32 %v969_v49, %v441_v11  ;;  %v363_v14 = vpop.f32.mrb[7].mxu0  ;;  %v443_v15 = vpop.f32.mrb[7].mxu1 }
 0x129   : > { %v508_v16 = vmax.f32 %v362_v12, 0.0  ;;  %v524_v17 = vmax.f32 %v442_v13, 0.0 }
 0x12a   : > { %v366_v18 = vpop.f32.mrb[8].mxu0  ;;  %v446_v19 = vpop.f32.mrb[8].mxu1 }
 0x12b   : > { %541 = vst.msk [vmem:[%s977_s30 + $0x18] sm:$0xff] %vm537_vm0, %v508_v16  ;;  %557 = vst.msk [vmem:[%s977_s30 + $0x98] sm:$0xff] %vm537_vm0, %v524_v17  ;;  %v367_v20 = vadd.f32 %v969_v49, %v366_v18  ;;  %v447_v21 = vadd.f32 %v969_v49, %v446_v19  ;;  %v368_v22 = vpop.f32.mrb[9].mxu0  ;;  %v448_v23 = vpop.f32.mrb[9].mxu1 }
 0x12d   : > { %v509_v24 = vmax.f32 %v367_v20, 0.0  ;;  %v525_v25 = vmax.f32 %v447_v21, 0.0 }
 0x12e   : > { %v371_v26 = vpop.f32.mrb[10].mxu0  ;;  %v451_v27 = vpop.f32.mrb[10].mxu1 }
 0x12f   : > { %542 = vst.msk [vmem:[%s977_s30 + $0x20] sm:$0xff] %vm537_vm0, %v509_v24  ;;  %558 = vst.msk [vmem:[%s977_s30 + $0xa0] sm:$0xff] %vm537_vm0, %v525_v25  ;;  %v372_v28 = vadd.f32 %v969_v49, %v371_v26  ;;  %v452_v29 = vadd.f32 %v969_v49, %v451_v27  ;;  %v373_v30 = vpop.f32.mrb[11].mxu0  ;;  %v453_v31 = vpop.f32.mrb[11].mxu1 }
 0x131   : > { %v510_v32 = vmax.f32 %v372_v28, 0.0  ;;  %v526_v33 = vmax.f32 %v452_v29, 0.0 }
 0x132   : > { %v376_v34 = vpop.f32.mrb[12].mxu0  ;;  %v456_v35 = vpop.f32.mrb[12].mxu1 }
 0x133   : > { %543 = vst.msk [vmem:[%s977_s30 + $0x28] sm:$0xff] %vm537_vm0, %v510_v32  ;;  %559 = vst.msk [vmem:[%s977_s30 + $0xa8] sm:$0xff] %vm537_vm0, %v526_v33  ;;  %v377_v36 = vadd.f32 %v969_v49, %v376_v34  ;;  %v457_v37 = vadd.f32 %v969_v49, %v456_v35  ;;  %v378_v38 = vpop.f32.mrb[13].mxu0  ;;  %v458_v39 = vpop.f32.mrb[13].mxu1 }
 0x135   : > { %v511_v40 = vmax.f32 %v377_v36, 0.0  ;;  %v527_v41 = vmax.f32 %v457_v37, 0.0 }
 0x136   : > { %v381_v42 = vpop.f32.mrb[14].mxu0  ;;  %v461_v43 = vpop.f32.mrb[14].mxu1 }
 0x137   : > { %544 = vst.msk [vmem:[%s977_s30 + $0x30] sm:$0xff] %vm537_vm0, %v511_v40  ;;  %560 = vst.msk [vmem:[%s977_s30 + $0xb0] sm:$0xff] %vm537_vm0, %v527_v41  ;;  %v382_v44 = vadd.f32 %v969_v49, %v381_v42  ;;  %v462_v45 = vadd.f32 %v969_v49, %v461_v43  ;;  %v383_v46 = vpop.f32.mrb[15].mxu0  ;;  %v463_v47 = vpop.f32.mrb[15].mxu1 }
 0x139   : > { %v512_v48 = vmax.f32 %v382_v44, 0.0  ;;  %v528_v50 = vmax.f32 %v462_v45, 0.0 }
 0x13a   : > { %v386_v51 = vpop.f32.mrb[16].mxu0  ;;  %v466_v52 = vpop.f32.mrb[16].mxu1 }
 0x13b   : > { %545 = vst.msk [vmem:[%s977_s30 + $0x38] sm:$0xff] %vm537_vm0, %v512_v48  ;;  %561 = vst.msk [vmem:[%s977_s30 + $0xb8] sm:$0xff] %vm537_vm0, %v528_v50  ;;  %v387_v53 = vadd.f32 %v969_v49, %v386_v51  ;;  %v467_v54 = vadd.f32 %v969_v49, %v466_v52  ;;  %v388_v55 = vpop.f32.mrb[17].mxu0  ;;  %v468_v56 = vpop.f32.mrb[17].mxu1 }
 0x13d   : > { %v513_v57 = vmax.f32 %v387_v53, 0.0  ;;  %v529_v58 = vmax.f32 %v467_v54, 0.0 }
 0x13e   : > { %v391_v59 = vpop.f32.mrb[18].mxu0  ;;  %v471_v60 = vpop.f32.mrb[18].mxu1 }
 0x13f   : > { %546 = vst.msk [vmem:[%s977_s30 + $0x40] sm:$0xff] %vm537_vm0, %v513_v57  ;;  %562 = vst.msk [vmem:[%s977_s30 + $0xc0] sm:$0xff] %vm537_vm0, %v529_v58  ;;  %v392_v61 = vadd.f32 %v969_v49, %v391_v59  ;;  %v472_v62 = vadd.f32 %v969_v49, %v471_v60  ;;  %v393_v63 = vpop.f32.mrb[19].mxu0  ;;  %v473_v0 = vpop.f32.mrb[19].mxu1 }
 0x141   : > { %v514_v1 = vmax.f32 %v392_v61, 0.0  ;;  %v530_v2 = vmax.f32 %v472_v62, 0.0 }
 0x142   : > { %v396_v3 = vpop.f32.mrb[20].mxu0  ;;  %v476_v4 = vpop.f32.mrb[20].mxu1 }
 0x143   : > { %547 = vst.msk [vmem:[%s977_s30 + $0x48] sm:$0xff] %vm537_vm0, %v514_v1  ;;  %563 = vst.msk [vmem:[%s977_s30 + $0xc8] sm:$0xff] %vm537_vm0, %v530_v2  ;;  %v397_v5 = vadd.f32 %v969_v49, %v396_v3  ;;  %v477_v6 = vadd.f32 %v969_v49, %v476_v4  ;;  %v398_v7 = vpop.f32.mrb[21].mxu0  ;;  %v478_v8 = vpop.f32.mrb[21].mxu1 }
 0x145   : > { %v515_v9 = vmax.f32 %v397_v5, 0.0  ;;  %v531_v10 = vmax.f32 %v477_v6, 0.0 }
 0x146   : > { %v401_v11 = vpop.f32.mrb[22].mxu0  ;;  %v481_v12 = vpop.f32.mrb[22].mxu1 }
 0x147   : > { %548 = vst.msk [vmem:[%s977_s30 + $0x50] sm:$0xff] %vm537_vm0, %v515_v9  ;;  %564 = vst.msk [vmem:[%s977_s30 + $0xd0] sm:$0xff] %vm537_vm0, %v531_v10  ;;  %v402_v13 = vadd.f32 %v969_v49, %v401_v11  ;;  %v482_v14 = vadd.f32 %v969_v49, %v481_v12  ;;  %v403_v15 = vpop.f32.mrb[23].mxu0  ;;  %v483_v16 = vpop.f32.mrb[23].mxu1 }
 0x149   : > { %v516_v17 = vmax.f32 %v402_v13, 0.0  ;;  %v532_v18 = vmax.f32 %v482_v14, 0.0 }
 0x14a   : > { %v406_v19 = vpop.f32.mrb[24].mxu0  ;;  %v486_v20 = vpop.f32.mrb[24].mxu1 }
 0x14b   : > { %549 = vst.msk [vmem:[%s977_s30 + $0x58] sm:$0xff] %vm537_vm0, %v516_v17  ;;  %565 = vst.msk [vmem:[%s977_s30 + $0xd8] sm:$0xff] %vm537_vm0, %v532_v18  ;;  %v407_v21 = vadd.f32 %v969_v49, %v406_v19  ;;  %v487_v22 = vadd.f32 %v969_v49, %v486_v20  ;;  %v408_v23 = vpop.f32.mrb[25].mxu0  ;;  %v488_v24 = vpop.f32.mrb[25].mxu1 }
 0x14d   : > { %v517_v25 = vmax.f32 %v407_v21, 0.0  ;;  %v533_v26 = vmax.f32 %v487_v22, 0.0 }
 0x14e   : > { %v411_v27 = vpop.f32.mrb[26].mxu0  ;;  %v491_v28 = vpop.f32.mrb[26].mxu1 }
 0x14f   : > { %550 = vst.msk [vmem:[%s977_s30 + $0x60] sm:$0xff] %vm537_vm0, %v517_v25  ;;  %566 = vst.msk [vmem:[%s977_s30 + $0xe0] sm:$0xff] %vm537_vm0, %v533_v26  ;;  %v412_v29 = vadd.f32 %v969_v49, %v411_v27  ;;  %v492_v30 = vadd.f32 %v969_v49, %v491_v28  ;;  %v413_v31 = vpop.f32.mrb[27].mxu0  ;;  %v493_v32 = vpop.f32.mrb[27].mxu1 }
 0x151   : > { %v518_v33 = vmax.f32 %v412_v29, 0.0  ;;  %v534_v34 = vmax.f32 %v492_v30, 0.0 }
 0x152   : > { %v416_v35 = vpop.f32.mrb[28].mxu0  ;;  %v496_v36 = vpop.f32.mrb[28].mxu1 }
 0x153   : > { %551 = vst.msk [vmem:[%s977_s30 + $0x68] sm:$0xff] %vm537_vm0, %v518_v33  ;;  %567 = vst.msk [vmem:[%s977_s30 + $0xe8] sm:$0xff] %vm537_vm0, %v534_v34  ;;  %v417_v37 = vadd.f32 %v969_v49, %v416_v35  ;;  %v497_v38 = vadd.f32 %v969_v49, %v496_v36  ;;  %v418_v39 = vpop.f32.mrb[29].mxu0  ;;  %v498_v40 = vpop.f32.mrb[29].mxu1 }
 0x155   : > { %v519_v41 = vmax.f32 %v417_v37, 0.0  ;;  %v535_v42 = vmax.f32 %v497_v38, 0.0 }
 0x156   : > { %v421_v43 = vpop.f32.mrb[30].mxu0  ;;  %v501_v44 = vpop.f32.mrb[30].mxu1 }
 0x157   : > { %552 = vst.msk [vmem:[%s977_s30 + $0x70] sm:$0xff] %vm537_vm0, %v519_v41  ;;  %568 = vst.msk [vmem:[%s977_s30 + $0xf0] sm:$0xff] %vm537_vm0, %v535_v42  ;;  %v422_v45 = vadd.f32 %v969_v49, %v421_v43  ;;  %v502_v46 = vadd.f32 %v969_v49, %v501_v44  ;;  %v423_v47 = vpop.f32.mrb[31].mxu0  ;;  %v503_v48 = vpop.f32.mrb[31].mxu1 }
 0x159   : > { %v520_v50 = vmax.f32 %v422_v45, 0.0  ;;  %v536_v51 = vmax.f32 %v502_v46, 0.0 }
 0x15b   : > { %553 = vst.msk [vmem:[%s977_s30 + $0x78] sm:$0xff] %vm537_vm0, %v520_v50  ;;  %569 = vst.msk [vmem:[%s977_s30 + $0xf8] sm:$0xff] %vm537_vm0, %v536_v51 }
 0x15c PF: > { %s13_s12 = sadd.s32 1, %s735_s12  }
 0x15d   : > { %p10_p4 = scmp.ge.s32.totalorder %s13_s12, 4  }
 0x15f   :  { %12 = sbr.rel (!%p10_p4) target bundleno = 1 (0x1), region = 62 }

// kernel: _lambda_.5
= control target key start
LH: loop header
LB: loop body
LE: loop exit
PB: predicated region body
PF: predicated region fallthrough
CT: control target
= control target key end

     0   :  { %vm335_vm0 = vcmask 523264   ;;  %s878_s1 = inlined_call_operand.vmem [shape: f32[512,64], index: 1, kind: input, shape index: {}]   ;;  %s879_s0 = inlined_call_operand.vmem [shape: f32[64,512], index: 0, kind: input, shape index: {}]   ;;  %s880_s2 = inlined_call_operand.vmem [shape: f32[1,64], index: 2, kind: input, shape index: {}]   ;;  %s881_s3 = inlined_call_operand.vmem [shape: f32[64,64], index: 3, kind: output, shape index: {}]  }
   0x1   :  { %v62_v0 = vld [vmem:[%s878_s1 + $0x80] sm:$0xff]  ;;  %v63_v1 = vld [vmem:[%s878_s1 + $0x88] sm:$0xff]  ;;  %v64_v11 = vld [vmem:[%s878_s1 + $0x90] sm:$0xff] }
   0x2   :  { %v46_v2 = vld [vmem:[%s878_s1] sm:$0xff]  ;;  %v461_v3 = vpack.c.bf16 %v63_v1, %v62_v0  ;;  %v47_v4 = vld [vmem:[%s878_s1 + $0x8] sm:$0xff]  ;;  %v65_v13 = vld [vmem:[%s878_s1 + $0x98] sm:$0xff] }
   0x3   :  { %v94_v5 = vld [vmem:[%s878_s1 + $0x180] sm:$0xff]  ;;  %v95_v6 = vld [vmem:[%s878_s1 + $0x188] sm:$0xff]  ;;  %v463_v7 = vpack.c.bf16 %v47_v4, %v46_v2  ;;  %v48_v14 = vld [vmem:[%s878_s1 + $0x10] sm:$0xff]  ;;  %v465_v16 = vpack.c.bf16 %v65_v13, %v64_v11 }
   0x4   :  { %v493_v8 = vpack.c.bf16 %v95_v6, %v94_v5  ;;  %v78_v9 = vld [vmem:[%s878_s1 + $0x100] sm:$0xff]  ;;  %v79_v10 = vld [vmem:[%s878_s1 + $0x108] sm:$0xff]  ;;  %462 = vmatprep.subr.bf16.mxu0 %v461_v3  ;;  %v49_v15 = vld [vmem:[%s878_s1 + $0x18] sm:$0xff] }
   0x5   :  { %v495_v12 = vpack.c.bf16 %v79_v10, %v78_v9  ;;  %464 = vmatpush3.bf16.msra.mxu0 %v463_v7  ;;  %v467_v17 = vpack.c.bf16 %v49_v15, %v48_v14  ;;  %v96_v18 = vld [vmem:[%s878_s1 + $0x190] sm:$0xff]  ;;  %v97_v19 = vld [vmem:[%s878_s1 + $0x198] sm:$0xff]  ;;  %v66_v23 = vld [vmem:[%s878_s1 + $0xa0] sm:$0xff] }
   0x6   :  { %494 = vmatprep.subr.bf16.mxu1 %v493_v8  ;;  %v80_v20 = vld [vmem:[%s878_s1 + $0x110] sm:$0xff]  ;;  %v497_v21 = vpack.c.bf16 %v97_v19, %v96_v18  ;;  %v81_v22 = vld [vmem:[%s878_s1 + $0x118] sm:$0xff]  ;;  %v67_v24 = vld [vmem:[%s878_s1 + $0xa8] sm:$0xff]  ;;  %466 = vmatprep.subr.bf16.mxu0 %v465_v16 }
   0x7   :  { %496 = vmatpush3.bf16.msra.mxu1 %v495_v12  ;;  %v499_v25 = vpack.c.bf16 %v81_v22, %v80_v20  ;;  %v469_v26 = vpack.c.bf16 %v67_v24, %v66_v23  ;;  %v50_v27 = vld [vmem:[%s878_s1 + $0x20] sm:$0xff]  ;;  %v51_v28 = vld [vmem:[%s878_s1 + $0x28] sm:$0xff]  ;;  %v68_v35 = vld [vmem:[%s878_s1 + $0xb0] sm:$0xff] }
   0x8   :  { %v98_v29 = vld [vmem:[%s878_s1 + $0x1a0] sm:$0xff]  ;;  %498 = vmatprep.subr.bf16.mxu1 %v497_v21  ;;  %v99_v30 = vld [vmem:[%s878_s1 + $0x1a8] sm:$0xff]  ;;  %v471_v33 = vpack.c.bf16 %v51_v28, %v50_v27  ;;  %v69_v36 = vld [vmem:[%s878_s1 + $0xb8] sm:$0xff] }
   0x9   :  { %v82_v31 = vld [vmem:[%s878_s1 + $0x120] sm:$0xff]  ;;  %v83_v32 = vld [vmem:[%s878_s1 + $0x128] sm:$0xff]  ;;  %468 = vmatpush3.bf16.msra.mxu0 %v467_v17  ;;  %v501_v34 = vpack.c.bf16 %v99_v30, %v98_v29  ;;  %v52_v37 = vld [vmem:[%s878_s1 + $0x30] sm:$0xff]  ;;  %v473_v39 = vpack.c.bf16 %v69_v36, %v68_v35 }
   0xa   :  { %470 = vmatprep.subr.bf16.mxu0 %v469_v26  ;;  %v503_v38 = vpack.c.bf16 %v83_v32, %v82_v31  ;;  %v53_v40 = vld [vmem:[%s878_s1 + $0x38] sm:$0xff]  ;;  %v100_v41 = vld [vmem:[%s878_s1 + $0x1b0] sm:$0xff]  ;;  %v70_v46 = vld [vmem:[%s878_s1 + $0xc0] sm:$0xff] }
   0xb   :  { %500 = vmatpush3.bf16.msra.mxu1 %v499_v25  ;;  %v101_v42 = vld [vmem:[%s878_s1 + $0x1b8] sm:$0xff]  ;;  %v84_v44 = vld [vmem:[%s878_s1 + $0x130] sm:$0xff]  ;;  %v71_v47 = vld [vmem:[%s878_s1 + $0xc8] sm:$0xff]  ;;  %v475_v48 = vpack.c.bf16 %v53_v40, %v52_v37 }
   0xc   :  { %502 = vmatprep.subr.bf16.mxu1 %v501_v34  ;;  %v505_v43 = vpack.c.bf16 %v101_v42, %v100_v41  ;;  %v85_v45 = vld [vmem:[%s878_s1 + $0x138] sm:$0xff]  ;;  %v102_v49 = vld [vmem:[%s878_s1 + $0x1c0] sm:$0xff]  ;;  %v103_v50 = vld [vmem:[%s878_s1 + $0x1c8] sm:$0xff]  ;;  %v477_v52 = vpack.c.bf16 %v71_v47, %v70_v46 }
   0xd   :  { %472 = vmatpush3.bf16.msra.mxu0 %v471_v33  ;;  %v507_v51 = vpack.c.bf16 %v85_v45, %v84_v44  ;;  %v54_v53 = vld [vmem:[%s878_s1 + $0x40] sm:$0xff]  ;;  %v55_v54 = vld [vmem:[%s878_s1 + $0x48] sm:$0xff]  ;;  %v509_v56 = vpack.c.bf16 %v103_v50, %v102_v49  ;;  %v72_v58 = vld [vmem:[%s878_s1 + $0xd0] sm:$0xff] }
   0xe   :  { %474 = vmatprep.subr.bf16.mxu0 %v473_v39  ;;  %v86_v55 = vld [vmem:[%s878_s1 + $0x140] sm:$0xff]  ;;  %v87_v57 = vld [vmem:[%s878_s1 + $0x148] sm:$0xff]  ;;  %v73_v59 = vld [vmem:[%s878_s1 + $0xd8] sm:$0xff]  ;;  %v479_v62 = vpack.c.bf16 %v55_v54, %v54_v53 }
   0xf   :  { %504 = vmatpush3.bf16.msra.mxu1 %v503_v38  ;;  %v104_v60 = vld [vmem:[%s878_s1 + $0x1d0] sm:$0xff]  ;;  %v105_v61 = vld [vmem:[%s878_s1 + $0x1d8] sm:$0xff]  ;;  %v511_v63 = vpack.c.bf16 %v87_v57, %v86_v55  ;;  %v481_v0 = vpack.c.bf16 %v73_v59, %v72_v58  ;;  %v74_v6 = vld [vmem:[%s878_s1 + $0xe0] sm:$0xff] }
  0x10   :  { %506 = vmatprep.subr.bf16.mxu1 %v505_v43  ;;  %v56_v1 = vld [vmem:[%s878_s1 + $0x50] sm:$0xff]  ;;  %v57_v2 = vld [vmem:[%s878_s1 + $0x58] sm:$0xff]  ;;  %v513_v4 = vpack.c.bf16 %v105_v61, %v104_v60  ;;  %v75_v7 = vld [vmem:[%s878_s1 + $0xe8] sm:$0xff] }
  0x11   :  { %476 = vmatpush3.bf16.msra.mxu0 %v475_v48  ;;  %v88_v3 = vld [vmem:[%s878_s1 + $0x150] sm:$0xff]  ;;  %v89_v5 = vld [vmem:[%s878_s1 + $0x158] sm:$0xff]  ;;  %v106_v8 = vld [vmem:[%s878_s1 + $0x1e0] sm:$0xff]  ;;  %v483_v10 = vpack.c.bf16 %v57_v2, %v56_v1  ;;  %v485_v14 = vpack.c.bf16 %v75_v7, %v74_v6 }
  0x12   :  { %478 = vmatprep.subr.bf16.mxu0 %v477_v52  ;;  %v107_v9 = vld [vmem:[%s878_s1 + $0x1e8] sm:$0xff]  ;;  %v58_v11 = vld [vmem:[%s878_s1 + $0x60] sm:$0xff]  ;;  %v515_v13 = vpack.c.bf16 %v89_v5, %v88_v3  ;;  %v76_v19 = vld [vmem:[%s878_s1 + $0xf0] sm:$0xff] }
  0x13   :  { %508 = vmatpush3.bf16.msra.mxu1 %v507_v51  ;;  %v59_v12 = vld [vmem:[%s878_s1 + $0x68] sm:$0xff]  ;;  %v90_v15 = vld [vmem:[%s878_s1 + $0x160] sm:$0xff]  ;;  %v517_v18 = vpack.c.bf16 %v107_v9, %v106_v8  ;;  %v77_v20 = vld [vmem:[%s878_s1 + $0xf8] sm:$0xff] }
  0x14   :  { %510 = vmatprep.subr.bf16.mxu1 %v509_v56  ;;  %v91_v16 = vld [vmem:[%s878_s1 + $0x168] sm:$0xff]  ;;  %v17_v21 = vld [vmem:[%s879_s0 + $0x18] sm:$0xff]  ;;  %v108_v22 = vld [vmem:[%s878_s1 + $0x1f0] sm:$0xff]  ;;  %v487_v24 = vpack.c.bf16 %v59_v12, %v58_v11  ;;  %v489_v26 = vpack.c.bf16 %v77_v20, %v76_v19 }
  0x15   :  { %480 = vmatpush3.bf16.msra.mxu0 %v479_v62  ;;  %v15_v17 = vld [vmem:[%s879_s0 + $0x8] sm:$0xff]  ;;  %v109_v23 = vld [vmem:[%s878_s1 + $0x1f8] sm:$0xff]  ;;  %286 = vmatprep.mubr.f32.mxu1 %v17_v21  ;;  %v519_v25 = vpack.c.bf16 %v91_v16, %v90_v15  ;;  %v60_v27 = vld [vmem:[%s878_s1 + $0x70] sm:$0xff] }
  0x16   :  { %482 = vmatprep.subr.bf16.mxu0 %v481_v0  ;;  %181 = vmatprep.mubr.f32.mxu0 %v15_v17  ;;  %v61_v28 = vld [vmem:[%s878_s1 + $0x78] sm:$0xff]  ;;  %v521_v29 = vpack.c.bf16 %v109_v23, %v108_v22  ;;  %v92_v30 = vld [vmem:[%s878_s1 + $0x170] sm:$0xff]  ;;  %v14_v34 = vld [vmem:[%s879_s0] sm:$0xff] }
  0x17   :  { %512 = vmatpush3.bf16.msra.mxu1 %v511_v63  ;;  %v93_v31 = vld [vmem:[%s878_s1 + $0x178] sm:$0xff]  ;;  %v491_v32 = vpack.c.bf16 %v61_v28, %v60_v27  ;;  %v16_v35 = vld [vmem:[%s879_s0 + $0x10] sm:$0xff]  ;;  %v19_v36 = vld [vmem:[%s879_s0 + $0x28] sm:$0xff] }
  0x18   :  { %514 = vmatprep.subr.bf16.mxu1 %v513_v4  ;;  %v523_v33 = vpack.c.bf16 %v93_v31, %v92_v30  ;;  %v21_v37 = vld [vmem:[%s879_s0 + $0x38] sm:$0xff]  ;;  %v18_v38 = vld [vmem:[%s879_s0 + $0x20] sm:$0xff]  ;;  %v20_v39 = vld [vmem:[%s879_s0 + $0x30] sm:$0xff] }
  0x19   :  { %484 = vmatpush3.bf16.msra.mxu0 %v483_v10  ;;  %v23_v40 = vld [vmem:[%s879_s0 + $0x48] sm:$0xff]  ;;  %v25_v41 = vld [vmem:[%s879_s0 + $0x58] sm:$0xff]  ;;  %v22_v42 = vld [vmem:[%s879_s0 + $0x40] sm:$0xff] }
  0x1a   :  { %486 = vmatprep.subr.bf16.mxu0 %v485_v14  ;;  %v24_v43 = vld [vmem:[%s879_s0 + $0x50] sm:$0xff]  ;;  %v27_v44 = vld [vmem:[%s879_s0 + $0x68] sm:$0xff]  ;;  %v29_v45 = vld [vmem:[%s879_s0 + $0x78] sm:$0xff] }
  0x1b   :  { %516 = vmatpush3.bf16.msra.mxu1 %v515_v13  ;;  %v26_v46 = vld [vmem:[%s879_s0 + $0x60] sm:$0xff]  ;;  %v28_v47 = vld [vmem:[%s879_s0 + $0x70] sm:$0xff]  ;;  %v31_v48 = vld [vmem:[%s879_s0 + $0x88] sm:$0xff] }
  0x1c   :  { %518 = vmatprep.subr.bf16.mxu1 %v517_v18  ;;  %v33_v49 = vld [vmem:[%s879_s0 + $0x98] sm:$0xff]  ;;  %v30_v50 = vld [vmem:[%s879_s0 + $0x80] sm:$0xff]  ;;  %v32_v51 = vld [vmem:[%s879_s0 + $0x90] sm:$0xff] }
  0x1d   :  { %488 = vmatpush3.bf16.msra.mxu0 %v487_v24  ;;  %v35_v52 = vld [vmem:[%s879_s0 + $0xa8] sm:$0xff]  ;;  %v37_v53 = vld [vmem:[%s879_s0 + $0xb8] sm:$0xff]  ;;  %v34_v54 = vld [vmem:[%s879_s0 + $0xa0] sm:$0xff] }
  0x1e   :  { %490 = vmatprep.subr.bf16.mxu0 %v489_v26  ;;  %v36_v55 = vld [vmem:[%s879_s0 + $0xb0] sm:$0xff]  ;;  %v39_v56 = vld [vmem:[%s879_s0 + $0xc8] sm:$0xff]  ;;  %v41_v57 = vld [vmem:[%s879_s0 + $0xd8] sm:$0xff] }
  0x1f   :  { %520 = vmatpush3.bf16.msra.mxu1 %v519_v25  ;;  %v38_v58 = vld [vmem:[%s879_s0 + $0xc0] sm:$0xff]  ;;  %v40_v59 = vld [vmem:[%s879_s0 + $0xd0] sm:$0xff]  ;;  %v43_v60 = vld [vmem:[%s879_s0 + $0xe8] sm:$0xff] }
  0x20   :  { %522 = vmatprep.subr.bf16.mxu1 %v521_v29  ;;  %v45_v61 = vld [vmem:[%s879_s0 + $0xf8] sm:$0xff]  ;;  %v42_v62 = vld [vmem:[%s879_s0 + $0xe0] sm:$0xff]  ;;  %v44_v63 = vld [vmem:[%s879_s0 + $0xf0] sm:$0xff] }
  0x21   :  { %492 = vmatpush3.bf16.msra.mxu0 %v491_v32  ;;  %v836_v1 = vld [vmem:[%s880_s2] ss:$0 sm:$0xff] }
  0x23   :  { %524 = vmatpush3.bf16.msra.mxu1 %v523_v33 }
  0x24   :  { %182 = vmatmul.mubr.f32.vlgmr.msra.gmra.mrb[0].mxu0 %v14_v34 }
  0x25   :  { %186 = vmatprep.mubr.f32.mxu0 %v19_v36 }
  0x26   :  { %287 = vmatmul.mubr.f32.vlgmr.msra.gmra.mrb[0].mxu1 %v16_v35 }
  0x27   :  { %291 = vmatprep.mubr.f32.mxu1 %v21_v37 }
  0x28   :  { %187 = vmatmul.mubr.f32.gmra.mrb[2].mxu0 %v18_v38 }
  0x29   :  { %191 = vmatprep.mubr.f32.mxu0 %v23_v40 }
  0x2a   :  { %292 = vmatmul.mubr.f32.gmra.mrb[2].mxu1 %v20_v39 }
  0x2b   :  { %296 = vmatprep.mubr.f32.mxu1 %v25_v41 }
  0x2c   :  { %192 = vmatmul.mubr.f32.gmra.mrb[4].mxu0 %v22_v42 }
  0x2d   :  { %196 = vmatprep.mubr.f32.mxu0 %v27_v44 }
  0x2e   :  { %297 = vmatmul.mubr.f32.gmra.mrb[4].mxu1 %v24_v43 }
  0x2f   :  { %301 = vmatprep.mubr.f32.mxu1 %v29_v45 }
  0x30   :  { %197 = vmatmul.mubr.f32.gmra.mrb[6].mxu0 %v26_v46 }
  0x31   :  { %201 = vmatprep.mubr.f32.mxu0 %v31_v48 }
  0x32   :  { %302 = vmatmul.mubr.f32.gmra.mrb[6].mxu1 %v28_v47 }
  0x33   :  { %306 = vmatprep.mubr.f32.mxu1 %v33_v49 }
  0x34   :  { %202 = vmatmul.mubr.f32.gmra.mrb[8].mxu0 %v30_v50 }
  0x35   :  { %206 = vmatprep.mubr.f32.mxu0 %v35_v52 }
  0x36   :  { %307 = vmatmul.mubr.f32.gmra.mrb[8].mxu1 %v32_v51 }
  0x37   :  { %311 = vmatprep.mubr.f32.mxu1 %v37_v53 }
  0x38   :  { %207 = vmatmul.mubr.f32.gmra.mrb[10].mxu0 %v34_v54 }
  0x39   :  { %211 = vmatprep.mubr.f32.mxu0 %v39_v56 }
  0x3a   :  { %312 = vmatmul.mubr.f32.gmra.mrb[10].mxu1 %v36_v55 }
  0x3b   :  { %316 = vmatprep.mubr.f32.mxu1 %v41_v57 }
  0x3c   :  { %212 = vmatmul.mubr.f32.gmra.mrb[12].mxu0 %v38_v58 }
  0x3d   :  { %216 = vmatprep.mubr.f32.mxu0 %v43_v60 }
  0x3e   :  { %317 = vmatmul.mubr.f32.gmra.mrb[12].mxu1 %v40_v59 }
  0x3f   :  { %321 = vmatprep.mubr.f32.mxu1 %v45_v61 }
  0x40   :  { %217 = vmatmul.mubr.f32.gmra.mrb[14].mxu0 %v42_v62 }
  0x42   :  { %322 = vmatmul.mubr.f32.gmra.mrb[14].mxu1 %v44_v63 }
  0xf7   :  { %v381_v0 = vpop.f32.mrb[0].mxu0 }
  0xf8   :  { %v382_v2 = vpop.f32.mrb[1].mxu0 }
  0xf9   :  { %v437_v3 = vpop.f32.mrb[0].mxu1  ;;  %v383_v4 = vadd.f32 %v382_v2, %v381_v0 }
  0xfa   :  { %v438_v5 = vpop.f32.mrb[1].mxu1 }
  0xfb   :  { %v439_v6 = vadd.f32 %v438_v5, %v437_v3  ;;  %v184_v7 = vadd.f32 %v383_v4, %v836_v1  ;;  %v384_v8 = vpop.f32.mrb[2].mxu0 }
  0xfc   :  { %v385_v9 = vpop.f32.mrb[3].mxu0 }
  0xfd   :  { %v440_v10 = vpop.f32.mrb[2].mxu1  ;;  %v289_v11 = vadd.f32 %v439_v6, %v184_v7  ;;  %v386_v12 = vadd.f32 %v385_v9, %v384_v8 }
  0xfe   :  { %v441_v13 = vpop.f32.mrb[3].mxu1 }
  0xff   :  { %v442_v14 = vadd.f32 %v441_v13, %v440_v10  ;;  %v327_v15 = vmax.f32 %v289_v11, 0.0  ;;  %v189_v16 = vadd.f32 %v386_v12, %v836_v1  ;;  %v387_v17 = vpop.f32.mrb[4].mxu0 }
 0x100   :  { %v388_v18 = vpop.f32.mrb[5].mxu0 }
 0x101   :  { %v443_v19 = vpop.f32.mrb[4].mxu1  ;;  %336 = vst.msk [vmem:[%s881_s3] sm:$0xff] %vm335_vm0, %v327_v15  ;;  %v294_v20 = vadd.f32 %v442_v14, %v189_v16  ;;  %v389_v21 = vadd.f32 %v388_v18, %v387_v17 }
 0x102   :  { %v444_v22 = vpop.f32.mrb[5].mxu1 }
 0x103   :  { %v445_v23 = vadd.f32 %v444_v22, %v443_v19  ;;  %v328_v24 = vmax.f32 %v294_v20, 0.0  ;;  %v194_v25 = vadd.f32 %v389_v21, %v836_v1  ;;  %v390_v26 = vpop.f32.mrb[6].mxu0 }
 0x104   :  { %v391_v27 = vpop.f32.mrb[7].mxu0 }
 0x105   :  { %v446_v28 = vpop.f32.mrb[6].mxu1  ;;  %337 = vst.msk [vmem:[%s881_s3 + $0x8] sm:$0xff] %vm335_vm0, %v328_v24  ;;  %v299_v29 = vadd.f32 %v445_v23, %v194_v25  ;;  %v392_v30 = vadd.f32 %v391_v27, %v390_v26 }
 0x106   :  { %v447_v31 = vpop.f32.mrb[7].mxu1 }
 0x107   :  { %v448_v32 = vadd.f32 %v447_v31, %v446_v28  ;;  %v329_v33 = vmax.f32 %v299_v29, 0.0  ;;  %v199_v34 = vadd.f32 %v392_v30, %v836_v1  ;;  %v393_v35 = vpop.f32.mrb[8].mxu0 }
 0x108   :  { %v394_v36 = vpop.f32.mrb[9].mxu0 }
 0x109   :  { %v449_v37 = vpop.f32.mrb[8].mxu1  ;;  %338 = vst.msk [vmem:[%s881_s3 + $0x10] sm:$0xff] %vm335_vm0, %v329_v33  ;;  %v304_v38 = vadd.f32 %v448_v32, %v199_v34  ;;  %v395_v39 = vadd.f32 %v394_v36, %v393_v35 }
 0x10a   :  { %v450_v40 = vpop.f32.mrb[9].mxu1 }
 0x10b   :  { %v451_v41 = vadd.f32 %v450_v40, %v449_v37  ;;  %v330_v42 = vmax.f32 %v304_v38, 0.0  ;;  %v204_v43 = vadd.f32 %v395_v39, %v836_v1  ;;  %v396_v44 = vpop.f32.mrb[10].mxu0 }
 0x10c   :  { %v397_v45 = vpop.f32.mrb[11].mxu0 }
 0x10d   :  { %v452_v46 = vpop.f32.mrb[10].mxu1  ;;  %339 = vst.msk [vmem:[%s881_s3 + $0x18] sm:$0xff] %vm335_vm0, %v330_v42  ;;  %v309_v47 = vadd.f32 %v451_v41, %v204_v43  ;;  %v398_v48 = vadd.f32 %v397_v45, %v396_v44 }
 0x10e   :  { %v453_v49 = vpop.f32.mrb[11].mxu1 }
 0x10f   :  { %v454_v50 = vadd.f32 %v453_v49, %v452_v46  ;;  %v331_v51 = vmax.f32 %v309_v47, 0.0  ;;  %v209_v52 = vadd.f32 %v398_v48, %v836_v1  ;;  %v399_v53 = vpop.f32.mrb[12].mxu0 }
 0x110   :  { %v400_v54 = vpop.f32.mrb[13].mxu0 }
 0x111   :  { %v455_v55 = vpop.f32.mrb[12].mxu1  ;;  %340 = vst.msk [vmem:[%s881_s3 + $0x20] sm:$0xff] %vm335_vm0, %v331_v51  ;;  %v314_v56 = vadd.f32 %v454_v50, %v209_v52  ;;  %v401_v57 = vadd.f32 %v400_v54, %v399_v53 }
 0x112   :  { %v456_v58 = vpop.f32.mrb[13].mxu1 }
 0x113   :  { %v457_v59 = vadd.f32 %v456_v58, %v455_v55  ;;  %v332_v60 = vmax.f32 %v314_v56, 0.0  ;;  %v214_v61 = vadd.f32 %v401_v57, %v836_v1  ;;  %v402_v62 = vpop.f32.mrb[14].mxu0 }
 0x114   :  { %v403_v63 = vpop.f32.mrb[15].mxu0 }
 0x115   :  { %v458_v0 = vpop.f32.mrb[14].mxu1  ;;  %341 = vst.msk [vmem:[%s881_s3 + $0x28] sm:$0xff] %vm335_vm0, %v332_v60  ;;  %v319_v2 = vadd.f32 %v457_v59, %v214_v61  ;;  %v404_v3 = vadd.f32 %v403_v63, %v402_v62 }
 0x116   :  { %v459_v4 = vpop.f32.mrb[15].mxu1 }
 0x117   :  { %v460_v5 = vadd.f32 %v459_v4, %v458_v0  ;;  %v333_v6 = vmax.f32 %v319_v2, 0.0  ;;  %v219_v7 = vadd.f32 %v404_v3, %v836_v1 }
 0x119   :  { %342 = vst.msk [vmem:[%s881_s3 + $0x30] sm:$0xff] %vm335_vm0, %v333_v6  ;;  %v324_v8 = vadd.f32 %v460_v5, %v219_v7 }
 0x11b   :  { %v334_v9 = vmax.f32 %v324_v8, 0.0 }
 0x11d   :  { %343 = vst.msk [vmem:[%s881_s3 + $0x38] sm:$0xff] %vm335_vm0, %v334_v9 }

// kernel: _lambda_.6
= control target key start
LH: loop header
LB: loop body
LE: loop exit
PB: predicated region body
PF: predicated region fallthrough
CT: control target
= control target key end

     0   :  { %vm103_vm0 = vcmask 523264   ;;  %s810_s1 = inlined_call_operand.vmem [shape: f32[576,64], index: 1, kind: input, shape index: {}]   ;;  %s811_s0 = inlined_call_operand.vmem [shape: f32[16,576], index: 0, kind: input, shape index: {}]   ;;  %s812_s2 = inlined_call_operand.vmem [shape: f32[1,64], index: 2, kind: input, shape index: {}]   ;;  %s813_s3 = inlined_call_operand.vmem [shape: f32[16,64], index: 3, kind: output, shape index: {}]  }
   0x1   :  { %v40_v0 = vld [vmem:[%s810_s1 + $0x80] sm:$0xff]  ;;  %v41_v1 = vld [vmem:[%s810_s1 + $0x88] sm:$0xff]  ;;  %v42_v11 = vld [vmem:[%s810_s1 + $0x90] sm:$0xff] }
   0x2   :  { %v24_v2 = vld [vmem:[%s810_s1] sm:$0xff]  ;;  %v451_v3 = vpack.c.bf16 %v41_v1, %v40_v0  ;;  %v25_v4 = vld [vmem:[%s810_s1 + $0x8] sm:$0xff]  ;;  %v43_v13 = vld [vmem:[%s810_s1 + $0x98] sm:$0xff] }
   0x3   :  { %v72_v5 = vld [vmem:[%s810_s1 + $0x180] sm:$0xff]  ;;  %v73_v6 = vld [vmem:[%s810_s1 + $0x188] sm:$0xff]  ;;  %v453_v7 = vpack.c.bf16 %v25_v4, %v24_v2  ;;  %v26_v14 = vld [vmem:[%s810_s1 + $0x10] sm:$0xff]  ;;  %v455_v16 = vpack.c.bf16 %v43_v13, %v42_v11 }
   0x4   :  { %v483_v8 = vpack.c.bf16 %v73_v6, %v72_v5  ;;  %v56_v9 = vld [vmem:[%s810_s1 + $0x100] sm:$0xff]  ;;  %v57_v10 = vld [vmem:[%s810_s1 + $0x108] sm:$0xff]  ;;  %452 = vmatprep.subr.bf16.mxu0 %v451_v3  ;;  %v27_v15 = vld [vmem:[%s810_s1 + $0x18] sm:$0xff] }
   0x5   :  { %v485_v12 = vpack.c.bf16 %v57_v10, %v56_v9  ;;  %454 = vmatpush3.bf16.msra.mxu0 %v453_v7  ;;  %v457_v17 = vpack.c.bf16 %v27_v15, %v26_v14  ;;  %v74_v18 = vld [vmem:[%s810_s1 + $0x190] sm:$0xff]  ;;  %v75_v19 = vld [vmem:[%s810_s1 + $0x198] sm:$0xff]  ;;  %v44_v23 = vld [vmem:[%s810_s1 + $0xa0] sm:$0xff] }
   0x6   :  { %484 = vmatprep.subr.bf16.mxu1 %v483_v8  ;;  %v58_v20 = vld [vmem:[%s810_s1 + $0x110] sm:$0xff]  ;;  %v487_v21 = vpack.c.bf16 %v75_v19, %v74_v18  ;;  %v59_v22 = vld [vmem:[%s810_s1 + $0x118] sm:$0xff]  ;;  %v45_v24 = vld [vmem:[%s810_s1 + $0xa8] sm:$0xff]  ;;  %456 = vmatprep.subr.bf16.mxu0 %v455_v16 }
   0x7   :  { %486 = vmatpush3.bf16.msra.mxu1 %v485_v12  ;;  %v489_v25 = vpack.c.bf16 %v59_v22, %v58_v20  ;;  %v459_v26 = vpack.c.bf16 %v45_v24, %v44_v23  ;;  %v28_v27 = vld [vmem:[%s810_s1 + $0x20] sm:$0xff]  ;;  %v29_v28 = vld [vmem:[%s810_s1 + $0x28] sm:$0xff]  ;;  %v46_v35 = vld [vmem:[%s810_s1 + $0xb0] sm:$0xff] }
   0x8   :  { %v76_v29 = vld [vmem:[%s810_s1 + $0x1a0] sm:$0xff]  ;;  %488 = vmatprep.subr.bf16.mxu1 %v487_v21  ;;  %v77_v30 = vld [vmem:[%s810_s1 + $0x1a8] sm:$0xff]  ;;  %v461_v33 = vpack.c.bf16 %v29_v28, %v28_v27  ;;  %v47_v36 = vld [vmem:[%s810_s1 + $0xb8] sm:$0xff] }
   0x9   :  { %v60_v31 = vld [vmem:[%s810_s1 + $0x120] sm:$0xff]  ;;  %v61_v32 = vld [vmem:[%s810_s1 + $0x128] sm:$0xff]  ;;  %458 = vmatpush3.bf16.msra.mxu0 %v457_v17  ;;  %v491_v34 = vpack.c.bf16 %v77_v30, %v76_v29  ;;  %v30_v37 = vld [vmem:[%s810_s1 + $0x30] sm:$0xff]  ;;  %v463_v39 = vpack.c.bf16 %v47_v36, %v46_v35 }
   0xa   :  { %460 = vmatprep.subr.bf16.mxu0 %v459_v26  ;;  %v493_v38 = vpack.c.bf16 %v61_v32, %v60_v31  ;;  %v31_v40 = vld [vmem:[%s810_s1 + $0x38] sm:$0xff]  ;;  %v78_v41 = vld [vmem:[%s810_s1 + $0x1b0] sm:$0xff]  ;;  %v48_v46 = vld [vmem:[%s810_s1 + $0xc0] sm:$0xff] }
   0xb   :  { %490 = vmatpush3.bf16.msra.mxu1 %v489_v25  ;;  %v79_v42 = vld [vmem:[%s810_s1 + $0x1b8] sm:$0xff]  ;;  %v62_v44 = vld [vmem:[%s810_s1 + $0x130] sm:$0xff]  ;;  %v49_v47 = vld [vmem:[%s810_s1 + $0xc8] sm:$0xff]  ;;  %v465_v48 = vpack.c.bf16 %v31_v40, %v30_v37 }
   0xc   :  { %492 = vmatprep.subr.bf16.mxu1 %v491_v34  ;;  %v495_v43 = vpack.c.bf16 %v79_v42, %v78_v41  ;;  %v63_v45 = vld [vmem:[%s810_s1 + $0x138] sm:$0xff]  ;;  %v80_v49 = vld [vmem:[%s810_s1 + $0x1c0] sm:$0xff]  ;;  %v81_v50 = vld [vmem:[%s810_s1 + $0x1c8] sm:$0xff]  ;;  %v467_v52 = vpack.c.bf16 %v49_v47, %v48_v46 }
   0xd   :  { %462 = vmatpush3.bf16.msra.mxu0 %v461_v33  ;;  %v497_v51 = vpack.c.bf16 %v63_v45, %v62_v44  ;;  %v32_v53 = vld [vmem:[%s810_s1 + $0x40] sm:$0xff]  ;;  %v33_v54 = vld [vmem:[%s810_s1 + $0x48] sm:$0xff]  ;;  %v499_v56 = vpack.c.bf16 %v81_v50, %v80_v49  ;;  %v50_v58 = vld [vmem:[%s810_s1 + $0xd0] sm:$0xff] }
   0xe   :  { %464 = vmatprep.subr.bf16.mxu0 %v463_v39  ;;  %v64_v55 = vld [vmem:[%s810_s1 + $0x140] sm:$0xff]  ;;  %v65_v57 = vld [vmem:[%s810_s1 + $0x148] sm:$0xff]  ;;  %v51_v59 = vld [vmem:[%s810_s1 + $0xd8] sm:$0xff]  ;;  %v469_v62 = vpack.c.bf16 %v33_v54, %v32_v53 }
   0xf   :  { %494 = vmatpush3.bf16.msra.mxu1 %v493_v38  ;;  %v82_v60 = vld [vmem:[%s810_s1 + $0x1d0] sm:$0xff]  ;;  %v83_v61 = vld [vmem:[%s810_s1 + $0x1d8] sm:$0xff]  ;;  %v501_v63 = vpack.c.bf16 %v65_v57, %v64_v55  ;;  %v471_v0 = vpack.c.bf16 %v51_v59, %v50_v58  ;;  %v52_v6 = vld [vmem:[%s810_s1 + $0xe0] sm:$0xff] }
  0x10   :  { %496 = vmatprep.subr.bf16.mxu1 %v495_v43  ;;  %v34_v1 = vld [vmem:[%s810_s1 + $0x50] sm:$0xff]  ;;  %v35_v2 = vld [vmem:[%s810_s1 + $0x58] sm:$0xff]  ;;  %v503_v4 = vpack.c.bf16 %v83_v61, %v82_v60  ;;  %v53_v7 = vld [vmem:[%s810_s1 + $0xe8] sm:$0xff] }
  0x11   :  { %466 = vmatpush3.bf16.msra.mxu0 %v465_v48  ;;  %v66_v3 = vld [vmem:[%s810_s1 + $0x150] sm:$0xff]  ;;  %v67_v5 = vld [vmem:[%s810_s1 + $0x158] sm:$0xff]  ;;  %v84_v8 = vld [vmem:[%s810_s1 + $0x1e0] sm:$0xff]  ;;  %v473_v10 = vpack.c.bf16 %v35_v2, %v34_v1  ;;  %v475_v14 = vpack.c.bf16 %v53_v7, %v52_v6 }
  0x12   :  { %468 = vmatprep.subr.bf16.mxu0 %v467_v52  ;;  %v85_v9 = vld [vmem:[%s810_s1 + $0x1e8] sm:$0xff]  ;;  %v36_v11 = vld [vmem:[%s810_s1 + $0x60] sm:$0xff]  ;;  %v505_v13 = vpack.c.bf16 %v67_v5, %v66_v3  ;;  %v54_v19 = vld [vmem:[%s810_s1 + $0xf0] sm:$0xff] }
  0x13   :  { %498 = vmatpush3.bf16.msra.mxu1 %v497_v51  ;;  %v15_v12 = vld [vmem:[%s811_s0 + $0x8] sm:$0xff]  ;;  %v68_v16 = vld [vmem:[%s810_s1 + $0x160] sm:$0xff]  ;;  %v507_v18 = vpack.c.bf16 %v85_v9, %v84_v8  ;;  %v55_v20 = vld [vmem:[%s810_s1 + $0xf8] sm:$0xff] }
  0x14   :  { %500 = vmatprep.subr.bf16.mxu1 %v499_v56  ;;  %v37_v15 = vld [vmem:[%s810_s1 + $0x68] sm:$0xff]  ;;  %174 = vmatprep.mubr.f32.mxu0 %v15_v12  ;;  %v17_v21 = vld [vmem:[%s811_s0 + $0x18] sm:$0xff]  ;;  %v86_v22 = vld [vmem:[%s810_s1 + $0x1f0] sm:$0xff]  ;;  %v479_v26 = vpack.c.bf16 %v55_v20, %v54_v19 }
  0x15   :  { %470 = vmatpush3.bf16.msra.mxu0 %v469_v62  ;;  %v69_v17 = vld [vmem:[%s810_s1 + $0x168] sm:$0xff]  ;;  %v87_v23 = vld [vmem:[%s810_s1 + $0x1f8] sm:$0xff]  ;;  %249 = vmatprep.mubr.f32.mxu1 %v17_v21  ;;  %v477_v24 = vpack.c.bf16 %v37_v15, %v36_v11  ;;  %v38_v27 = vld [vmem:[%s810_s1 + $0x70] sm:$0xff] }
  0x16   :  { %472 = vmatprep.subr.bf16.mxu0 %v471_v0  ;;  %v509_v25 = vpack.c.bf16 %v69_v17, %v68_v16  ;;  %v39_v28 = vld [vmem:[%s810_s1 + $0x78] sm:$0xff]  ;;  %v70_v29 = vld [vmem:[%s810_s1 + $0x170] sm:$0xff]  ;;  %v511_v30 = vpack.c.bf16 %v87_v23, %v86_v22  ;;  %v88_v32 = vld [vmem:[%s810_s1 + $0x200] sm:$0xff] }
  0x17   :  { %502 = vmatpush3.bf16.msra.mxu1 %v501_v63  ;;  %v71_v31 = vld [vmem:[%s810_s1 + $0x178] sm:$0xff]  ;;  %v89_v33 = vld [vmem:[%s810_s1 + $0x208] sm:$0xff]  ;;  %v481_v34 = vpack.c.bf16 %v39_v28, %v38_v27  ;;  %v90_v37 = vld [vmem:[%s810_s1 + $0x210] sm:$0xff] }
  0x18   :  { %504 = vmatprep.subr.bf16.mxu1 %v503_v4  ;;  %v513_v35 = vpack.c.bf16 %v71_v31, %v70_v29  ;;  %v515_v36 = vpack.c.bf16 %v89_v33, %v88_v32  ;;  %v91_v38 = vld [vmem:[%s810_s1 + $0x218] sm:$0xff]  ;;  %v14_v39 = vld [vmem:[%s811_s0] sm:$0xff]  ;;  %v16_v40 = vld [vmem:[%s811_s0 + $0x10] sm:$0xff] }
  0x19   :  { %474 = vmatpush3.bf16.msra.mxu0 %v473_v10  ;;  %v519_v41 = vpack.c.bf16 %v91_v38, %v90_v37  ;;  %v20_v42 = vld [vmem:[%s811_s0 + $0x30] sm:$0xff]  ;;  %v92_v43 = vld [vmem:[%s810_s1 + $0x220] sm:$0xff]  ;;  %v93_v44 = vld [vmem:[%s810_s1 + $0x228] sm:$0xff] }
  0x1a   :  { %476 = vmatprep.subr.bf16.mxu0 %v475_v14  ;;  %v22_v45 = vld [vmem:[%s811_s0 + $0x40] sm:$0xff]  ;;  %v19_v46 = vld [vmem:[%s811_s0 + $0x28] sm:$0xff]  ;;  %v523_v47 = vpack.c.bf16 %v93_v44, %v92_v43  ;;  %v21_v48 = vld [vmem:[%s811_s0 + $0x38] sm:$0xff] }
  0x1b   :  { %506 = vmatpush3.bf16.msra.mxu1 %v505_v13  ;;  %v94_v49 = vld [vmem:[%s810_s1 + $0x230] sm:$0xff]  ;;  %v95_v50 = vld [vmem:[%s810_s1 + $0x238] sm:$0xff]  ;;  %v18_v51 = vld [vmem:[%s811_s0 + $0x20] sm:$0xff] }
  0x1c   :  { %508 = vmatprep.subr.bf16.mxu1 %v507_v18  ;;  %v527_v52 = vpack.c.bf16 %v95_v50, %v94_v49  ;;  %v23_v53 = vld [vmem:[%s811_s0 + $0x48] sm:$0xff]  ;;  %v343_v55 = vld [vmem:[%s812_s2] ss:$0 sm:$0xff] }
  0x1d   :  { %478 = vmatpush3.bf16.msra.mxu0 %v477_v24 }
  0x1e   :  { %480 = vmatprep.subr.bf16.mxu0 %v479_v26 }
  0x1f   :  { %510 = vmatpush3.bf16.msra.mxu1 %v509_v25 }
  0x20   :  { %512 = vmatprep.subr.bf16.mxu1 %v511_v30 }
  0x21   :  { %482 = vmatpush3.bf16.msra.mxu0 %v481_v34 }
  0x22   :  { %516 = vmatprep.subr.bf16.mxu0 %v515_v36 }
  0x23   :  { %514 = vmatpush3.bf16.msra.mxu1 %v513_v35 }
  0x24   :  { %175 = vmatmul.mubr.f32.vlgmr.msra.gmra.mrb[0].mxu0 %v14_v39 }
  0x25   :  { %518 = vmatpush3.bf16.msra.mxu0 %v515_v36  ;;  %179 = vmatprep.mubr.f32.mxu0 %v20_v42 }
  0x26   :  { %250 = vmatmul.mubr.f32.vlgmr.msra.gmra.mrb[0].mxu1 %v16_v40  ;;  %520 = vmatprep.subr.bf16.mxu0 %v519_v41 }
  0x27   :  { %254 = vmatprep.mubr.f32.mxu1 %v22_v45 }
  0x28   :  { %180 = vmatmul.mubr.f32.gmra.mrb[2].mxu0 %v19_v46 }
  0x29   :  { %522 = vmatpush3.bf16.msra.mxu0 %v519_v41  ;;  %448 = vmatprep.mubr.msk.f32.mxu0 %vm103_vm0, %v18_v51 }
  0x2a   :  { %255 = vmatmul.mubr.f32.gmra.mrb[2].mxu1 %v21_v48  ;;  %524 = vmatprep.subr.bf16.mxu0 %v523_v47 }
  0x2d   :  { %526 = vmatpush3.bf16.msra.mxu0 %v523_v47 }
  0x2e   :  { %528 = vmatprep.subr.bf16.mxu0 %v527_v52 }
  0x31   :  { %530 = vmatpush3.bf16.msra.mxu0 %v527_v52 }
  0x34   :  { %449 = vmatmul.mubr.msk.f32.vlgmr.msra.gmra.mrb[4].mxu0 %vm103_vm0, %v23_v53 }
  0xf7   :  { %v378_v54 = vpop.f32.mrb[0].mxu0 }
  0xf8   :  { %v379_v56 = vpop.f32.mrb[1].mxu0 }
  0xf9   :  { %v416_v57 = vpop.f32.mrb[0].mxu1  ;;  %v380_v58 = vadd.f32 %v379_v56, %v378_v54 }
  0xfa   :  { %v417_v59 = vpop.f32.mrb[1].mxu1 }
  0xfb   :  { %v418_v60 = vadd.f32 %v417_v59, %v416_v57  ;;  %v177_v61 = vadd.f32 %v380_v58, %v343_v55  ;;  %v381_v62 = vpop.f32.mrb[2].mxu0 }
  0xfc   :  { %v382_v63 = vpop.f32.mrb[3].mxu0 }
  0xfd   :  { %v419_v0 = vpop.f32.mrb[2].mxu1  ;;  %v383_v1 = vadd.f32 %v382_v63, %v381_v62  ;;  %v252_v3 = vadd.f32 %v418_v60, %v177_v61 }
  0xfe   :  { %v420_v2 = vpop.f32.mrb[3].mxu1 }
  0xff   :  { %v421_v4 = vadd.f32 %v420_v2, %v419_v0  ;;  %v182_v5 = vadd.f32 %v383_v1, %v343_v55 }
 0x101   :  { %v257_v6 = vadd.f32 %v421_v4, %v182_v5 }
 0x107   :  { %v450_v7 = vpop.f32.mrb[4].mxu0 }
 0x108   :  { %v332_v8 = vadd.f32 %v450_v7, %v257_v6  ;;  %v326_v9 = vpop.f32.mrb[5].mxu0 }
 0x109   :  { %v327_v10 = vadd.f32 %v326_v9, %v252_v3 }
 0x10a   :  { %v336_v11 = vmax.f32 %v332_v8, 0.0 }
 0x10b   :  { %v335_v12 = vmax.f32 %v327_v10, 0.0 }
 0x10c   :  { %338 = vst.msk [vmem:[%s813_s3 + $0x8] sm:$0xff] %vm103_vm0, %v336_v11 }
 0x10d   :  { %337 = vst.msk [vmem:[%s813_s3] sm:$0xff] %vm103_vm0, %v335_v12 }

// kernel: _lambda_.7
= control target key start
LH: loop header
LB: loop body
LE: loop exit
PB: predicated region body
PF: predicated region fallthrough
CT: control target
= control target key end

     0   :  { %s1868_s25 = smov 0   ;;  %s2702_s0 = inlined_call_operand.vmem [shape: f32[8,256], index: 0, kind: input, shape index: {}]   ;;  %s2703_s1 = inlined_call_operand.vmem [shape: f32[256,512], index: 1, kind: input, shape index: {}]   ;;  %s2704_s2 = inlined_call_operand.vmem [shape: f32[256,512], index: 2, kind: input, shape index: {}]   ;;  %s2705_s3 = inlined_call_operand.vmem [shape: f32[256,512], index: 3, kind: input, shape index: {}]   ;;  %s2706_s4 = inlined_call_operand.vmem [shape: f32[1,512], index: 4, kind: input, shape index: {}]   ;;  %s2707_s5 = inlined_call_operand.vmem [shape: f32[1,512], index: 5, kind: input, shape index: {}]   ;;  %s2708_s6 = inlined_call_operand.vmem [shape: f32[1,512], index: 6, kind: input, shape index: {}]   ;;  %s2709_s7 = inlined_call_operand.vmem [shape: f32[512,128], index: 7, kind: input, shape index: {}]   ;;  %s2710_s8 = inlined_call_operand.vmem [shape: f32[512,128], index: 8, kind: input, shape index: {}]   ;;  %s2711_s9 = inlined_call_operand.vmem [shape: f32[512,128], index: 9, kind: input, shape index: {}]   ;;  %s2712_s10 = inlined_call_operand.vmem [shape: f32[1,128], index: 10, kind: input, shape index: {}]   ;;  %s2713_s11 = inlined_call_operand.vmem [shape: f32[1,128], index: 11, kind: input, shape index: {}]   ;;  %s2714_s12 = inlined_call_operand.vmem [shape: f32[1,128], index: 12, kind: input, shape index: {}]   ;;  %s2715_s13 = inlined_call_operand.vmem [shape: f32[8,128], index: 13, kind: output, shape index: {}]  }
   0x1 LB: > { %s1874_s26 = sadd.s32 4294967295, %s1794_s25   ;;  %p1562_p0 = scmp.ge.s32.totalorder %s1794_s25, 1  ;;  %s1794_s25 = sphi %s1868_s25, %s23_s25  }
   0x2   : > { %p417_p1 = scmp.lt.s32.totalorder %s1794_s25, 3 }
   0x4   : > { %p418_p2 = pnand %p1562_p0, %p417_p1 }
   0x5   : > { %p473_p3 = scmp.lt.s32.totalorder (!%p418_p2), %s1874_s26, 1  ;;  %s1564_s27 = sshll.u32 (!%p418_p2), %s1874_s26, 4 }
   0x6   : > { %421 = sbr.rel (%p418_p2) target bundleno = 581 (0x245), region = 72  ;;  %p478_p4 = scmp.lt.s32.totalorder (!%p418_p2), %s1564_s27, 31 }
   0x7   : > { %p1573_p5 = scmp.ne.s32.totalorder (!%p418_p2), %s1874_s26, 0 }
   0xd   : > { %s474_s28 = scalar_select %p473_p3, %s1874_s26, 1 }
   0xe   : > { %s2717_s27 = smov (!%p478_p4, %s1564_s27), 31  ;;  %501 = sbr.rel (%p1573_p5) target bundleno = 21 (0x15), region = 76 }
   0xf   : > { %s1563_s29 = sshll.u32 %s474_s28, 3  ;;  %s1577_s16 = sshll.u32 %s2717_s27, 5  ;;  %v1796_v0 = vmov (!%p1573_p5), 0.0  }
  0x10   : > { %s1884_s15 = scalar_lea.vmem %s2702_s0, %s1563_s29  ;;  %s1889_s19 = scalar_lea.vmem %s2703_s1, %s1577_s16  ;;  %502 = vst [vmem:[#allocation2] sm:$0xff] (!%p1573_p5), %v1796_v0  ;;  %503 = vst [vmem:[#allocation2 + $0x8] sm:$0xff] (!%p1573_p5), %v1796_v0 }
  0x11   : > { %s1894_s22 = scalar_lea.vmem %s2704_s2, %s1577_s16  ;;  %s1899_s28 = scalar_lea.vmem %s2705_s3, %s1577_s16  ;;  %504 = vst [vmem:[#allocation2 + $0x10] sm:$0xff] (!%p1573_p5), %v1796_v0  ;;  %505 = vst [vmem:[#allocation2 + $0x18] sm:$0xff] (!%p1573_p5), %v1796_v0 }
  0x15 PF: > { %v507_v1 = vld [vmem:[%s1889_s19 + $0x8] sm:$0xff]  ;;  %v1797_v7 = vmov 0.0   ;;  %v509_v10 = vld [vmem:[%s1889_s19 + $0x18] sm:$0xff]  ;;  %v506_v20 = vld [vmem:[%s1889_s19] sm:$0xff]  ;;  %p1574_p6 = scmp.ne.s32.totalorder %s1874_s26, 1 }
  0x16   : > { %v511_v2 = vld [vmem:[%s1889_s19 + $0x28] sm:$0xff]  ;;  %895 = vmatprep.mubr.f32.mxu0 %v1797_v7  ;;  %966 = vmatprep.mubr.f32.mxu1 %v1797_v7  ;;  %v513_v11 = vld [vmem:[%s1889_s19 + $0x38] sm:$0xff]  ;;  %v510_v21 = vld [vmem:[%s1889_s19 + $0x20] sm:$0xff] }
  0x17   : > { %v571_v3 = vld [vmem:[%s1894_s22 + $0x8] sm:$0xff]  ;;  %v573_v12 = vld [vmem:[%s1894_s22 + $0x18] sm:$0xff]  ;;  %v570_v22 = vld [vmem:[%s1894_s22] sm:$0xff] }
  0x18   : > { %v575_v4 = vld [vmem:[%s1894_s22 + $0x28] sm:$0xff]  ;;  %v577_v13 = vld [vmem:[%s1894_s22 + $0x38] sm:$0xff]  ;;  %v574_v23 = vld [vmem:[%s1894_s22 + $0x20] sm:$0xff] }
  0x19   : > { %v635_v5 = vld [vmem:[%s1899_s28 + $0x8] sm:$0xff]  ;;  %v637_v14 = vld [vmem:[%s1899_s28 + $0x18] sm:$0xff]  ;;  %v634_v24 = vld [vmem:[%s1899_s28] sm:$0xff] }
  0x1a   : > { %v639_v6 = vld [vmem:[%s1899_s28 + $0x28] sm:$0xff]  ;;  %v699_v8 = vmul.f32 %v635_v5, %v571_v3  ;;  %v641_v15 = vld [vmem:[%s1899_s28 + $0x38] sm:$0xff]  ;;  %v701_v18 = vmul.f32 %v637_v14, %v573_v12  ;;  %v638_v25 = vld [vmem:[%s1899_s28 + $0x20] sm:$0xff]  ;;  %v698_v29 = vmul.f32 %v634_v24, %v570_v22 }
  0x1b   : > { %v703_v9 = vmul.f32 %v639_v6, %v575_v4  ;;  %v705_v19 = vmul.f32 %v641_v15, %v577_v13  ;;  %v508_v30 = vld [vmem:[%s1889_s19 + $0x10] sm:$0xff]  ;;  %v702_v33 = vmul.f32 %v638_v25, %v574_v23  ;;  %v515_v41 = vld [vmem:[%s1889_s19 + $0x48] sm:$0xff]  ;;  %v517_v52 = vld [vmem:[%s1889_s19 + $0x58] sm:$0xff] }
  0x1c   : > { %v763_v16 = vadd.f32 %v699_v8, %v507_v1  ;;  %v765_v27 = vadd.f32 %v701_v18, %v509_v10  ;;  %v512_v31 = vld [vmem:[%s1889_s19 + $0x30] sm:$0xff]  ;;  %v762_v38 = vadd.f32 %v698_v29, %v506_v20  ;;  %v519_v42 = vld [vmem:[%s1889_s19 + $0x68] sm:$0xff]  ;;  %v521_v53 = vld [vmem:[%s1889_s19 + $0x78] sm:$0xff] }
  0x1d   : > { %v767_v17 = vadd.f32 %v703_v9, %v511_v2  ;;  %v769_v28 = vadd.f32 %v705_v19, %v513_v11  ;;  %v572_v32 = vld [vmem:[%s1894_s22 + $0x10] sm:$0xff]  ;;  %v579_v43 = vld [vmem:[%s1894_s22 + $0x48] sm:$0xff]  ;;  %v766_v44 = vadd.f32 %v702_v33, %v510_v21  ;;  %v581_v54 = vld [vmem:[%s1894_s22 + $0x58] sm:$0xff] }
  0x1e   : > { %v576_v34 = vld [vmem:[%s1894_s22 + $0x30] sm:$0xff]  ;;  %v583_v45 = vld [vmem:[%s1894_s22 + $0x68] sm:$0xff]  ;;  %v585_v56 = vld [vmem:[%s1894_s22 + $0x78] sm:$0xff] }
  0x1f   : > { %v1650_v26 = vpack.c.bf16 %v767_v17, %v763_v16  ;;  %v636_v35 = vld [vmem:[%s1899_s28 + $0x10] sm:$0xff]  ;;  %v1682_v37 = vpack.c.bf16 %v769_v28, %v765_v27  ;;  %v643_v46 = vld [vmem:[%s1899_s28 + $0x48] sm:$0xff]  ;;  %v1652_v55 = vpack.c.bf16 %v766_v44, %v762_v38  ;;  %v645_v57 = vld [vmem:[%s1899_s28 + $0x58] sm:$0xff] }
  0x20   : > { %v640_v36 = vld [vmem:[%s1899_s28 + $0x30] sm:$0xff]  ;;  %v700_v39 = vmul.f32 %v636_v35, %v572_v32  ;;  %v647_v47 = vld [vmem:[%s1899_s28 + $0x68] sm:$0xff]  ;;  %v707_v50 = vmul.f32 %v643_v46, %v579_v43  ;;  %v649_v58 = vld [vmem:[%s1899_s28 + $0x78] sm:$0xff]  ;;  %v709_v62 = vmul.f32 %v645_v57, %v581_v54 }
  0x21   : > { %1651 = vmatprep.subr.bf16.mxu0 %v1650_v26  ;;  %v704_v40 = vmul.f32 %v640_v36, %v576_v34  ;;  %1683 = vmatprep.subr.bf16.mxu1 %v1682_v37  ;;  %v711_v51 = vmul.f32 %v647_v47, %v583_v45  ;;  %v514_v63 = vld [vmem:[%s1889_s19 + $0x40] sm:$0xff]  ;;  %v713_v2 = vmul.f32 %v649_v58, %v585_v56  ;;  %v516_v10 = vld [vmem:[%s1889_s19 + $0x50] sm:$0xff]  ;;  %v523_v21 = vld [vmem:[%s1889_s19 + $0x88] sm:$0xff] }
  0x22   : > { %v764_v48 = vadd.f32 %v700_v39, %v508_v30  ;;  %v771_v60 = vadd.f32 %v707_v50, %v515_v41  ;;  %v518_v0 = vld [vmem:[%s1889_s19 + $0x60] sm:$0xff]  ;;  %1653 = vmatpush1.bf16.msra.mxu0 %v1652_v55  ;;  %v773_v7 = vadd.f32 %v709_v62, %v517_v52  ;;  %v520_v11 = vld [vmem:[%s1889_s19 + $0x70] sm:$0xff]  ;;  %v527_v22 = vld [vmem:[%s1889_s19 + $0xa8] sm:$0xff] }
  0x23   : > { %v768_v49 = vadd.f32 %v704_v40, %v512_v31  ;;  %v775_v61 = vadd.f32 %v711_v51, %v519_v42  ;;  %v578_v1 = vld [vmem:[%s1894_s22 + $0x40] sm:$0xff]  ;;  %v580_v12 = vld [vmem:[%s1894_s22 + $0x50] sm:$0xff]  ;;  %v777_v13 = vadd.f32 %v713_v2, %v521_v53  ;;  %v587_v23 = vld [vmem:[%s1894_s22 + $0x88] sm:$0xff] }
  0x24   : > { %v582_v3 = vld [vmem:[%s1894_s22 + $0x60] sm:$0xff]  ;;  %v584_v14 = vld [vmem:[%s1894_s22 + $0x70] sm:$0xff]  ;;  %v591_v25 = vld [vmem:[%s1894_s22 + $0xa8] sm:$0xff] }
  0x25   : > { %v1684_v59 = vpack.c.bf16 %v768_v49, %v764_v48  ;;  %v642_v4 = vld [vmem:[%s1899_s28 + $0x40] sm:$0xff]  ;;  %v1654_v6 = vpack.c.bf16 %v775_v61, %v771_v60  ;;  %v644_v15 = vld [vmem:[%s1899_s28 + $0x50] sm:$0xff]  ;;  %v1686_v24 = vpack.c.bf16 %v777_v13, %v773_v7  ;;  %v651_v26 = vld [vmem:[%s1899_s28 + $0x88] sm:$0xff] }
  0x26   : > { %v646_v5 = vld [vmem:[%s1899_s28 + $0x60] sm:$0xff]  ;;  %v706_v8 = vmul.f32 %v642_v4, %v578_v1  ;;  %v648_v16 = vld [vmem:[%s1899_s28 + $0x70] sm:$0xff]  ;;  %v708_v19 = vmul.f32 %v644_v15, %v580_v12  ;;  %v655_v27 = vld [vmem:[%s1899_s28 + $0xa8] sm:$0xff]  ;;  %v715_v31 = vmul.f32 %v651_v26, %v587_v23 }
  0x27   : > { %1685 = vmatpush1.bf16.msra.mxu1 %v1684_v59  ;;  %v710_v9 = vmul.f32 %v646_v5, %v582_v3  ;;  %1655 = vmatprep.subr.bf16.mxu0 %v1654_v6  ;;  %v712_v20 = vmul.f32 %v648_v16, %v584_v14  ;;  %v525_v32 = vld [vmem:[%s1889_s19 + $0x98] sm:$0xff]  ;;  %v719_v35 = vmul.f32 %v655_v27, %v591_v25  ;;  %v522_v43 = vld [vmem:[%s1889_s19 + $0x80] sm:$0xff]  ;;  %v524_v54 = vld [vmem:[%s1889_s19 + $0x90] sm:$0xff] }
  0x28   : > { %v770_v17 = vadd.f32 %v706_v8, %v514_v63  ;;  %v772_v29 = vadd.f32 %v708_v19, %v516_v10  ;;  %v529_v33 = vld [vmem:[%s1889_s19 + $0xb8] sm:$0xff]  ;;  %1687 = vmatprep.subr.bf16.mxu1 %v1686_v24  ;;  %v779_v40 = vadd.f32 %v715_v31, %v523_v21  ;;  %v526_v44 = vld [vmem:[%s1889_s19 + $0xa0] sm:$0xff]  ;;  %v528_v55 = vld [vmem:[%s1889_s19 + $0xb0] sm:$0xff] }
  0x29   : > { %v774_v18 = vadd.f32 %v710_v9, %v518_v0  ;;  %v776_v30 = vadd.f32 %v712_v20, %v520_v11  ;;  %v589_v34 = vld [vmem:[%s1894_s22 + $0x98] sm:$0xff]  ;;  %v586_v45 = vld [vmem:[%s1894_s22 + $0x80] sm:$0xff]  ;;  %v783_v46 = vadd.f32 %v719_v35, %v527_v22  ;;  %v588_v56 = vld [vmem:[%s1894_s22 + $0x90] sm:$0xff] }
  0x2a   : > { %v593_v36 = vld [vmem:[%s1894_s22 + $0xb8] sm:$0xff]  ;;  %v590_v47 = vld [vmem:[%s1894_s22 + $0xa0] sm:$0xff]  ;;  %v592_v58 = vld [vmem:[%s1894_s22 + $0xb0] sm:$0xff] }
  0x2b   : > { %v1656_v28 = vpack.c.bf16 %v774_v18, %v770_v17  ;;  %v653_v37 = vld [vmem:[%s1899_s28 + $0x98] sm:$0xff]  ;;  %v1688_v39 = vpack.c.bf16 %v776_v30, %v772_v29  ;;  %v650_v48 = vld [vmem:[%s1899_s28 + $0x80] sm:$0xff]  ;;  %v1658_v57 = vpack.c.bf16 %v783_v46, %v779_v40  ;;  %v652_v59 = vld [vmem:[%s1899_s28 + $0x90] sm:$0xff] }
  0x2c   : > { %v657_v38 = vld [vmem:[%s1899_s28 + $0xb8] sm:$0xff]  ;;  %v717_v41 = vmul.f32 %v653_v37, %v589_v34  ;;  %v654_v49 = vld [vmem:[%s1899_s28 + $0xa0] sm:$0xff]  ;;  %v714_v52 = vmul.f32 %v650_v48, %v586_v45  ;;  %v656_v60 = vld [vmem:[%s1899_s28 + $0xb0] sm:$0xff]  ;;  %v716_v0 = vmul.f32 %v652_v59, %v588_v56 }
  0x2d   : > { %1657 = vmatpush1.bf16.msra.mxu0 %v1656_v28  ;;  %v721_v42 = vmul.f32 %v657_v38, %v593_v36  ;;  %1689 = vmatpush1.bf16.msra.mxu1 %v1688_v39  ;;  %v718_v53 = vmul.f32 %v654_v49, %v590_v47  ;;  %v531_v1 = vld [vmem:[%s1889_s19 + $0xc8] sm:$0xff]  ;;  %v720_v4 = vmul.f32 %v656_v60, %v592_v58  ;;  %v533_v12 = vld [vmem:[%s1889_s19 + $0xd8] sm:$0xff]  ;;  %v530_v23 = vld [vmem:[%s1889_s19 + $0xc0] sm:$0xff] }
  0x2e   : > { %v781_v50 = vadd.f32 %v717_v41, %v525_v32  ;;  %v778_v62 = vadd.f32 %v714_v52, %v522_v43  ;;  %v535_v2 = vld [vmem:[%s1889_s19 + $0xe8] sm:$0xff]  ;;  %1659 = vmatprep.subr.bf16.mxu0 %v1658_v57  ;;  %v780_v9 = vadd.f32 %v716_v0, %v524_v54  ;;  %v537_v13 = vld [vmem:[%s1889_s19 + $0xf8] sm:$0xff]  ;;  %v534_v24 = vld [vmem:[%s1889_s19 + $0xe0] sm:$0xff] }
  0x2f   : > { %v785_v51 = vadd.f32 %v721_v42, %v529_v33  ;;  %v782_v63 = vadd.f32 %v718_v53, %v526_v44  ;;  %v595_v3 = vld [vmem:[%s1894_s22 + $0xc8] sm:$0xff]  ;;  %v597_v14 = vld [vmem:[%s1894_s22 + $0xd8] sm:$0xff]  ;;  %v784_v15 = vadd.f32 %v720_v4, %v528_v55  ;;  %v594_v25 = vld [vmem:[%s1894_s22 + $0xc0] sm:$0xff] }
  0x30   : > { %v599_v5 = vld [vmem:[%s1894_s22 + $0xe8] sm:$0xff]  ;;  %v601_v16 = vld [vmem:[%s1894_s22 + $0xf8] sm:$0xff]  ;;  %v598_v27 = vld [vmem:[%s1894_s22 + $0xe0] sm:$0xff] }
  0x31   : > { %v1690_v61 = vpack.c.bf16 %v785_v51, %v781_v50  ;;  %v659_v6 = vld [vmem:[%s1899_s28 + $0xc8] sm:$0xff]  ;;  %v1660_v8 = vpack.c.bf16 %v782_v63, %v778_v62  ;;  %v661_v17 = vld [vmem:[%s1899_s28 + $0xd8] sm:$0xff]  ;;  %v1692_v26 = vpack.c.bf16 %v784_v15, %v780_v9  ;;  %v658_v28 = vld [vmem:[%s1899_s28 + $0xc0] sm:$0xff] }
  0x32   : > { %v663_v7 = vld [vmem:[%s1899_s28 + $0xe8] sm:$0xff]  ;;  %v723_v10 = vmul.f32 %v659_v6, %v595_v3  ;;  %v665_v18 = vld [vmem:[%s1899_s28 + $0xf8] sm:$0xff]  ;;  %v725_v21 = vmul.f32 %v661_v17, %v597_v14  ;;  %v662_v29 = vld [vmem:[%s1899_s28 + $0xe0] sm:$0xff]  ;;  %v722_v33 = vmul.f32 %v658_v28, %v594_v25 }
  0x33   : > { %1691 = vmatprep.subr.bf16.mxu1 %v1690_v61  ;;  %v727_v11 = vmul.f32 %v663_v7, %v599_v5  ;;  %1661 = vmatpush1.bf16.msra.mxu0 %v1660_v8  ;;  %v729_v22 = vmul.f32 %v665_v18, %v601_v16  ;;  %v532_v34 = vld [vmem:[%s1889_s19 + $0xd0] sm:$0xff]  ;;  %v726_v37 = vmul.f32 %v662_v29, %v598_v27  ;;  %v539_v45 = vld [vmem:[%s1889_s19 + $0x108] sm:$0xff]  ;;  %v541_v56 = vld [vmem:[%s1889_s19 + $0x118] sm:$0xff] }
  0x34   : > { %v787_v19 = vadd.f32 %v723_v10, %v531_v1  ;;  %v789_v31 = vadd.f32 %v725_v21, %v533_v12  ;;  %v536_v35 = vld [vmem:[%s1889_s19 + $0xf0] sm:$0xff]  ;;  %1693 = vmatpush1.bf16.msra.mxu1 %v1692_v26  ;;  %v786_v42 = vadd.f32 %v722_v33, %v530_v23  ;;  %v543_v46 = vld [vmem:[%s1889_s19 + $0x128] sm:$0xff]  ;;  %v545_v57 = vld [vmem:[%s1889_s19 + $0x138] sm:$0xff] }
  0x35   : > { %v791_v20 = vadd.f32 %v727_v11, %v535_v2  ;;  %v793_v32 = vadd.f32 %v729_v22, %v537_v13  ;;  %v596_v36 = vld [vmem:[%s1894_s22 + $0xd0] sm:$0xff]  ;;  %v603_v47 = vld [vmem:[%s1894_s22 + $0x108] sm:$0xff]  ;;  %v790_v48 = vadd.f32 %v726_v37, %v534_v24  ;;  %v605_v58 = vld [vmem:[%s1894_s22 + $0x118] sm:$0xff] }
  0x36   : > { %v600_v38 = vld [vmem:[%s1894_s22 + $0xf0] sm:$0xff]  ;;  %v607_v49 = vld [vmem:[%s1894_s22 + $0x128] sm:$0xff]  ;;  %v609_v60 = vld [vmem:[%s1894_s22 + $0x138] sm:$0xff] }
  0x37   : > { %v1662_v30 = vpack.c.bf16 %v791_v20, %v787_v19  ;;  %v660_v39 = vld [vmem:[%s1899_s28 + $0xd0] sm:$0xff]  ;;  %v1694_v41 = vpack.c.bf16 %v793_v32, %v789_v31  ;;  %v667_v50 = vld [vmem:[%s1899_s28 + $0x108] sm:$0xff]  ;;  %v1664_v59 = vpack.c.bf16 %v790_v48, %v786_v42  ;;  %v669_v61 = vld [vmem:[%s1899_s28 + $0x118] sm:$0xff] }
  0x38   : > { %v664_v40 = vld [vmem:[%s1899_s28 + $0xf0] sm:$0xff]  ;;  %v724_v43 = vmul.f32 %v660_v39, %v596_v36  ;;  %v671_v51 = vld [vmem:[%s1899_s28 + $0x128] sm:$0xff]  ;;  %v731_v54 = vmul.f32 %v667_v50, %v603_v47  ;;  %v673_v62 = vld [vmem:[%s1899_s28 + $0x138] sm:$0xff]  ;;  %v733_v2 = vmul.f32 %v669_v61, %v605_v58 }
  0x39   : > { %1663 = vmatprep.subr.bf16.mxu0 %v1662_v30  ;;  %v728_v44 = vmul.f32 %v664_v40, %v600_v38  ;;  %1695 = vmatprep.subr.bf16.mxu1 %v1694_v41  ;;  %v735_v55 = vmul.f32 %v671_v51, %v607_v49  ;;  %v538_v3 = vld [vmem:[%s1889_s19 + $0x100] sm:$0xff]  ;;  %v737_v6 = vmul.f32 %v673_v62, %v609_v60  ;;  %v540_v14 = vld [vmem:[%s1889_s19 + $0x110] sm:$0xff]  ;;  %v547_v25 = vld [vmem:[%s1889_s19 + $0x148] sm:$0xff] }
  0x3a   : > { %v788_v52 = vadd.f32 %v724_v43, %v532_v34  ;;  %v795_v0 = vadd.f32 %v731_v54, %v539_v45  ;;  %v542_v4 = vld [vmem:[%s1889_s19 + $0x120] sm:$0xff]  ;;  %1665 = vmatpush1.bf16.msra.mxu0 %v1664_v59  ;;  %v797_v11 = vadd.f32 %v733_v2, %v541_v56  ;;  %v544_v15 = vld [vmem:[%s1889_s19 + $0x130] sm:$0xff]  ;;  %v551_v26 = vld [vmem:[%s1889_s19 + $0x168] sm:$0xff] }
  0x3b   : > { %v792_v53 = vadd.f32 %v728_v44, %v536_v35  ;;  %v799_v1 = vadd.f32 %v735_v55, %v543_v46  ;;  %v602_v5 = vld [vmem:[%s1894_s22 + $0x100] sm:$0xff]  ;;  %v604_v16 = vld [vmem:[%s1894_s22 + $0x110] sm:$0xff]  ;;  %v801_v17 = vadd.f32 %v737_v6, %v545_v57  ;;  %v611_v27 = vld [vmem:[%s1894_s22 + $0x148] sm:$0xff] }
  0x3c   : > { %v606_v7 = vld [vmem:[%s1894_s22 + $0x120] sm:$0xff]  ;;  %v608_v18 = vld [vmem:[%s1894_s22 + $0x130] sm:$0xff]  ;;  %v615_v29 = vld [vmem:[%s1894_s22 + $0x168] sm:$0xff] }
  0x3d   : > { %v1696_v63 = vpack.c.bf16 %v792_v53, %v788_v52  ;;  %v666_v8 = vld [vmem:[%s1899_s28 + $0x100] sm:$0xff]  ;;  %v1666_v10 = vpack.c.bf16 %v799_v1, %v795_v0  ;;  %v668_v19 = vld [vmem:[%s1899_s28 + $0x110] sm:$0xff]  ;;  %v1698_v28 = vpack.c.bf16 %v801_v17, %v797_v11  ;;  %v675_v30 = vld [vmem:[%s1899_s28 + $0x148] sm:$0xff] }
  0x3e   : > { %v670_v9 = vld [vmem:[%s1899_s28 + $0x120] sm:$0xff]  ;;  %v730_v12 = vmul.f32 %v666_v8, %v602_v5  ;;  %v672_v20 = vld [vmem:[%s1899_s28 + $0x130] sm:$0xff]  ;;  %v732_v23 = vmul.f32 %v668_v19, %v604_v16  ;;  %v679_v31 = vld [vmem:[%s1899_s28 + $0x168] sm:$0xff]  ;;  %v739_v35 = vmul.f32 %v675_v30, %v611_v27 }
  0x3f   : > { %1697 = vmatpush1.bf16.msra.mxu1 %v1696_v63  ;;  %v734_v13 = vmul.f32 %v670_v9, %v606_v7  ;;  %1667 = vmatprep.subr.bf16.mxu0 %v1666_v10  ;;  %v736_v24 = vmul.f32 %v672_v20, %v608_v18  ;;  %v549_v36 = vld [vmem:[%s1889_s19 + $0x158] sm:$0xff]  ;;  %v743_v39 = vmul.f32 %v679_v31, %v615_v29  ;;  %v546_v47 = vld [vmem:[%s1889_s19 + $0x140] sm:$0xff]  ;;  %v548_v58 = vld [vmem:[%s1889_s19 + $0x150] sm:$0xff] }
  0x40   : > { %v794_v21 = vadd.f32 %v730_v12, %v538_v3  ;;  %v796_v33 = vadd.f32 %v732_v23, %v540_v14  ;;  %v553_v37 = vld [vmem:[%s1889_s19 + $0x178] sm:$0xff]  ;;  %1699 = vmatprep.subr.bf16.mxu1 %v1698_v28  ;;  %v803_v44 = vadd.f32 %v739_v35, %v547_v25  ;;  %v550_v48 = vld [vmem:[%s1889_s19 + $0x160] sm:$0xff]  ;;  %v552_v59 = vld [vmem:[%s1889_s19 + $0x170] sm:$0xff] }
  0x41   : > { %v798_v22 = vadd.f32 %v734_v13, %v542_v4  ;;  %v800_v34 = vadd.f32 %v736_v24, %v544_v15  ;;  %v613_v38 = vld [vmem:[%s1894_s22 + $0x158] sm:$0xff]  ;;  %v610_v49 = vld [vmem:[%s1894_s22 + $0x140] sm:$0xff]  ;;  %v807_v50 = vadd.f32 %v743_v39, %v551_v26  ;;  %v612_v60 = vld [vmem:[%s1894_s22 + $0x150] sm:$0xff] }
  0x42   : > { %v617_v40 = vld [vmem:[%s1894_s22 + $0x178] sm:$0xff]  ;;  %v614_v51 = vld [vmem:[%s1894_s22 + $0x160] sm:$0xff]  ;;  %v616_v62 = vld [vmem:[%s1894_s22 + $0x170] sm:$0xff] }
  0x43   : > { %v1668_v32 = vpack.c.bf16 %v798_v22, %v794_v21  ;;  %v677_v41 = vld [vmem:[%s1899_s28 + $0x158] sm:$0xff]  ;;  %v1700_v43 = vpack.c.bf16 %v800_v34, %v796_v33  ;;  %v674_v52 = vld [vmem:[%s1899_s28 + $0x140] sm:$0xff]  ;;  %v1670_v61 = vpack.c.bf16 %v807_v50, %v803_v44  ;;  %v676_v63 = vld [vmem:[%s1899_s28 + $0x150] sm:$0xff] }
  0x44   : > { %v681_v42 = vld [vmem:[%s1899_s28 + $0x178] sm:$0xff]  ;;  %v741_v45 = vmul.f32 %v677_v41, %v613_v38  ;;  %v678_v53 = vld [vmem:[%s1899_s28 + $0x160] sm:$0xff]  ;;  %v738_v56 = vmul.f32 %v674_v52, %v610_v49  ;;  %v680_v0 = vld [vmem:[%s1899_s28 + $0x170] sm:$0xff]  ;;  %v740_v4 = vmul.f32 %v676_v63, %v612_v60 }
  0x45   : > { %1669 = vmatpush1.bf16.msra.mxu0 %v1668_v32  ;;  %v745_v46 = vmul.f32 %v681_v42, %v617_v40  ;;  %1701 = vmatpush1.bf16.msra.mxu1 %v1700_v43  ;;  %v742_v57 = vmul.f32 %v678_v53, %v614_v51  ;;  %v555_v5 = vld [vmem:[%s1889_s19 + $0x188] sm:$0xff]  ;;  %v744_v8 = vmul.f32 %v680_v0, %v616_v62  ;;  %v557_v16 = vld [vmem:[%s1889_s19 + $0x198] sm:$0xff]  ;;  %v554_v27 = vld [vmem:[%s1889_s19 + $0x180] sm:$0xff] }
  0x46   : > { %v805_v54 = vadd.f32 %v741_v45, %v549_v36  ;;  %v802_v2 = vadd.f32 %v738_v56, %v546_v47  ;;  %v559_v6 = vld [vmem:[%s1889_s19 + $0x1a8] sm:$0xff]  ;;  %1671 = vmatprep.subr.bf16.mxu0 %v1670_v61  ;;  %v804_v13 = vadd.f32 %v740_v4, %v548_v58  ;;  %v561_v17 = vld [vmem:[%s1889_s19 + $0x1b8] sm:$0xff]  ;;  %v558_v28 = vld [vmem:[%s1889_s19 + $0x1a0] sm:$0xff] }
  0x47   : > { %v809_v55 = vadd.f32 %v745_v46, %v553_v37  ;;  %v806_v3 = vadd.f32 %v742_v57, %v550_v48  ;;  %v619_v7 = vld [vmem:[%s1894_s22 + $0x188] sm:$0xff]  ;;  %v621_v18 = vld [vmem:[%s1894_s22 + $0x198] sm:$0xff]  ;;  %v808_v19 = vadd.f32 %v744_v8, %v552_v59  ;;  %v618_v29 = vld [vmem:[%s1894_s22 + $0x180] sm:$0xff] }
  0x48   : > { %v623_v9 = vld [vmem:[%s1894_s22 + $0x1a8] sm:$0xff]  ;;  %v625_v20 = vld [vmem:[%s1894_s22 + $0x1b8] sm:$0xff]  ;;  %v622_v31 = vld [vmem:[%s1894_s22 + $0x1a0] sm:$0xff] }
  0x49   : > { %v1702_v1 = vpack.c.bf16 %v809_v55, %v805_v54  ;;  %v683_v10 = vld [vmem:[%s1899_s28 + $0x188] sm:$0xff]  ;;  %v1672_v12 = vpack.c.bf16 %v806_v3, %v802_v2  ;;  %v685_v21 = vld [vmem:[%s1899_s28 + $0x198] sm:$0xff]  ;;  %v1704_v30 = vpack.c.bf16 %v808_v19, %v804_v13  ;;  %v682_v32 = vld [vmem:[%s1899_s28 + $0x180] sm:$0xff] }
  0x4a   : > { %v687_v11 = vld [vmem:[%s1899_s28 + $0x1a8] sm:$0xff]  ;;  %v747_v14 = vmul.f32 %v683_v10, %v619_v7  ;;  %v689_v22 = vld [vmem:[%s1899_s28 + $0x1b8] sm:$0xff]  ;;  %v749_v25 = vmul.f32 %v685_v21, %v621_v18  ;;  %v686_v33 = vld [vmem:[%s1899_s28 + $0x1a0] sm:$0xff]  ;;  %v746_v37 = vmul.f32 %v682_v32, %v618_v29 }
  0x4b   : > { %1703 = vmatprep.subr.bf16.mxu1 %v1702_v1  ;;  %v751_v15 = vmul.f32 %v687_v11, %v623_v9  ;;  %1673 = vmatpush1.bf16.msra.mxu0 %v1672_v12  ;;  %v753_v26 = vmul.f32 %v689_v22, %v625_v20  ;;  %v556_v38 = vld [vmem:[%s1889_s19 + $0x190] sm:$0xff]  ;;  %v750_v41 = vmul.f32 %v686_v33, %v622_v31  ;;  %v563_v49 = vld [vmem:[%s1889_s19 + $0x1c8] sm:$0xff]  ;;  %v565_v60 = vld [vmem:[%s1889_s19 + $0x1d8] sm:$0xff] }
  0x4c   : > { %v811_v23 = vadd.f32 %v747_v14, %v555_v5  ;;  %v813_v35 = vadd.f32 %v749_v25, %v557_v16  ;;  %v560_v39 = vld [vmem:[%s1889_s19 + $0x1b0] sm:$0xff]  ;;  %1705 = vmatpush1.bf16.msra.mxu1 %v1704_v30  ;;  %v810_v46 = vadd.f32 %v746_v37, %v554_v27  ;;  %v567_v50 = vld [vmem:[%s1889_s19 + $0x1e8] sm:$0xff]  ;;  %v569_v61 = vld [vmem:[%s1889_s19 + $0x1f8] sm:$0xff] }
  0x4d   : > { %v815_v24 = vadd.f32 %v751_v15, %v559_v6  ;;  %v817_v36 = vadd.f32 %v753_v26, %v561_v17  ;;  %v620_v40 = vld [vmem:[%s1894_s22 + $0x190] sm:$0xff]  ;;  %v627_v51 = vld [vmem:[%s1894_s22 + $0x1c8] sm:$0xff]  ;;  %v814_v52 = vadd.f32 %v750_v41, %v558_v28  ;;  %v629_v62 = vld [vmem:[%s1894_s22 + $0x1d8] sm:$0xff] }
  0x4e   : > { %v624_v42 = vld [vmem:[%s1894_s22 + $0x1b0] sm:$0xff]  ;;  %v631_v53 = vld [vmem:[%s1894_s22 + $0x1e8] sm:$0xff]  ;;  %v633_v0 = vld [vmem:[%s1894_s22 + $0x1f8] sm:$0xff] }
  0x4f   : > { %v1674_v34 = vpack.c.bf16 %v815_v24, %v811_v23  ;;  %v684_v43 = vld [vmem:[%s1899_s28 + $0x190] sm:$0xff]  ;;  %v1706_v45 = vpack.c.bf16 %v817_v36, %v813_v35  ;;  %v691_v54 = vld [vmem:[%s1899_s28 + $0x1c8] sm:$0xff]  ;;  %v1676_v63 = vpack.c.bf16 %v814_v52, %v810_v46  ;;  %v693_v1 = vld [vmem:[%s1899_s28 + $0x1d8] sm:$0xff] }
  0x50   : > { %v688_v44 = vld [vmem:[%s1899_s28 + $0x1b0] sm:$0xff]  ;;  %v748_v47 = vmul.f32 %v684_v43, %v620_v40  ;;  %v695_v55 = vld [vmem:[%s1899_s28 + $0x1e8] sm:$0xff]  ;;  %v755_v58 = vmul.f32 %v691_v54, %v627_v51  ;;  %v697_v2 = vld [vmem:[%s1899_s28 + $0x1f8] sm:$0xff]  ;;  %v757_v6 = vmul.f32 %v693_v1, %v629_v62 }
  0x51   : > { %1675 = vmatprep.subr.bf16.mxu0 %v1674_v34  ;;  %v752_v48 = vmul.f32 %v688_v44, %v624_v42  ;;  %1707 = vmatprep.subr.bf16.mxu1 %v1706_v45  ;;  %v759_v59 = vmul.f32 %v695_v55, %v631_v53  ;;  %v562_v7 = vld [vmem:[%s1889_s19 + $0x1c0] sm:$0xff]  ;;  %v761_v10 = vmul.f32 %v697_v2, %v633_v0  ;;  %v564_v18 = vld [vmem:[%s1889_s19 + $0x1d0] sm:$0xff]  ;;  %v827_v36 = vld [vmem:[#allocation2 + $0x8] sm:$0xff] }
  0x52   : > { %v812_v56 = vadd.f32 %v748_v47, %v556_v38  ;;  %v819_v4 = vadd.f32 %v755_v58, %v563_v49  ;;  %v566_v8 = vld [vmem:[%s1889_s19 + $0x1e0] sm:$0xff]  ;;  %1677 = vmatpush1.bf16.msra.mxu0 %v1676_v63  ;;  %v821_v15 = vadd.f32 %v757_v6, %v565_v60  ;;  %v568_v19 = vld [vmem:[%s1889_s19 + $0x1f0] sm:$0xff]  ;;  %v829_v41 = vld [vmem:[#allocation2 + $0x18] sm:$0xff] }
  0x53   : > { %v816_v57 = vadd.f32 %v752_v48, %v560_v39  ;;  %v823_v5 = vadd.f32 %v759_v59, %v567_v50  ;;  %v626_v9 = vld [vmem:[%s1894_s22 + $0x1c0] sm:$0xff]  ;;  %v628_v20 = vld [vmem:[%s1894_s22 + $0x1d0] sm:$0xff]  ;;  %v825_v21 = vadd.f32 %v761_v10, %v569_v61  ;;  %v1040_v48 = vld [vmem:[%s2709_s7 + $0x88] sm:$0xff] (!%p1574_p6) }
  0x54   : > { %v630_v11 = vld [vmem:[%s1894_s22 + $0x1e0] sm:$0xff]  ;;  %v632_v22 = vld [vmem:[%s1894_s22 + $0x1f0] sm:$0xff]  ;;  %v1104_v50 = vld [vmem:[%s2710_s8 + $0x88] sm:$0xff] (!%p1574_p6) }
  0x55   : > { %v1708_v3 = vpack.c.bf16 %v816_v57, %v812_v56  ;;  %v690_v12 = vld [vmem:[%s1899_s28 + $0x1c0] sm:$0xff]  ;;  %v1678_v14 = vpack.c.bf16 %v823_v5, %v819_v4  ;;  %v692_v23 = vld [vmem:[%s1899_s28 + $0x1d0] sm:$0xff]  ;;  %v1710_v29 = vpack.c.bf16 %v825_v21, %v821_v15  ;;  %v1168_v52 = vld [vmem:[%s2711_s9 + $0x88] sm:$0xff] (!%p1574_p6) }
  0x56   : > { %v694_v13 = vld [vmem:[%s1899_s28 + $0x1e0] sm:$0xff]  ;;  %v754_v16 = vmul.f32 %v690_v12, %v626_v9  ;;  %v696_v24 = vld [vmem:[%s1899_s28 + $0x1f0] sm:$0xff]  ;;  %v756_v27 = vmul.f32 %v692_v23, %v628_v20  ;;  %v1232_v54 = vmul.f32 (!%p1574_p6), %v1168_v52, %v1104_v50  ;;  %v1024_v56 = vld [vmem:[%s2709_s7 + $0x8] sm:$0xff] (!%p1574_p6) }
  0x57   : > { %1709 = vmatpush1.bf16.msra.mxu1 %v1708_v3  ;;  %v758_v17 = vmul.f32 %v694_v13, %v630_v11  ;;  %1679 = vmatprep.subr.bf16.mxu0 %v1678_v14  ;;  %v760_v28 = vmul.f32 %v696_v24, %v632_v22  ;;  %v830_v34 = vld [vmem:[%s1884_s15] sm:$0xff]  ;;  %v828_v38 = vld [vmem:[#allocation2 + $0x10] sm:$0xff]  ;;  %v1088_v58 = vld [vmem:[%s2710_s8 + $0x8] sm:$0xff] (!%p1574_p6) }
  0x58   : > { %v818_v25 = vadd.f32 %v754_v16, %v562_v7  ;;  %v820_v31 = vadd.f32 %v756_v27, %v564_v18  ;;  %1711 = vmatprep.subr.bf16.mxu1 %v1710_v29  ;;  %v826_v35 = vld [vmem:[#allocation2] sm:$0xff]  ;;  %v1152_v60 = vld [vmem:[%s2711_s9 + $0x8] sm:$0xff] (!%p1574_p6)  ;;  %v1296_v62 = vadd.f32 (!%p1574_p6), %v1232_v54, %v1040_v48  ;;  %v1041_v22 = vld [vmem:[%s2709_s7 + $0x90] sm:$0xff] (!%p1574_p6) }
  0x59   : > { %v822_v26 = vadd.f32 %v758_v17, %v566_v8  ;;  %v824_v32 = vadd.f32 %v760_v28, %v568_v19  ;;  %v1039_v47 = vld [vmem:[%s2709_s7 + $0x80] sm:$0xff] (!%p1574_p6)  ;;  %v1216_v0 = vmul.f32 (!%p1574_p6), %v1152_v60, %v1088_v58  ;;  %v1072_v2 = vld [vmem:[%s2709_s7 + $0x188] sm:$0xff] (!%p1574_p6)  ;;  %v1042_v23 = vld [vmem:[%s2709_s7 + $0x98] sm:$0xff] (!%p1574_p6) }
  0x5a   : > { %v1103_v49 = vld [vmem:[%s2710_s8 + $0x80] sm:$0xff] (!%p1574_p6)  ;;  %v1136_v4 = vld [vmem:[%s2710_s8 + $0x188] sm:$0xff] (!%p1574_p6)  ;;  %v1105_v24 = vld [vmem:[%s2710_s8 + $0x90] sm:$0xff] (!%p1574_p6) }
  0x5b   : > { %v1680_v30 = vpack.c.bf16 %v822_v26, %v818_v25  ;;  %v1712_v33 = vpack.c.bf16 %v824_v32, %v820_v31  ;;  %v1167_v51 = vld [vmem:[%s2711_s9 + $0x80] sm:$0xff] (!%p1574_p6)  ;;  %v1200_v6 = vld [vmem:[%s2711_s9 + $0x188] sm:$0xff] (!%p1574_p6)  ;;  %v1280_v9 = vadd.f32 (!%p1574_p6), %v1216_v0, %v1024_v56  ;;  %v1106_v26 = vld [vmem:[%s2710_s8 + $0x98] sm:$0xff] (!%p1574_p6) }
  0x5c   : > { %v1231_v53 = vmul.f32 (!%p1574_p6), %v1167_v51, %v1103_v49  ;;  %v1023_v55 = vld [vmem:[%s2709_s7] sm:$0xff] (!%p1574_p6)  ;;  %v1056_v12 = vld [vmem:[%s2709_s7 + $0x108] sm:$0xff] (!%p1574_p6)  ;;  %v1264_v14 = vmul.f32 (!%p1574_p6), %v1200_v6, %v1136_v4  ;;  %v1169_v27 = vld [vmem:[%s2711_s9 + $0x90] sm:$0xff] (!%p1574_p6) }
  0x5d   : > { %1681 = vmatpush1.bf16.msra.mxu0 %v1680_v30  ;;  %1713 = vmatpush1.bf16.msra.mxu1 %v1712_v33  ;;  %v1087_v57 = vld [vmem:[%s2710_s8] sm:$0xff] (!%p1574_p6)  ;;  %v1120_v15 = vld [vmem:[%s2710_s8 + $0x108] sm:$0xff] (!%p1574_p6)  ;;  %v1170_v28 = vld [vmem:[%s2711_s9 + $0x98] sm:$0xff] (!%p1574_p6)  ;;  %v1233_v31 = vmul.f32 (!%p1574_p6), %v1169_v27, %v1105_v24 }
  0x5e   : > { %v1151_v59 = vld [vmem:[%s2711_s9] sm:$0xff] (!%p1574_p6)  ;;  %v1295_v61 = vadd.f32 (!%p1574_p6), %v1231_v53, %v1039_v47  ;;  %v1184_v17 = vld [vmem:[%s2711_s9 + $0x108] sm:$0xff] (!%p1574_p6)  ;;  %v1328_v25 = vadd.f32 (!%p1574_p6), %v1264_v14, %v1072_v2  ;;  %v1234_v32 = vmul.f32 (!%p1574_p6), %v1170_v28, %v1106_v26  ;;  %v1025_v33 = vld [vmem:[%s2709_s7 + $0x10] sm:$0xff] (!%p1574_p6) }
  0x5f   : > { %v1215_v63 = vmul.f32 (!%p1574_p6), %v1151_v59, %v1087_v57  ;;  %v1071_v1 = vld [vmem:[%s2709_s7 + $0x180] sm:$0xff] (!%p1574_p6)  ;;  %v1248_v21 = vmul.f32 (!%p1574_p6), %v1184_v17, %v1120_v15  ;;  %v1138_v48 = vld [vmem:[%s2710_s8 + $0x198] sm:$0xff] (!%p1574_p6)  ;;  %v1201_v49 = vld [vmem:[%s2711_s9 + $0x190] sm:$0xff] (!%p1574_p6) }
  0x60   : > { %896 = vmatmul.mubr.f32.vlgmr.msra.gmra.mrb[0].mxu0 %v830_v34  ;;  %967 = vmatmul.mubr.f32.vlgmr.msra.gmra.mrb[0].mxu1 %v830_v34  ;;  %v1135_v3 = vld [vmem:[%s2710_s8 + $0x180] sm:$0xff] (!%p1574_p6)  ;;  %v1714_v7 = vpack.c.bf16 (!%p1574_p6), %v1296_v62, %v1295_v61  ;;  %v1026_v34 = vld [vmem:[%s2709_s7 + $0x18] sm:$0xff] (!%p1574_p6)  ;;  %v1121_v57 = vld [vmem:[%s2710_s8 + $0x110] sm:$0xff] (!%p1574_p6) }
  0x61   : > { %v1199_v5 = vld [vmem:[%s2711_s9 + $0x180] sm:$0xff] (!%p1574_p6)  ;;  %v1279_v8 = vadd.f32 (!%p1574_p6), %v1215_v63, %v1023_v55  ;;  %v1312_v30 = vadd.f32 (!%p1574_p6), %v1248_v21, %v1056_v12  ;;  %v1202_v50 = vld [vmem:[%s2711_s9 + $0x198] sm:$0xff] (!%p1574_p6)  ;;  %v1057_v55 = vld [vmem:[%s2709_s7 + $0x110] sm:$0xff] (!%p1574_p6) }
  0x62   : > { %v1263_v10 = vmul.f32 (!%p1574_p6), %v1199_v5, %v1135_v3  ;;  %v1055_v11 = vld [vmem:[%s2709_s7 + $0x100] sm:$0xff] (!%p1574_p6)  ;;  %1715 = vmatprep.subr.bf16.mxu0 (!%p1574_p6), %v1714_v7  ;;  %v1266_v54 = vmul.f32 (!%p1574_p6), %v1202_v50, %v1138_v48  ;;  %v1058_v56 = vld [vmem:[%s2709_s7 + $0x118] sm:$0xff] (!%p1574_p6)  ;;  %v1185_v60 = vld [vmem:[%s2711_s9 + $0x110] sm:$0xff] (!%p1574_p6) }
  0x63   : > { %v1119_v13 = vld [vmem:[%s2710_s8 + $0x100] sm:$0xff] (!%p1574_p6)  ;;  %v1716_v18 = vpack.c.bf16 (!%p1574_p6), %v1280_v9, %v1279_v8  ;;  %v1122_v59 = vld [vmem:[%s2710_s8 + $0x118] sm:$0xff] (!%p1574_p6)  ;;  %v1249_v0 = vmul.f32 (!%p1574_p6), %v1185_v60, %v1121_v57  ;;  %v1044_v3 = vld [vmem:[%s2709_s7 + $0xa8] sm:$0xff] (!%p1574_p6) }
  0x64   : > { %v1183_v16 = vld [vmem:[%s2711_s9 + $0x100] sm:$0xff] (!%p1574_p6)  ;;  %v1327_v19 = vadd.f32 (!%p1574_p6), %v1263_v10, %v1071_v1  ;;  %v1186_v61 = vld [vmem:[%s2711_s9 + $0x118] sm:$0xff] (!%p1574_p6)  ;;  %v1108_v6 = vld [vmem:[%s2710_s8 + $0xa8] sm:$0xff] (!%p1574_p6) }
  0x65   : > { %v1247_v20 = vmul.f32 (!%p1574_p6), %v1183_v16, %v1119_v13  ;;  %1717 = vmatpush3.bf16.msra.mxu0 (!%p1574_p6), %v1716_v18  ;;  %v1250_v1 = vmul.f32 (!%p1574_p6), %v1186_v61, %v1122_v59  ;;  %v1043_v2 = vld [vmem:[%s2709_s7 + $0xa0] sm:$0xff] (!%p1574_p6)  ;;  %v1172_v8 = vld [vmem:[%s2711_s9 + $0xa8] sm:$0xff] (!%p1574_p6)  ;;  %v1313_v10 = vadd.f32 (!%p1574_p6), %v1249_v0, %v1057_v55  ;;  %v1109_v48 = vld [vmem:[%s2710_s8 + $0xb0] sm:$0xff] (!%p1574_p6) }
  0x66   : > { %v1107_v4 = vld [vmem:[%s2710_s8 + $0xa0] sm:$0xff] (!%p1574_p6)  ;;  %v1028_v14 = vld [vmem:[%s2709_s7 + $0x28] sm:$0xff] (!%p1574_p6)  ;;  %v1236_v16 = vmul.f32 (!%p1574_p6), %v1172_v8, %v1108_v6  ;;  %v1110_v50 = vld [vmem:[%s2710_s8 + $0xb8] sm:$0xff] (!%p1574_p6) }
  0x67   : > { %v1311_v29 = vadd.f32 (!%p1574_p6), %v1247_v20, %v1055_v11  ;;  %v1171_v7 = vld [vmem:[%s2711_s9 + $0xa0] sm:$0xff] (!%p1574_p6)  ;;  %v1314_v11 = vadd.f32 (!%p1574_p6), %v1250_v1, %v1058_v56  ;;  %v1092_v17 = vld [vmem:[%s2710_s8 + $0x28] sm:$0xff] (!%p1574_p6)  ;;  %v1029_v57 = vld [vmem:[%s2709_s7 + $0x30] sm:$0xff] (!%p1574_p6) }
  0x68   : > { %v1235_v12 = vmul.f32 (!%p1574_p6), %v1171_v7, %v1107_v4  ;;  %v1027_v13 = vld [vmem:[%s2709_s7 + $0x20] sm:$0xff] (!%p1574_p6)  ;;  %v1300_v27 = vadd.f32 (!%p1574_p6), %v1236_v16, %v1044_v3  ;;  %v1140_v28 = vld [vmem:[%s2710_s8 + $0x1a8] sm:$0xff] (!%p1574_p6)  ;;  %v1093_v59 = vld [vmem:[%s2710_s8 + $0x30] sm:$0xff] (!%p1574_p6) }
  0x69   : > { %v1091_v15 = vld [vmem:[%s2710_s8 + $0x20] sm:$0xff] (!%p1574_p6)  ;;  %v1752_v20 = vpack.c.bf16 (!%p1574_p6), %v1314_v11, %v1313_v10  ;;  %v1094_v61 = vld [vmem:[%s2710_s8 + $0x38] sm:$0xff] (!%p1574_p6)  ;;  %v1077_v4 = vld [vmem:[%s2709_s7 + $0x1b0] sm:$0xff] (!%p1574_p6) }
  0x6a   : > { %v1155_v18 = vld [vmem:[%s2711_s9 + $0x20] sm:$0xff] (!%p1574_p6)  ;;  %v1299_v21 = vadd.f32 (!%p1574_p6), %v1235_v12, %v1043_v2  ;;  %v1141_v6 = vld [vmem:[%s2710_s8 + $0x1b0] sm:$0xff] (!%p1574_p6)  ;;  %v1142_v8 = vld [vmem:[%s2710_s8 + $0x1b8] sm:$0xff] (!%p1574_p6) }
  0x6b   : > { %v1075_v24 = vld [vmem:[%s2709_s7 + $0x1a0] sm:$0xff] (!%p1574_p6)  ;;  %v1206_v10 = vld [vmem:[%s2711_s9 + $0x1b8] sm:$0xff] (!%p1574_p6) }
  0x6c   : > { %v1139_v26 = vld [vmem:[%s2710_s8 + $0x1a0] sm:$0xff] (!%p1574_p6)  ;;  %v1062_v16 = vld [vmem:[%s2709_s7 + $0x138] sm:$0xff] (!%p1574_p6) }
 0x131   : > { %984 = sbr.rel (%p1574_p6) target bundleno = 581 (0x245), region = 80 }
 0x133   : > { %v897_v37 = vpop.f32.mrb[0].mxu0  ;;  %v968_v42 = vpop.f32.mrb[0].mxu1 }
 0x134   : > { %v973_v39 = vadd.f32 %v897_v37, %v826_v35  ;;  %v899_v40 = vpop.f32.mrb[1].mxu0  ;;  %v975_v44 = vadd.f32 %v968_v42, %v828_v38  ;;  %v970_v45 = vpop.f32.mrb[1].mxu1  ;;  %v1089_v35 = vld [vmem:[%s2710_s8 + $0x10] sm:$0xff] (!%p1574_p6)  ;;  %v1090_v37 = vld [vmem:[%s2710_s8 + $0x18] sm:$0xff] (!%p1574_p6)  ;;  %v1298_v42 = vadd.f32 (!%p1574_p6), %v1234_v32, %v1042_v23 }
 0x135   : > { %v974_v43 = vadd.f32 %v899_v40, %v827_v36  ;;  %v976_v46 = vadd.f32 %v970_v45, %v829_v41  ;;  %v1746_v36 = vpack.c.bf16 (!%p1574_p6), %v1328_v25, %v1327_v19  ;;  %v1153_v38 = vld [vmem:[%s2711_s9 + $0x10] sm:$0xff] (!%p1574_p6)  ;;  %v1748_v40 = vpack.c.bf16 (!%p1574_p6), %v1312_v30, %v1311_v29  ;;  %v1074_v45 = vld [vmem:[%s2709_s7 + $0x198] sm:$0xff] (!%p1574_p6)  ;;  %v1156_v19 = vld [vmem:[%s2711_s9 + $0x28] sm:$0xff] (!%p1574_p6) }
 0x136   : > { %977 = vst [vmem:[#allocation2] sm:$0xff] %v973_v39  ;;  %979 = vst [vmem:[#allocation2 + $0x10] sm:$0xff] %v975_v44  ;;  %v1154_v39 = vld [vmem:[%s2711_s9 + $0x18] sm:$0xff] (!%p1574_p6)  ;;  %v1297_v41 = vadd.f32 (!%p1574_p6), %v1233_v31, %v1041_v22  ;;  %v1073_v44 = vld [vmem:[%s2709_s7 + $0x190] sm:$0xff] (!%p1574_p6)  ;;  %v1330_v63 = vadd.f32 (!%p1574_p6), %v1266_v54, %v1074_v45  ;;  %v1219_v22 = vmul.f32 (!%p1574_p6), %v1155_v18, %v1091_v15 }
 0x137   : > { %978 = vst [vmem:[#allocation2 + $0x8] sm:$0xff] %v974_v43  ;;  %980 = vst [vmem:[#allocation2 + $0x18] sm:$0xff] %v976_v46  ;;  %v1217_v43 = vmul.f32 (!%p1574_p6), %v1153_v38, %v1089_v35  ;;  %v1137_v46 = vld [vmem:[%s2710_s8 + $0x190] sm:$0xff] (!%p1574_p6)  ;;  %1747 = vmatprep.subr.bf16.mxu1 (!%p1574_p6), %v1746_v36  ;;  %v1218_v47 = vmul.f32 (!%p1574_p6), %v1154_v39, %v1090_v37  ;;  %v1220_v23 = vmul.f32 (!%p1574_p6), %v1156_v19, %v1092_v17  ;;  %v1076_v25 = vld [vmem:[%s2709_s7 + $0x1a8] sm:$0xff] (!%p1574_p6) }
 0x138   : > { %1749 = vmatpush3.bf16.msra.mxu1 %v1748_v40  ;;  %v1718_v51 = vpack.c.bf16 %v1298_v42, %v1297_v41  ;;  %v1265_v53 = vmul.f32 %v1201_v49, %v1137_v46  ;;  %v1203_v29 = vld [vmem:[%s2711_s9 + $0x1a0] sm:$0xff]  ;;  %v1204_v30 = vld [vmem:[%s2711_s9 + $0x1a8] sm:$0xff]  ;;  %v1283_v31 = vadd.f32 %v1219_v22, %v1027_v13  ;;  %v1722_v38 = vpack.c.bf16 %v1300_v27, %v1299_v21  ;;  %v1045_v46 = vld [vmem:[%s2709_s7 + $0xb0] sm:$0xff] }
 0x139   : > { %v1281_v52 = vadd.f32 %v1217_v43, %v1025_v33  ;;  %v1282_v58 = vadd.f32 %v1218_v47, %v1026_v34  ;;  %v1284_v32 = vadd.f32 %v1220_v23, %v1028_v14  ;;  %v1267_v33 = vmul.f32 %v1203_v29, %v1139_v26  ;;  %v1059_v35 = vld [vmem:[%s2709_s7 + $0x120] sm:$0xff]  ;;  %v1060_v36 = vld [vmem:[%s2709_s7 + $0x128] sm:$0xff]  ;;  %v1046_v47 = vld [vmem:[%s2709_s7 + $0xb8] sm:$0xff] }
 0x13a   : > { %1719 = vmatprep.subr.bf16.mxu0 %v1718_v51  ;;  %v1329_v62 = vadd.f32 %v1265_v53, %v1073_v44  ;;  %v1268_v34 = vmul.f32 %v1204_v30, %v1140_v28  ;;  %v1123_v37 = vld [vmem:[%s2710_s8 + $0x120] sm:$0xff]  ;;  %v1124_v39 = vld [vmem:[%s2710_s8 + $0x128] sm:$0xff]  ;;  %v1173_v51 = vld [vmem:[%s2711_s9 + $0xb0] sm:$0xff]  ;;  %v1270_v18 = vmul.f32 %v1206_v10, %v1142_v8 }
 0x13b   : > { %v1720_v5 = vpack.c.bf16 %v1282_v58, %v1281_v52  ;;  %v1187_v40 = vld [vmem:[%s2711_s9 + $0x120] sm:$0xff]  ;;  %v1188_v41 = vld [vmem:[%s2711_s9 + $0x128] sm:$0xff]  ;;  %v1724_v42 = vpack.c.bf16 %v1284_v32, %v1283_v31  ;;  %v1331_v43 = vadd.f32 %v1267_v33, %v1075_v24  ;;  %v1174_v52 = vld [vmem:[%s2711_s9 + $0xb8] sm:$0xff]  ;;  %v1237_v55 = vmul.f32 %v1173_v51, %v1109_v48 }
 0x13c   : > { %v1750_v9 = vpack.c.bf16 %v1330_v63, %v1329_v62  ;;  %v1332_v44 = vadd.f32 %v1268_v34, %v1076_v25  ;;  %v1251_v45 = vmul.f32 %v1187_v40, %v1123_v37  ;;  %v1252_v49 = vmul.f32 %v1188_v41, %v1124_v39  ;;  %v1030_v58 = vld [vmem:[%s2709_s7 + $0x38] sm:$0xff]  ;;  %v1157_v62 = vld [vmem:[%s2711_s9 + $0x30] sm:$0xff]  ;;  %v1047_v26 = vld [vmem:[%s2709_s7 + $0xc0] sm:$0xff] }
 0x13d   : > { %1721 = vmatpush3.bf16.msra.mxu0 %v1720_v5  ;;  %v1238_v56 = vmul.f32 %v1174_v52, %v1110_v50  ;;  %v1158_v63 = vld [vmem:[%s2711_s9 + $0x38] sm:$0xff]  ;;  %v1301_v0 = vadd.f32 %v1237_v55, %v1045_v46  ;;  %v1221_v2 = vmul.f32 %v1157_v62, %v1093_v59  ;;  %v1061_v15 = vld [vmem:[%s2709_s7 + $0x130] sm:$0xff]  ;;  %v1048_v27 = vld [vmem:[%s2709_s7 + $0xc8] sm:$0xff] }
 0x13e   : > { %1751 = vmatprep.subr.bf16.mxu1 %v1750_v9  ;;  %1723 = vmatprep.subr.bf16.mxu0 %v1722_v38  ;;  %v1754_v53 = vpack.c.bf16 %v1332_v44, %v1331_v43  ;;  %v1315_v54 = vadd.f32 %v1251_v45, %v1059_v35  ;;  %v1316_v60 = vadd.f32 %v1252_v49, %v1060_v36  ;;  %v1078_v5 = vld [vmem:[%s2709_s7 + $0x1b8] sm:$0xff]  ;;  %v1205_v9 = vld [vmem:[%s2711_s9 + $0x1b0] sm:$0xff]  ;;  %v1111_v28 = vld [vmem:[%s2710_s8 + $0xc0] sm:$0xff] }
 0x13f   : > { %1753 = vmatpush3.bf16.msra.mxu1 %v1752_v20  ;;  %v1302_v1 = vadd.f32 %v1238_v56, %v1046_v47  ;;  %v1222_v3 = vmul.f32 %v1158_v63, %v1094_v61  ;;  %v1285_v12 = vadd.f32 %v1221_v2, %v1029_v57  ;;  %v1269_v14 = vmul.f32 %v1205_v9, %v1141_v6  ;;  %v1125_v17 = vld [vmem:[%s2710_s8 + $0x130] sm:$0xff]  ;;  %v1126_v19 = vld [vmem:[%s2710_s8 + $0x138] sm:$0xff]  ;;  %v1112_v30 = vld [vmem:[%s2710_s8 + $0xc8] sm:$0xff] }
 0x140   : > { %1755 = vmatprep.subr.bf16.mxu1 %v1754_v53  ;;  %v1756_v7 = vpack.c.bf16 %v1316_v60, %v1315_v54  ;;  %v1189_v20 = vld [vmem:[%s2711_s9 + $0x130] sm:$0xff]  ;;  %v1190_v21 = vld [vmem:[%s2711_s9 + $0x138] sm:$0xff]  ;;  %v1334_v29 = vadd.f32 %v1270_v18, %v1078_v5  ;;  %v1175_v31 = vld [vmem:[%s2711_s9 + $0xc0] sm:$0xff] }
 0x141   : > { %1725 = vmatpush3.bf16.msra.mxu0 %v1724_v42  ;;  %v1726_v11 = vpack.c.bf16 %v1302_v1, %v1301_v0  ;;  %v1286_v13 = vadd.f32 %v1222_v3, %v1030_v58  ;;  %v1333_v23 = vadd.f32 %v1269_v14, %v1077_v4  ;;  %v1253_v24 = vmul.f32 %v1189_v20, %v1125_v17  ;;  %v1176_v32 = vld [vmem:[%s2711_s9 + $0xc8] sm:$0xff]  ;;  %v1031_v37 = vld [vmem:[%s2709_s7 + $0x40] sm:$0xff]  ;;  %v1049_v6 = vld [vmem:[%s2709_s7 + $0xd0] sm:$0xff] }
 0x142   : > { %v1254_v25 = vmul.f32 %v1190_v21, %v1126_v19  ;;  %v1239_v35 = vmul.f32 %v1175_v31, %v1111_v28  ;;  %v1240_v36 = vmul.f32 %v1176_v32, %v1112_v30  ;;  %v1032_v38 = vld [vmem:[%s2709_s7 + $0x48] sm:$0xff]  ;;  %v1095_v39 = vld [vmem:[%s2710_s8 + $0x40] sm:$0xff]  ;;  %v1113_v8 = vld [vmem:[%s2710_s8 + $0xd0] sm:$0xff] }
 0x143   : > { %1757 = vmatpush3.bf16.msra.mxu1 %v1756_v7  ;;  %1727 = vmatprep.subr.bf16.mxu0 %v1726_v11  ;;  %v1728_v22 = vpack.c.bf16 %v1286_v13, %v1285_v12  ;;  %v1317_v33 = vadd.f32 %v1253_v24, %v1061_v15  ;;  %v1758_v40 = vpack.c.bf16 %v1334_v29, %v1333_v23  ;;  %v1096_v41 = vld [vmem:[%s2710_s8 + $0x48] sm:$0xff]  ;;  %v1159_v42 = vld [vmem:[%s2711_s9 + $0x40] sm:$0xff]  ;;  %v1050_v7 = vld [vmem:[%s2709_s7 + $0xd8] sm:$0xff] }
 0x144   : > { %v1318_v34 = vadd.f32 %v1254_v25, %v1062_v16  ;;  %v1160_v43 = vld [vmem:[%s2711_s9 + $0x48] sm:$0xff]  ;;  %v1303_v45 = vadd.f32 %v1239_v35, %v1047_v26  ;;  %v1304_v46 = vadd.f32 %v1240_v36, %v1048_v27  ;;  %v1223_v47 = vmul.f32 %v1159_v42, %v1095_v39  ;;  %v1079_v48 = vld [vmem:[%s2709_s7 + $0x1c0] sm:$0xff]  ;;  %v1114_v10 = vld [vmem:[%s2710_s8 + $0xd8] sm:$0xff] }
 0x145   : > { %1729 = vmatpush3.bf16.msra.mxu0 %v1728_v22  ;;  %v1080_v49 = vld [vmem:[%s2709_s7 + $0x1c8] sm:$0xff]  ;;  %v1143_v50 = vld [vmem:[%s2710_s8 + $0x1c0] sm:$0xff]  ;;  %1759 = vmatprep.subr.bf16.mxu1 %v1758_v40  ;;  %v1224_v51 = vmul.f32 %v1160_v43, %v1096_v41  ;;  %v1177_v11 = vld [vmem:[%s2711_s9 + $0xd0] sm:$0xff] }
 0x146   : > { %v1760_v44 = vpack.c.bf16 %v1318_v34, %v1317_v33  ;;  %v1144_v52 = vld [vmem:[%s2710_s8 + $0x1c8] sm:$0xff]  ;;  %v1207_v53 = vld [vmem:[%s2711_s9 + $0x1c0] sm:$0xff]  ;;  %v1730_v55 = vpack.c.bf16 %v1304_v46, %v1303_v45  ;;  %v1287_v56 = vadd.f32 %v1223_v47, %v1031_v37  ;;  %v1178_v12 = vld [vmem:[%s2711_s9 + $0xd8] sm:$0xff]  ;;  %v1241_v16 = vmul.f32 %v1177_v11, %v1113_v8 }
 0x147   : > { %v1208_v54 = vld [vmem:[%s2711_s9 + $0x1c8] sm:$0xff]  ;;  %v1271_v57 = vmul.f32 %v1207_v53, %v1143_v50  ;;  %v1063_v59 = vld [vmem:[%s2709_s7 + $0x140] sm:$0xff]  ;;  %v1288_v62 = vadd.f32 %v1224_v51, %v1032_v38  ;;  %v1033_v17 = vld [vmem:[%s2709_s7 + $0x50] sm:$0xff]  ;;  %v1242_v20 = vmul.f32 %v1178_v12, %v1114_v10 }
 0x148   : > { %1761 = vmatpush3.bf16.msra.mxu1 %v1760_v44  ;;  %v1272_v58 = vmul.f32 %v1208_v54, %v1144_v52  ;;  %v1064_v60 = vld [vmem:[%s2709_s7 + $0x148] sm:$0xff]  ;;  %v1127_v61 = vld [vmem:[%s2710_s8 + $0x140] sm:$0xff]  ;;  %1731 = vmatprep.subr.bf16.mxu0 %v1730_v55  ;;  %v1034_v18 = vld [vmem:[%s2709_s7 + $0x58] sm:$0xff]  ;;  %v1305_v25 = vadd.f32 %v1241_v16, %v1049_v6 }
 0x149   : > { %v1128_v63 = vld [vmem:[%s2710_s8 + $0x148] sm:$0xff]  ;;  %v1191_v0 = vld [vmem:[%s2711_s9 + $0x140] sm:$0xff]  ;;  %v1335_v2 = vadd.f32 %v1271_v57, %v1079_v48  ;;  %v1732_v9 = vpack.c.bf16 %v1288_v62, %v1287_v56  ;;  %v1097_v19 = vld [vmem:[%s2710_s8 + $0x50] sm:$0xff]  ;;  %v1306_v31 = vadd.f32 %v1242_v20, %v1050_v7 }
 0x14a   : > { %v1192_v1 = vld [vmem:[%s2711_s9 + $0x148] sm:$0xff]  ;;  %v1336_v3 = vadd.f32 %v1272_v58, %v1080_v49  ;;  %v1255_v4 = vmul.f32 %v1191_v0, %v1127_v61  ;;  %v1098_v21 = vld [vmem:[%s2710_s8 + $0x58] sm:$0xff]  ;;  %v1161_v22 = vld [vmem:[%s2711_s9 + $0x50] sm:$0xff] }
 0x14b   : > { %v1256_v5 = vmul.f32 %v1192_v1, %v1128_v63  ;;  %1733 = vmatpush3.bf16.msra.mxu0 %v1732_v9  ;;  %v1162_v23 = vld [vmem:[%s2711_s9 + $0x58] sm:$0xff]  ;;  %v1225_v26 = vmul.f32 %v1161_v22, %v1097_v19  ;;  %v1081_v28 = vld [vmem:[%s2709_s7 + $0x1d0] sm:$0xff]  ;;  %v1734_v42 = vpack.c.bf16 %v1306_v31, %v1305_v25  ;;  %v1051_v50 = vld [vmem:[%s2709_s7 + $0xe0] sm:$0xff] }
 0x14c   : > { %v1762_v13 = vpack.c.bf16 %v1336_v3, %v1335_v2  ;;  %v1319_v14 = vadd.f32 %v1255_v4, %v1063_v59  ;;  %v1226_v27 = vmul.f32 %v1162_v23, %v1098_v21  ;;  %v1082_v29 = vld [vmem:[%s2709_s7 + $0x1d8] sm:$0xff]  ;;  %v1145_v30 = vld [vmem:[%s2710_s8 + $0x1d0] sm:$0xff]  ;;  %v1052_v51 = vld [vmem:[%s2709_s7 + $0xe8] sm:$0xff] }
 0x14d   : > { %v1320_v15 = vadd.f32 %v1256_v5, %v1064_v60  ;;  %v1146_v32 = vld [vmem:[%s2710_s8 + $0x1d8] sm:$0xff]  ;;  %v1209_v33 = vld [vmem:[%s2711_s9 + $0x1d0] sm:$0xff]  ;;  %v1289_v35 = vadd.f32 %v1225_v26, %v1033_v17  ;;  %v1115_v52 = vld [vmem:[%s2710_s8 + $0xe0] sm:$0xff]  ;;  %1735 = vmatprep.subr.bf16.mxu0 %v1734_v42  ;;  %v995_v26 = vlaneseq }
 0x14e   : > { %1763 = vmatprep.subr.bf16.mxu1 %v1762_v13  ;;  %v1210_v34 = vld [vmem:[%s2711_s9 + $0x1d8] sm:$0xff]  ;;  %v1290_v36 = vadd.f32 %v1226_v27, %v1034_v18  ;;  %v1273_v37 = vmul.f32 %v1209_v33, %v1145_v30  ;;  %v1065_v39 = vld [vmem:[%s2709_s7 + $0x150] sm:$0xff]  ;;  %v1116_v54 = vld [vmem:[%s2710_s8 + $0xe8] sm:$0xff] }
 0x14f   : > { %v1764_v24 = vpack.c.bf16 %v1320_v15, %v1319_v14  ;;  %v1274_v38 = vmul.f32 %v1210_v34, %v1146_v32  ;;  %v1066_v40 = vld [vmem:[%s2709_s7 + $0x158] sm:$0xff]  ;;  %v1129_v41 = vld [vmem:[%s2710_s8 + $0x150] sm:$0xff]  ;;  %v1179_v55 = vld [vmem:[%s2711_s9 + $0xe0] sm:$0xff] }
 0x150   : > { %v1130_v43 = vld [vmem:[%s2710_s8 + $0x158] sm:$0xff]  ;;  %v1193_v44 = vld [vmem:[%s2711_s9 + $0x150] sm:$0xff]  ;;  %v1736_v46 = vpack.c.bf16 %v1290_v36, %v1289_v35  ;;  %v1337_v47 = vadd.f32 %v1273_v37, %v1081_v28  ;;  %v1180_v56 = vld [vmem:[%s2711_s9 + $0xe8] sm:$0xff]  ;;  %v1243_v59 = vmul.f32 %v1179_v55, %v1115_v52 }
 0x151   : > { %1765 = vmatpush3.bf16.msra.mxu1 %v1764_v24  ;;  %v1194_v45 = vld [vmem:[%s2711_s9 + $0x158] sm:$0xff]  ;;  %v1338_v48 = vadd.f32 %v1274_v38, %v1082_v29  ;;  %v1257_v49 = vmul.f32 %v1193_v44, %v1129_v41  ;;  %v1244_v60 = vmul.f32 %v1180_v56, %v1116_v54  ;;  %v1035_v61 = vld [vmem:[%s2709_s7 + $0x60] sm:$0xff]  ;;  %v1036_v62 = vld [vmem:[%s2709_s7 + $0x68] sm:$0xff] }
 0x152   : > { %v1258_v53 = vmul.f32 %v1194_v45, %v1130_v43  ;;  %1737 = vmatpush3.bf16.msra.mxu0 %v1736_v46  ;;  %v1099_v63 = vld [vmem:[%s2710_s8 + $0x60] sm:$0xff]  ;;  %v1100_v1 = vld [vmem:[%s2710_s8 + $0x68] sm:$0xff]  ;;  %v1307_v4 = vadd.f32 %v1243_v59, %v1051_v50  ;;  %v1053_v31 = vld [vmem:[%s2709_s7 + $0xf0] sm:$0xff] }
 0x153   : > { %v1766_v57 = vpack.c.bf16 %v1338_v48, %v1337_v47  ;;  %v1321_v58 = vadd.f32 %v1257_v49, %v1065_v39  ;;  %v1163_v2 = vld [vmem:[%s2711_s9 + $0x60] sm:$0xff]  ;;  %v1164_v3 = vld [vmem:[%s2711_s9 + $0x68] sm:$0xff]  ;;  %v1308_v5 = vadd.f32 %v1244_v60, %v1052_v51  ;;  %v1054_v32 = vld [vmem:[%s2709_s7 + $0xf8] sm:$0xff]  ;;  %v2636_v49 = vshrl.u32 %v995_v26, 7 }
 0x154   : > { %v1322_v0 = vadd.f32 %v1258_v53, %v1066_v40  ;;  %v1227_v6 = vmul.f32 %v1163_v2, %v1099_v63  ;;  %v1228_v7 = vmul.f32 %v1164_v3, %v1100_v1  ;;  %v1083_v8 = vld [vmem:[%s2709_s7 + $0x1e0] sm:$0xff]  ;;  %v1084_v9 = vld [vmem:[%s2709_s7 + $0x1e8] sm:$0xff]  ;;  %v1117_v33 = vld [vmem:[%s2710_s8 + $0xf0] sm:$0xff] }
 0x155   : > { %1767 = vmatprep.subr.bf16.mxu1 %v1766_v57  ;;  %v1147_v10 = vld [vmem:[%s2710_s8 + $0x1e0] sm:$0xff]  ;;  %v1148_v12 = vld [vmem:[%s2710_s8 + $0x1e8] sm:$0xff]  ;;  %v1738_v15 = vpack.c.bf16 %v1308_v5, %v1307_v4  ;;  %v1118_v35 = vld [vmem:[%s2710_s8 + $0xf8] sm:$0xff] }
 0x156   : > { %v1768_v11 = vpack.c.bf16 %v1322_v0, %v1321_v58  ;;  %v1211_v13 = vld [vmem:[%s2711_s9 + $0x1e0] sm:$0xff]  ;;  %v1212_v14 = vld [vmem:[%s2711_s9 + $0x1e8] sm:$0xff]  ;;  %v1291_v16 = vadd.f32 %v1227_v6, %v1035_v61  ;;  %v1292_v17 = vadd.f32 %v1228_v7, %v1036_v62  ;;  %v1181_v36 = vld [vmem:[%s2711_s9 + $0xf0] sm:$0xff] }
 0x157   : > { %v1275_v18 = vmul.f32 %v1211_v13, %v1147_v10  ;;  %v1067_v19 = vld [vmem:[%s2709_s7 + $0x160] sm:$0xff]  ;;  %v1068_v20 = vld [vmem:[%s2709_s7 + $0x168] sm:$0xff]  ;;  %v1276_v22 = vmul.f32 %v1212_v14, %v1148_v12  ;;  %1739 = vmatprep.subr.bf16.mxu0 %v1738_v15  ;;  %v1182_v37 = vld [vmem:[%s2711_s9 + $0xf8] sm:$0xff]  ;;  %v1245_v40 = vmul.f32 %v1181_v36, %v1117_v33 }
 0x158   : > { %v1131_v21 = vld [vmem:[%s2710_s8 + $0x160] sm:$0xff]  ;;  %1769 = vmatpush3.bf16.msra.mxu1 %v1768_v11  ;;  %v1132_v23 = vld [vmem:[%s2710_s8 + $0x168] sm:$0xff]  ;;  %v1740_v27 = vpack.c.bf16 %v1292_v17, %v1291_v16  ;;  %v1246_v41 = vmul.f32 %v1182_v37, %v1118_v35  ;;  %v1037_v42 = vld [vmem:[%s2709_s7 + $0x70] sm:$0xff] }
 0x159   : > { %v1195_v24 = vld [vmem:[%s2711_s9 + $0x160] sm:$0xff]  ;;  %v1196_v25 = vld [vmem:[%s2711_s9 + $0x168] sm:$0xff]  ;;  %v1339_v28 = vadd.f32 %v1275_v18, %v1083_v8  ;;  %v1340_v34 = vadd.f32 %v1276_v22, %v1084_v9  ;;  %v1038_v43 = vld [vmem:[%s2709_s7 + $0x78] sm:$0xff]  ;;  %v1309_v51 = vadd.f32 %v1245_v40, %v1053_v31  ;;  %v1001_v8 = vsub.s32 1, %v2636_v49 }
 0x15a   : > { %v1259_v29 = vmul.f32 %v1195_v24, %v1131_v21  ;;  %v1260_v30 = vmul.f32 %v1196_v25, %v1132_v23  ;;  %1741 = vmatpush3.bf16.msra.mxu0 %v1740_v27  ;;  %v1101_v44 = vld [vmem:[%s2710_s8 + $0x70] sm:$0xff]  ;;  %v1102_v46 = vld [vmem:[%s2710_s8 + $0x78] sm:$0xff]  ;;  %v1310_v52 = vadd.f32 %v1246_v41, %v1054_v32  ;;  %v997_v9 = vsub.s32 0, %v2636_v49  ;;  %v985_v14 = vld [vmem:[%s2706_s4] sm:$0xf] }
 0x15b   : > { %v1770_v45 = vpack.c.bf16 %v1340_v34, %v1339_v28  ;;  %v1165_v47 = vld [vmem:[%s2711_s9 + $0x70] sm:$0xff]  ;;  %v1166_v48 = vld [vmem:[%s2711_s9 + $0x78] sm:$0xff]  ;;  %v986_v15 = vld [vmem:[%s2707_s5] sm:$0xf] }
 0x15c   : > { %v1323_v38 = vadd.f32 %v1259_v29, %v1067_v19  ;;  %v1324_v39 = vadd.f32 %v1260_v30, %v1068_v20  ;;  %v1229_v53 = vmul.f32 %v1165_v47, %v1101_v44  ;;  %v1085_v54 = vld [vmem:[%s2709_s7 + $0x1f0] sm:$0xff]  ;;  %v1086_v55 = vld [vmem:[%s2709_s7 + $0x1f8] sm:$0xff]  ;;  %v1230_v57 = vmul.f32 %v1166_v48, %v1102_v46  ;;  %v987_v16 = vld [vmem:[%s2708_s6] sm:$0xf] }
 0x15d   : > { %v1149_v56 = vld [vmem:[%s2710_s8 + $0x1f0] sm:$0xff]  ;;  %1771 = vmatprep.subr.bf16.mxu1 %v1770_v45  ;;  %v1150_v58 = vld [vmem:[%s2710_s8 + $0x1f8] sm:$0xff]  ;;  %v1742_v61 = vpack.c.bf16 %v1310_v52, %v1309_v51  ;;  %v988_v18 = vmul.f32 %v987_v16, %v986_v15  ;;  %v1009_v19 = vsub.s32 3, %v2636_v49  ;;  %v1005_v20 = vsub.s32 2, %v2636_v49  ;;  %v991_v25 = vld [vmem:[#allocation2 + $0x8] sm:$0xff] }
 0x15e   : > { %v1772_v50 = vpack.c.bf16 %v1324_v39, %v1323_v38  ;;  %v1213_v59 = vld [vmem:[%s2711_s9 + $0x1f0] sm:$0xff]  ;;  %v1214_v60 = vld [vmem:[%s2711_s9 + $0x1f8] sm:$0xff]  ;;  %v1293_v62 = vadd.f32 %v1229_v53, %v1037_v42  ;;  %v1294_v4 = vadd.f32 %v1230_v57, %v1038_v43  ;;  %v990_v27 = vld [vmem:[#allocation2] sm:$0xff] }
 0x15f   : > { %v1277_v63 = vmul.f32 %v1213_v59, %v1149_v56  ;;  %v1278_v0 = vmul.f32 %v1214_v60, %v1150_v58  ;;  %v1069_v1 = vld [vmem:[%s2709_s7 + $0x170] sm:$0xff]  ;;  %v1070_v2 = vld [vmem:[%s2709_s7 + $0x178] sm:$0xff]  ;;  %1743 = vmatprep.subr.bf16.mxu0 %v1742_v61  ;;  %v989_v24 = vadd.f32 %v988_v18, %v985_v14  ;;  %v1344_v42 = vld [vmem:[%s2713_s11] sm:$0x1] }
 0x160   : > { %1773 = vmatpush3.bf16.msra.mxu1 %v1772_v50  ;;  %v1133_v3 = vld [vmem:[%s2710_s8 + $0x170] sm:$0xff]  ;;  %v1134_v5 = vld [vmem:[%s2710_s8 + $0x178] sm:$0xff]  ;;  %v1744_v17 = vpack.c.bf16 %v1294_v4, %v1293_v62  ;;  %v1345_v43 = vld [vmem:[%s2714_s12] sm:$0x1] }
 0x161   : > { %v1197_v6 = vld [vmem:[%s2711_s9 + $0x170] sm:$0xff]  ;;  %v1198_v7 = vld [vmem:[%s2711_s9 + $0x178] sm:$0xff]  ;;  %v1341_v10 = vadd.f32 %v1277_v63, %v1085_v54  ;;  %v1342_v11 = vadd.f32 %v1278_v0, %v1086_v55  ;;  %v1002_v30 = vrot.slane %v989_v24, %v1001_v8  ;;  %v998_v31 = vrot.slane %v989_v24, %v997_v9  ;;  %v1343_v45 = vld [vmem:[%s2712_s10] sm:$0x1] }
 0x162   : > { %v1261_v12 = vmul.f32 %v1197_v6, %v1133_v3  ;;  %v1262_v13 = vmul.f32 %v1198_v7, %v1134_v5  ;;  %1745 = vmatpush3.bf16.msra.mxu0 %v1744_v17  ;;  %v993_v28 = vld [vmem:[#allocation2 + $0x18] sm:$0xff]  ;;  %v992_v29 = vld [vmem:[#allocation2 + $0x10] sm:$0xff]  ;;  %v1010_v32 = vrot.slane %v989_v24, %v1009_v19  ;;  %v1006_v33 = vrot.slane %v989_v24, %v1005_v20 }
 0x163   : > { %v1774_v21 = vpack.c.bf16 %v1342_v11, %v1341_v10  ;;  %v1016_v34 = vadd.f32 %v1002_v30, %v991_v25  ;;  %v1015_v35 = vadd.f32 %v998_v31, %v990_v27  ;;  %v1346_v44 = vmul.f32 %v1345_v43, %v1344_v42 }
 0x164   : > { %v1325_v22 = vadd.f32 %v1261_v12, %v1069_v1  ;;  %v1326_v23 = vadd.f32 %v1262_v13, %v1070_v2  ;;  %v1018_v36 = vadd.f32 %v1010_v32, %v993_v28  ;;  %v1017_v37 = vadd.f32 %v1006_v33, %v992_v29 }
 0x165   : > { %1775 = vmatprep.subr.bf16.mxu1 %v1774_v21  ;;  %v1020_v38 = vmax.f32 %v1016_v34, 0.0  ;;  %v1019_v39 = vmax.f32 %v1015_v35, 0.0  ;;  %v1347_v46 = vadd.f32 %v1346_v44, %v1343_v45 }
 0x166   : > { %v1776_v26 = vpack.c.bf16 %v1326_v23, %v1325_v22  ;;  %v1022_v40 = vmax.f32 %v1018_v36, 0.0  ;;  %v1021_v41 = vmax.f32 %v1017_v37, 0.0 }
 0x167   : > { %1418 = vmatprep.mubr.f32.mxu0 %v1020_v38  ;;  %v1352_v48 = vrot.slane %v1347_v46, %v997_v9 }
 0x168   : > { %1777 = vmatpush3.bf16.msra.mxu1 %v1776_v26  ;;  %1488 = vmatprep.mubr.f32.mxu1 %v1022_v40 }
 0x169   : > { %1419 = vmatmul.mubr.f32.vlgmr.msra.gmra.mrb[0].mxu0 %v1019_v39 }
 0x16b   : > { %1489 = vmatmul.mubr.f32.vlgmr.msra.gmra.mrb[0].mxu1 %v1021_v41 }
 0x23c   : > { %v1612_v47 = vpop.f32.mrb[0].mxu0 }
 0x23d   : > { %v1613_v50 = vpop.f32.mrb[1].mxu0 }
 0x23e   : > { %v1647_v49 = vpop.f32.mrb[0].mxu1  ;;  %v1614_v52 = vadd.f32 %v1613_v50, %v1612_v47 }
 0x23f   : > { %v1648_v51 = vpop.f32.mrb[1].mxu1 }
 0x240   : > { %v1649_v53 = vadd.f32 %v1648_v51, %v1647_v49  ;;  %v1421_v54 = vadd.f32 %v1614_v52, %v1352_v48 }
 0x242   : > { %v1491_v55 = vadd.f32 %v1649_v53, %v1421_v54 }
 0x244   : > { %1494 = vst [vmem:[%s2715_s13] sm:$0xff] %v1491_v55 }
 0x245 PF: > { %s23_s25 = sadd.s32 1, %s1794_s25  }
 0x246   : > { %p20_p7 = scmp.ge.s32.totalorder %s23_s25, 4  }
 0x248   :  { %22 = sbr.rel (!%p20_p7) target bundleno = 1 (0x1), region = 115 }

</bundles_post_ra>
